<compile_context>
chip_gen: v7x
topology: tpu7x:2x2x1
jax: 0.10.0
libtpu: 0.0.40
codegen_flags: <defaults>
</compile_context>

<pallas_src>
import jax
import jax.numpy as jnp
from jax import lax
from jax.experimental import pallas as pl
from jax.experimental.pallas import tpu as pltpu

BN_EPS = 1e-5


def get_shape():
    # Mirrors the module's (external) data-shape helper: (C, H, W) of one sample.
    return (1, 1, 16)


# ----------------------------------------------------------------------------
# Fused forward kernel: everything stays VMEM / register resident.
# ----------------------------------------------------------------------------
def bilstm_kernel(
    x_ref,        # (T*N, I)       row = t*N + n, I = num_outputs (LSTM input size)
    pe_ref,       # (T*N, 1)       pe value, broadcast over the feature axis in-kernel
    wf0_ref,      # (I, 8H)        layer-0 fwd input projection, gate-major/dir-minor cols
    wr0_ref,      # (I, 8H)        layer-0 rev input projection (zero in fwd sub-columns)
    whh0_ref,     # (2H, 8H)       layer-0 block-diagonal recurrent weight
    b0_ref,       # (1, 8H)        layer-0 fused bias (b_ih + b_hh, both directions)
    wf1_ref, wr1_ref, whh1_ref, b1_ref,              # layer 1, input size 2H
    c1w_ref,      # (3, C1, T)     conv-1 weight, tap-major
    c1b_ref, c1g_ref, c1bt_ref,                      # (C1, 1) bias / BN gamma / BN beta
    c1edge_ref,   # (2, N*2H)      row 0: left-tap valid mask, row 1: right-tap valid
    pool_even_ref,  # (2H, H)      batch-independent even-lane selector (MaxPool1d(2))
    pool_odd_ref,   # (2H, H)      batch-independent odd-lane selector
    c2w_ref,      # (3, C2, C1)
    c2b_ref, c2g_ref, c2bt_ref,                      # (C2, 1)
    c2edge_ref,   # (2, N*H)
    f1w_ref,      # (C2*L2, M1)    Linear(256, 16) weight, already transposed
    f1b_ref,      # (1, M1)
    f2w_ref,      # (M1, num_outputs)  (already transposed)
    f2b_ref,      # (1, num_outputs)
    out_ref,      # (N, num_outputs)
    x1_ref,       # VMEM scratch (T*N, 2H): layer-0 bidirectional output slab
    act_ref,      # VMEM scratch (T, N*2H): layer-1 output in conv-slab layout
):
    f32 = jnp.float32
    N = out_ref.shape[0]
    TN = x_ref.shape[0]
    T = TN // N
    H = whh0_ref.shape[0] // 2

    def sigmoid(z):
        # EUP exp + approx reciprocal (vrcp) -- keeps the precise divide off the VPU.
        return pl.reciprocal(1.0 + jnp.exp(-z), approx=True)

    # ---- positional-encoding add (broadcast over features, in-kernel) ----
    xin = x_ref[...] + pe_ref[...]                                    # (T*N, I)

    # ---- direction-fused bidirectional LSTM layer ----
    # Gate columns (8H total) are gate-major / direction-minor:
    #   [i_f i_r | f_f f_r | g_f g_r | o_f o_r], each sub-block H wide.
    # h, c packed (N, 2H) = [fwd H | rev H].  One recurrent matmul per step.
    def run_layer(x_slab, wf_ref, wr_ref, whh_ref, b_ref, store):
        # Batched (off-serial-chain) input projections; bias folded into the fwd one.
        xpf = jnp.dot(x_slab, wf_ref[...], preferred_element_type=f32) + b_ref[...]
        xpr = jnp.dot(x_slab, wr_ref[...], preferred_element_type=f32)
        whh = whh_ref[...]
        h = jnp.zeros((N, 2 * H), f32)
        c = jnp.zeros((N, 2 * H), f32)
        for s in range(T):
            rs = T - 1 - s                      # reverse direction processes time rs
            gp = (xpf[s * N:(s + 1) * N, :]
                  + xpr[rs * N:(rs + 1) * N, :]
                  + jnp.dot(h, whh, preferred_element_type=f32))      # (N, 8H)
            i_g = sigmoid(gp[:, 0:2 * H])
            f_g = sigmoid(gp[:, 2 * H:4 * H])
            g_g = jnp.tanh(gp[:, 4 * H:6 * H])
            o_g = sigmoid(gp[:, 6 * H:8 * H])
            c = f_g * c + i_g * g_g
            h = o_g * jnp.tanh(c)
            store(s, rs, h)                     # stores are off the recurrence chain

    def store_layer0(s, rs, h):
        # layer-0 output slab: row t*N+n, cols [fwd H | rev H] (layer-1 input layout)
        x1_ref[s * N:(s + 1) * N, 0:H] = h[:, 0:H]
        x1_ref[rs * N:(rs + 1) * N, H:2 * H] = h[:, H:2 * H]

    def store_layer1(s, rs, h):
        # layer-1 output written directly in conv-slab layout: act[t, n*2H + (dir*H + j)]
        for n in range(N):
            act_ref[s:s + 1, n * 2 * H:n * 2 * H + H] = h[n:n + 1, 0:H]
            act_ref[rs:rs + 1, n * 2 * H + H:(n + 1) * 2 * H] = h[n:n + 1, H:2 * H]

    run_layer(xin, wf0_ref, wr0_ref, whh0_ref, b0_ref, store_layer0)
    run_layer(x1_ref[...], wf1_ref, wr1_ref, whh1_ref, b1_ref, store_layer1)

    act = act_ref[...]                                                # (T, N*2H) = (8, 128)

    def conv_bn_relu(a, w_ref, b_ref, g_ref, bt_ref, edge_ref):
        # Conv1d(k=3, stride=1, pad=1) on the (C_in, N*L) slab: taps via XLU lane rotate
        # + per-segment edge masks (masks also kill the rotate wrap-around), then three
        # accumulating MXU matmuls.
        cin, nl = a.shape
        edge = edge_ref[...]
        left = pltpu.roll(a, shift=1, axis=1) * edge[0:1, :]          # x[:, l-1]
        right = pltpu.roll(a, shift=nl - 1, axis=1) * edge[1:2, :]    # x[:, l+1]
        y = (jnp.dot(w_ref[0], left, preferred_element_type=f32)
             + jnp.dot(w_ref[1], a, preferred_element_type=f32)
             + jnp.dot(w_ref[2], right, preferred_element_type=f32)
             + b_ref[...])
        # BatchNorm1d, training-mode batch statistics over (N, L) per channel (row).
        # Centered two-pass variance (no E[x^2]-mean^2 cancellation), all f32.
        # TODO(synk): PyTorch eval() would use running mean/var instead of batch stats.
        inv = 1.0 / nl
        mean = jnp.sum(y, axis=1, keepdims=True) * inv
        d = y - mean
        var = jnp.sum(d * d, axis=1, keepdims=True) * inv
        y = d * lax.rsqrt(var + BN_EPS) * g_ref[...] + bt_ref[...]
        # ReLU.  TODO(synk): Dropout(0.5) is identity (eval semantics); training-mode
        # dropout would need pltpu.prng_seed / prng_random_bits.
        return jnp.maximum(y, 0.0)

    # block 1: Conv1d(T -> C1) + BN + ReLU (+ Dropout) + MaxPool1d(2)
    h1 = conv_bn_relu(act, c1w_ref, c1b_ref, c1g_ref, c1bt_ref, c1edge_ref)  # (C1, N*2H)

    # MaxPool1d(2): per-sample even/odd lane selection (batch-independent (2H, H)
    # selectors) + elementwise max -- strictly per segment, no cross-batch pairing.
    se = pool_even_ref[...]
    so = pool_odd_ref[...]
    pooled = []
    for n in range(N):
        blk = h1[:, n * 2 * H:(n + 1) * 2 * H]                        # (C1, 2H)
        pooled.append(jnp.maximum(
            jnp.dot(blk, se, preferred_element_type=f32),
            jnp.dot(blk, so, preferred_element_type=f32)))            # (C1, H)
    h1p = jnp.concatenate(pooled, axis=1)                             # (C1, N*H)

    # block 2: Conv1d(C1 -> C2) + BN + ReLU (+ Dropout)
    h2 = conv_bn_relu(h1p, c2w_ref, c2b_ref, c2g_ref, c2bt_ref, c2edge_ref)  # (C2, N*H)

    # ---- flatten(1) + ffn, collapsed into single matmuls ----
    # flat[n, c*L2 + l] = h2[c, n*L2 + l]  (PyTorch flatten order: channel-major).
    C2 = h2.shape[0]
    L2 = h2.shape[1] // N
    rows = []
    for n in range(N):
        rows.append(jnp.concatenate(
            [h2[c:c + 1, n * L2:(n + 1) * L2] for c in range(C2)], axis=1))  # (1, C2*L2)
    flat = jnp.concatenate(rows, axis=0)                              # (N, C2*L2) = (2, 256)

    z = jnp.maximum(
        jnp.dot(flat, f1w_ref[...], preferred_element_type=f32) + f1b_ref[...], 0.0)
    out_ref[...] = jnp.dot(z, f2w_ref[...], preferred_element_type=f32) + f2b_ref[...]


# ----------------------------------------------------------------------------
# JAX glue: one-time layout prep of parameters / constants
# ----------------------------------------------------------------------------
def make_pe_table(max_seq_len, d_model):
    # mirrors PositionalEncoding.__init__
    i_seq = jnp.linspace(0, max_seq_len - 1, max_seq_len)
    j_seq = jnp.linspace(0, d_model - 2, d_model // 2)
    pos, two_i = jnp.meshgrid(i_seq, j_seq, indexing="ij")
    pe_2i = jnp.sin(pos / 10000 ** (two_i / d_model))
    pe_2i_1 = jnp.cos(pos / 10000 ** (two_i / d_model))
    return jnp.stack((pe_2i, pe_2i_1), axis=2).reshape(max_seq_len, d_model).astype(jnp.float32)


def _edge_masks(N, L):
    pos = jnp.arange(N * L, dtype=jnp.int32) % L
    left = jnp.where(pos == 0, 0.0, 1.0)          # left tap invalid at start of each segment
    right = jnp.where(pos == L - 1, 0.0, 1.0)     # right tap invalid at end of each segment
    return jnp.stack([left, right]).astype(jnp.float32)               # (2, N*L)


def _pool_selectors(L):
    # Batch-independent (L, L//2) one-hot selectors picking even / odd positions of a
    # length-L segment (MaxPool1d(2) = max of the two selections).
    r = jnp.arange(L, dtype=jnp.int32)[:, None]
    c = jnp.arange(L // 2, dtype=jnp.int32)[None, :]
    even = (r == 2 * c).astype(jnp.float32)
    odd = (r == 2 * c + 1).astype(jnp.float32)
    return even, odd


def _pack_lstm_fused(dirs, H, in_size):
    """Pack one bidirectional LSTM layer for the direction-fused kernel.

    Gate columns (8H) are gate-major / direction-minor; recurrent weight is
    block-diagonal so running both directions as one matmul is exact.
    Returns (wih_fwd_exp (in,8H), wih_rev_exp (in,8H), whh_fused (2H,8H), bias (1,8H)).
    """
    whh = jnp.zeros((2 * H, 8 * H), jnp.float32)
    b = jnp.zeros((1, 8 * H), jnp.float32)
    wih = []
    for d in range(2):                                   # 0: forward, 1: reverse
        w_ih = dirs[d]["w_ih"]                           # (4H, in)  gate order i, f, g, o
        w_hh = dirs[d]["w_hh"]                           # (4H, H)
        bias = dirs[d]["b_ih"] + dirs[d]["b_hh"]         # (4H,)
        wexp = jnp.zeros((in_size, 8 * H), jnp.float32)
        for g in range(4):
            cols = slice(g * 2 * H + d * H, g * 2 * H + (d + 1) * H)
            wexp = wexp.at[:, cols].set(w_ih[g * H:(g + 1) * H, :].T)
            whh = whh.at[d * H:(d + 1) * H, cols].set(w_hh[g * H:(g + 1) * H, :].T)
            b = b.at[:, cols].set(bias[g * H:(g + 1) * H][None, :])
        wih.append(wexp)
    return wih[0], wih[1], whh, b


def init_params(key, *, n_steps, pe_dim, hidden, num_layers, num_outputs):
    # The fused kernel implements the classifier structure that BiLSTM.__init__ produces
    # for pe_dim=8, num_layers=2:
    #   loop 1 (1 iter): Conv1d(8, 4) + BN + ReLU + Dropout + MaxPool(2), then break
    #   loop 2 (1 iter): Conv1d(4, 8) + BN + ReLU + Dropout
    #   ffn: Linear(256, 16) -> ReLU -> Linear(16, 16)
    assert pe_dim == 8 and num_layers == 2, "kernel built for this classifier structure"
    H = hidden
    C1, C2 = pe_dim // 2, pe_dim
    mlp_in = C2 * H
    assert mlp_in == ((H * 2 * pe_dim) // 4) * 2          # matches __init__ bookkeeping
    M1 = mlp_in // 16

    keys = iter(jax.random.split(key, 64))

    def rnd(shape, scale=0.1):
        return scale * jax.random.normal(next(keys), shape, dtype=jnp.float32)

    lstm = []
    for layer in range(2):
        in_sz = num_outputs if layer == 0 else 2 * H
        lstm.append([dict(w_ih=rnd((4 * H, in_sz)), w_hh=rnd((4 * H, H)),
                          b_ih=rnd((4 * H,)), b_hh=rnd((4 * H,))) for _ in range(2)])
    return {
        "pe_table": make_pe_table(n_steps, pe_dim),
        "lstm": lstm,
        "conv1": dict(w=rnd((C1, pe_dim, 3)), b=rnd((C1,)), g=1.0 + rnd((C1,)), beta=rnd((C1,))),
        "conv2": dict(w=rnd((C2, C1, 3)), b=rnd((C2,)), g=1.0 + rnd((C2,)), beta=rnd((C2,))),
        "ffn1": dict(w=rnd((M1, mlp_in)), b=rnd((M1,))),
        "ffn2": dict(w=rnd((num_outputs, M1)), b=rnd((num_outputs,))),
    }


def bilstm_forward(params, x, t):
    """x: (N, pe_dim, num_outputs) float32, t: (N,) int -> (N, get_shape()[1], get_shape()[2])."""
    N, T, I = x.shape
    H = params["lstm"][0][0]["w_hh"].shape[1]
    num_outputs = I

    # Embedding lookup of the fixed sinusoidal table (tiny gather, kept in XLA glue).
    t_emb = params["pe_table"][t]                                     # (N, T)

    x_slab = x.transpose(1, 0, 2).reshape(T * N, I)                   # row = t*N + n
    pe_slab = t_emb.T.reshape(T * N, 1)

    wf0, wr0, whh0, b0 = _pack_lstm_fused(params["lstm"][0], H, I)
    wf1, wr1, whh1, b1 = _pack_lstm_fused(params["lstm"][1], H, 2 * H)

    c1, c2 = params["conv1"], params["conv2"]
    C1, C2 = c1["w"].shape[0], c2["w"].shape[0]
    L1, L2 = 2 * H, H                                                 # conv lengths pre/post pool
    c1w = c1["w"].transpose(2, 0, 1)                                  # (3, C1, T)
    c2w = c2["w"].transpose(2, 0, 1)                                  # (3, C2, C1)
    pool_even, pool_odd = _pool_selectors(L1)

    M1 = params["ffn1"]["w"].shape[0]
    f1w = params["ffn1"]["w"].T                                       # (C2*L2, M1) = (256, 16)
    f1b = params["ffn1"]["b"].reshape(1, M1)
    f2w = params["ffn2"]["w"].T                                       # (M1, num_outputs)
    f2b = params["ffn2"]["b"].reshape(1, num_outputs)

    args = (
        x_slab, pe_slab,
        wf0, wr0, whh0, b0,
        wf1, wr1, whh1, b1,
        c1w, c1["b"].reshape(C1, 1), c1["g"].reshape(C1, 1), c1["beta"].reshape(C1, 1),
        _edge_masks(N, L1),
        pool_even, pool_odd,
        c2w, c2["b"].reshape(C2, 1), c2["g"].reshape(C2, 1), c2["beta"].reshape(C2, 1),
        _edge_masks(N, L2),
        f1w, f1b, f2w, f2b,
    )

    logits = pl.pallas_call(
        bilstm_kernel,
        out_shape=jax.ShapeDtypeStruct((N, num_outputs), jnp.float32),
        in_specs=[pl.BlockSpec(memory_space=pltpu.MemorySpace.VMEM) for _ in args],
        out_specs=pl.BlockSpec(memory_space=pltpu.MemorySpace.VMEM),
        scratch_shapes=[
            pltpu.VMEM((T * N, 2 * H), jnp.float32),   # layer-0 output slab (layer-1 input)
            pltpu.VMEM((T, N * 2 * H), jnp.float32),   # layer-1 output in conv-slab layout
        ],
    )(*args)

    return logits.reshape(-1, get_shape()[1], get_shape()[2])         # (N, 1, num_outputs)


# ----------------------------------------------------------------------------
if __name__ == "__main__":
    key = jax.random.PRNGKey(0)
    kx, kt, kp = jax.random.split(key, 3)

    N = 2
    n_steps = 100
    pe_dim = 8                      # == LSTM sequence length (x + pe broadcast requires it)
    hidden = 32
    num_layers = 2
    num_outputs = get_shape()[2]    # 16

    x = jax.random.normal(kx, (N, pe_dim, num_outputs), dtype=jnp.float32)
    t = jax.random.randint(kt, (N,), 0, n_steps)

    params = init_params(kp, n_steps=n_steps, pe_dim=pe_dim, hidden=hidden,
                         num_layers=num_layers, num_outputs=num_outputs)
    out = bilstm_forward(params, x, t)
    out = jax.block_until_ready(out)

    assert out.shape == (N, get_shape()[1], get_shape()[2]), out.shape
    assert bool(jnp.all(jnp.isfinite(out)))
    print("KERNEL_OK")
</pallas_src>

<mosaic_0001>
module attributes {stable_mosaic.version = 11 : i64} {
  func.func @bilstm_kernel(%arg0: memref<16x16xf32, #tpu.memory_space<vmem>>, %arg1: memref<16x1xf32, #tpu.memory_space<vmem>>, %arg2: memref<16x256xf32, #tpu.memory_space<vmem>>, %arg3: memref<16x256xf32, #tpu.memory_space<vmem>>, %arg4: memref<64x256xf32, #tpu.memory_space<vmem>>, %arg5: memref<1x256xf32, #tpu.memory_space<vmem>>, %arg6: memref<64x256xf32, #tpu.memory_space<vmem>>, %arg7: memref<64x256xf32, #tpu.memory_space<vmem>>, %arg8: memref<64x256xf32, #tpu.memory_space<vmem>>, %arg9: memref<1x256xf32, #tpu.memory_space<vmem>>, %arg10: memref<3x4x8xf32, #tpu.memory_space<vmem>>, %arg11: memref<4x1xf32, #tpu.memory_space<vmem>>, %arg12: memref<4x1xf32, #tpu.memory_space<vmem>>, %arg13: memref<4x1xf32, #tpu.memory_space<vmem>>, %arg14: memref<2x128xf32, #tpu.memory_space<vmem>>, %arg15: memref<64x32xf32, #tpu.memory_space<vmem>>, %arg16: memref<64x32xf32, #tpu.memory_space<vmem>>, %arg17: memref<3x8x4xf32, #tpu.memory_space<vmem>>, %arg18: memref<8x1xf32, #tpu.memory_space<vmem>>, %arg19: memref<8x1xf32, #tpu.memory_space<vmem>>, %arg20: memref<8x1xf32, #tpu.memory_space<vmem>>, %arg21: memref<2x64xf32, #tpu.memory_space<vmem>>, %arg22: memref<256x16xf32, #tpu.memory_space<vmem>>, %arg23: memref<1x16xf32, #tpu.memory_space<vmem>>, %arg24: memref<16x16xf32, #tpu.memory_space<vmem>>, %arg25: memref<1x16xf32, #tpu.memory_space<vmem>>, %arg26: memref<2x16xf32, #tpu.memory_space<vmem>>, %arg27: memref<16x64xf32, #tpu.memory_space<vmem>>, %arg28: memref<8x128xf32, #tpu.memory_space<vmem>>) attributes {dimension_semantics = [], scalar_prefetch = 0 : i64, scratch_operands = 2 : i64, tpu.core_type = #tpu.core_type<tc>} {
    %c0 = arith.constant 0 : index
    %c0_0 = arith.constant 0 : index
    %0 = vector.load %arg0[%c0, %c0_0] : memref<16x16xf32, #tpu.memory_space<vmem>>, vector<16x16xf32>
    %c0_1 = arith.constant 0 : index
    %c0_2 = arith.constant 0 : index
    %1 = vector.load %arg1[%c0_1, %c0_2] : memref<16x1xf32, #tpu.memory_space<vmem>>, vector<16x1xf32>
    %2 = vector.broadcast %1 : vector<16x1xf32> to vector<16x16xf32>
    %3 = arith.addf %0, %2 : vector<16x16xf32>
    %c0_3 = arith.constant 0 : index
    %c0_4 = arith.constant 0 : index
    %4 = vector.load %arg2[%c0_3, %c0_4] : memref<16x256xf32, #tpu.memory_space<vmem>>, vector<16x256xf32>
    %cst = arith.constant dense<0.000000e+00> : vector<16x256xf32>
    %5 = tpu.matmul %3, %4, %cst {dimension_numbers = #tpu.dot_dimension_numbers<[1], [0], [0], [1], [0, 0, 1, 1], [], []>} : vector<16x16xf32>, vector<16x256xf32>, vector<16x256xf32> -> vector<16x256xf32>
    %c0_5 = arith.constant 0 : index
    %c0_6 = arith.constant 0 : index
    %6 = vector.load %arg5[%c0_5, %c0_6] : memref<1x256xf32, #tpu.memory_space<vmem>>, vector<1x256xf32>
    %7 = vector.broadcast %6 : vector<1x256xf32> to vector<16x256xf32>
    %8 = arith.addf %5, %7 : vector<16x256xf32>
    %c0_7 = arith.constant 0 : index
    %c0_8 = arith.constant 0 : index
    %9 = vector.load %arg3[%c0_7, %c0_8] : memref<16x256xf32, #tpu.memory_space<vmem>>, vector<16x256xf32>
    %cst_9 = arith.constant dense<0.000000e+00> : vector<16x256xf32>
    %10 = tpu.matmul %3, %9, %cst_9 {dimension_numbers = #tpu.dot_dimension_numbers<[1], [0], [0], [1], [0, 0, 1, 1], [], []>} : vector<16x16xf32>, vector<16x256xf32>, vector<16x256xf32> -> vector<16x256xf32>
    %c0_10 = arith.constant 0 : index
    %c0_11 = arith.constant 0 : index
    %11 = vector.load %arg4[%c0_10, %c0_11] : memref<64x256xf32, #tpu.memory_space<vmem>>, vector<64x256xf32>
    %cst_12 = arith.constant 0.000000e+00 : f32
    %12 = vector.broadcast %cst_12 : f32 to vector<2x64xf32>
    %cst_13 = arith.constant 0.000000e+00 : f32
    %13 = vector.broadcast %cst_13 : f32 to vector<2x64xf32>
    %14 = vector.extract_strided_slice %8 {offsets = [0, 0], sizes = [2, 256], strides = [1, 1]} : vector<16x256xf32> to vector<2x256xf32>
    %15 = vector.extract_strided_slice %10 {offsets = [14, 0], sizes = [2, 256], strides = [1, 1]} : vector<16x256xf32> to vector<2x256xf32>
    %16 = arith.addf %14, %15 : vector<2x256xf32>
    %cst_14 = arith.constant dense<0.000000e+00> : vector<2x256xf32>
    %17 = tpu.matmul %12, %11, %cst_14 {dimension_numbers = #tpu.dot_dimension_numbers<[1], [0], [0], [1], [0, 0, 1, 1], [], []>} : vector<2x64xf32>, vector<64x256xf32>, vector<2x256xf32> -> vector<2x256xf32>
    %18 = arith.addf %16, %17 : vector<2x256xf32>
    %19 = vector.extract_strided_slice %18 {offsets = [0, 0], sizes = [2, 64], strides = [1, 1]} : vector<2x256xf32> to vector<2x64xf32>
    %cst_15 = arith.constant 0.000000e+00 : f32
    %20 = vector.broadcast %cst_15 : f32 to vector<2x64xf32>
    %21 = arith.subf %20, %19 : vector<2x64xf32>
    %22 = math.exp %21 : vector<2x64xf32>
    %cst_16 = arith.constant 1.000000e+00 : f32
    %23 = vector.broadcast %cst_16 : f32 to vector<2x64xf32>
    %24 = arith.addf %23, %22 : vector<2x64xf32>
    %25 = tpu.reciprocal %24 {approx = true} : vector<2x64xf32> -> vector<2x64xf32>
    %26 = vector.extract_strided_slice %18 {offsets = [0, 64], sizes = [2, 64], strides = [1, 1]} : vector<2x256xf32> to vector<2x64xf32>
    %cst_17 = arith.constant 0.000000e+00 : f32
    %27 = vector.broadcast %cst_17 : f32 to vector<2x64xf32>
    %28 = arith.subf %27, %26 : vector<2x64xf32>
    %29 = math.exp %28 : vector<2x64xf32>
    %cst_18 = arith.constant 1.000000e+00 : f32
    %30 = vector.broadcast %cst_18 : f32 to vector<2x64xf32>
    %31 = arith.addf %30, %29 : vector<2x64xf32>
    %32 = tpu.reciprocal %31 {approx = true} : vector<2x64xf32> -> vector<2x64xf32>
    %33 = vector.extract_strided_slice %18 {offsets = [0, 128], sizes = [2, 64], strides = [1, 1]} : vector<2x256xf32> to vector<2x64xf32>
    %34 = math.tanh %33 : vector<2x64xf32>
    %35 = vector.extract_strided_slice %18 {offsets = [0, 192], sizes = [2, 64], strides = [1, 1]} : vector<2x256xf32> to vector<2x64xf32>
    %cst_19 = arith.constant 0.000000e+00 : f32
    %36 = vector.broadcast %cst_19 : f32 to vector<2x64xf32>
    %37 = arith.subf %36, %35 : vector<2x64xf32>
    %38 = math.exp %37 : vector<2x64xf32>
    %cst_20 = arith.constant 1.000000e+00 : f32
    %39 = vector.broadcast %cst_20 : f32 to vector<2x64xf32>
    %40 = arith.addf %39, %38 : vector<2x64xf32>
    %41 = tpu.reciprocal %40 {approx = true} : vector<2x64xf32> -> vector<2x64xf32>
    %42 = arith.mulf %32, %13 : vector<2x64xf32>
    %43 = arith.mulf %25, %34 : vector<2x64xf32>
    %44 = arith.addf %42, %43 : vector<2x64xf32>
    %45 = math.tanh %44 : vector<2x64xf32>
    %46 = arith.mulf %41, %45 : vector<2x64xf32>
    %47 = vector.extract_strided_slice %46 {offsets = [0, 0], sizes = [2, 32], strides = [1, 1]} : vector<2x64xf32> to vector<2x32xf32>
    %c0_21 = arith.constant 0 : index
    %c0_22 = arith.constant 0 : index
    %48 = vector.load %arg27[%c0_21, %c0_22] : memref<16x64xf32, #tpu.memory_space<vmem>>, vector<2x32xf32>
    tpu.vector_store %arg27[%c0_21, %c0_22], %47 {strides = array<i32>} : memref<16x64xf32, #tpu.memory_space<vmem>>, vector<2x32xf32>,
    %49 = vector.extract_strided_slice %46 {offsets = [0, 32], sizes = [2, 32], strides = [1, 1]} : vector<2x64xf32> to vector<2x32xf32>
    %c14 = arith.constant 14 : index
    %c32 = arith.constant 32 : index
    %50 = vector.load %arg27[%c14, %c32] : memref<16x64xf32, #tpu.memory_space<vmem>>, vector<2x32xf32>
    tpu.vector_store %arg27[%c14, %c32], %49 {strides = array<i32>} : memref<16x64xf32, #tpu.memory_space<vmem>>, vector<2x32xf32>,
    %51 = vector.extract_strided_slice %8 {offsets = [2, 0], sizes = [2, 256], strides = [1, 1]} : vector<16x256xf32> to vector<2x256xf32>
    %52 = vector.extract_strided_slice %10 {offsets = [12, 0], sizes = [2, 256], strides = [1, 1]} : vector<16x256xf32> to vector<2x256xf32>
    %53 = arith.addf %51, %52 : vector<2x256xf32>
    %cst_23 = arith.constant dense<0.000000e+00> : vector<2x256xf32>
    %54 = tpu.matmul %46, %11, %cst_23 {dimension_numbers = #tpu.dot_dimension_numbers<[1], [0], [0], [1], [0, 0, 1, 1], [], []>} : vector<2x64xf32>, vector<64x256xf32>, vector<2x256xf32> -> vector<2x256xf32>
    %55 = arith.addf %53, %54 : vector<2x256xf32>
    %56 = vector.extract_strided_slice %55 {offsets = [0, 0], sizes = [2, 64], strides = [1, 1]} : vector<2x256xf32> to vector<2x64xf32>
    %cst_24 = arith.constant 0.000000e+00 : f32
    %57 = vector.broadcast %cst_24 : f32 to vector<2x64xf32>
    %58 = arith.subf %57, %56 : vector<2x64xf32>
    %59 = math.exp %58 : vector<2x64xf32>
    %cst_25 = arith.constant 1.000000e+00 : f32
    %60 = vector.broadcast %cst_25 : f32 to vector<2x64xf32>
    %61 = arith.addf %60, %59 : vector<2x64xf32>
    %62 = tpu.reciprocal %61 {approx = true} : vector<2x64xf32> -> vector<2x64xf32>
    %63 = vector.extract_strided_slice %55 {offsets = [0, 64], sizes = [2, 64], strides = [1, 1]} : vector<2x256xf32> to vector<2x64xf32>
    %cst_26 = arith.constant 0.000000e+00 : f32
    %64 = vector.broadcast %cst_26 : f32 to vector<2x64xf32>
    %65 = arith.subf %64, %63 : vector<2x64xf32>
    %66 = math.exp %65 : vector<2x64xf32>
    %cst_27 = arith.constant 1.000000e+00 : f32
    %67 = vector.broadcast %cst_27 : f32 to vector<2x64xf32>
    %68 = arith.addf %67, %66 : vector<2x64xf32>
    %69 = tpu.reciprocal %68 {approx = true} : vector<2x64xf32> -> vector<2x64xf32>
    %70 = vector.extract_strided_slice %55 {offsets = [0, 128], sizes = [2, 64], strides = [1, 1]} : vector<2x256xf32> to vector<2x64xf32>
    %71 = math.tanh %70 : vector<2x64xf32>
    %72 = vector.extract_strided_slice %55 {offsets = [0, 192], sizes = [2, 64], strides = [1, 1]} : vector<2x256xf32> to vector<2x64xf32>
    %cst_28 = arith.constant 0.000000e+00 : f32
    %73 = vector.broadcast %cst_28 : f32 to vector<2x64xf32>
    %74 = arith.subf %73, %72 : vector<2x64xf32>
    %75 = math.exp %74 : vector<2x64xf32>
    %cst_29 = arith.constant 1.000000e+00 : f32
    %76 = vector.broadcast %cst_29 : f32 to vector<2x64xf32>
    %77 = arith.addf %76, %75 : vector<2x64xf32>
    %78 = tpu.reciprocal %77 {approx = true} : vector<2x64xf32> -> vector<2x64xf32>
    %79 = arith.mulf %69, %44 : vector<2x64xf32>
    %80 = arith.mulf %62, %71 : vector<2x64xf32>
    %81 = arith.addf %79, %80 : vector<2x64xf32>
    %82 = math.tanh %81 : vector<2x64xf32>
    %83 = arith.mulf %78, %82 : vector<2x64xf32>
    %84 = vector.extract_strided_slice %83 {offsets = [0, 0], sizes = [2, 32], strides = [1, 1]} : vector<2x64xf32> to vector<2x32xf32>
    %c2 = arith.constant 2 : index
    %c0_30 = arith.constant 0 : index
    %85 = vector.load %arg27[%c2, %c0_30] : memref<16x64xf32, #tpu.memory_space<vmem>>, vector<2x32xf32>
    tpu.vector_store %arg27[%c2, %c0_30], %84 {strides = array<i32>} : memref<16x64xf32, #tpu.memory_space<vmem>>, vector<2x32xf32>,
    %86 = vector.extract_strided_slice %83 {offsets = [0, 32], sizes = [2, 32], strides = [1, 1]} : vector<2x64xf32> to vector<2x32xf32>
    %c12 = arith.constant 12 : index
    %c32_31 = arith.constant 32 : index
    %87 = vector.load %arg27[%c12, %c32_31] : memref<16x64xf32, #tpu.memory_space<vmem>>, vector<2x32xf32>
    tpu.vector_store %arg27[%c12, %c32_31], %86 {strides = array<i32>} : memref<16x64xf32, #tpu.memory_space<vmem>>, vector<2x32xf32>,
    %88 = vector.extract_strided_slice %8 {offsets = [4, 0], sizes = [2, 256], strides = [1, 1]} : vector<16x256xf32> to vector<2x256xf32>
    %89 = vector.extract_strided_slice %10 {offsets = [10, 0], sizes = [2, 256], strides = [1, 1]} : vector<16x256xf32> to vector<2x256xf32>
    %90 = arith.addf %88, %89 : vector<2x256xf32>
    %cst_32 = arith.constant dense<0.000000e+00> : vector<2x256xf32>
    %91 = tpu.matmul %83, %11, %cst_32 {dimension_numbers = #tpu.dot_dimension_numbers<[1], [0], [0], [1], [0, 0, 1, 1], [], []>} : vector<2x64xf32>, vector<64x256xf32>, vector<2x256xf32> -> vector<2x256xf32>
    %92 = arith.addf %90, %91 : vector<2x256xf32>
    %93 = vector.extract_strided_slice %92 {offsets = [0, 0], sizes = [2, 64], strides = [1, 1]} : vector<2x256xf32> to vector<2x64xf32>
    %cst_33 = arith.constant 0.000000e+00 : f32
    %94 = vector.broadcast %cst_33 : f32 to vector<2x64xf32>
    %95 = arith.subf %94, %93 : vector<2x64xf32>
    %96 = math.exp %95 : vector<2x64xf32>
    %cst_34 = arith.constant 1.000000e+00 : f32
    %97 = vector.broadcast %cst_34 : f32 to vector<2x64xf32>
    %98 = arith.addf %97, %96 : vector<2x64xf32>
    %99 = tpu.reciprocal %98 {approx = true} : vector<2x64xf32> -> vector<2x64xf32>
    %100 = vector.extract_strided_slice %92 {offsets = [0, 64], sizes = [2, 64], strides = [1, 1]} : vector<2x256xf32> to vector<2x64xf32>
    %cst_35 = arith.constant 0.000000e+00 : f32
    %101 = vector.broadcast %cst_35 : f32 to vector<2x64xf32>
    %102 = arith.subf %101, %100 : vector<2x64xf32>
    %103 = math.exp %102 : vector<2x64xf32>
    %cst_36 = arith.constant 1.000000e+00 : f32
    %104 = vector.broadcast %cst_36 : f32 to vector<2x64xf32>
    %105 = arith.addf %104, %103 : vector<2x64xf32>
    %106 = tpu.reciprocal %105 {approx = true} : vector<2x64xf32> -> vector<2x64xf32>
    %107 = vector.extract_strided_slice %92 {offsets = [0, 128], sizes = [2, 64], strides = [1, 1]} : vector<2x256xf32> to vector<2x64xf32>
    %108 = math.tanh %107 : vector<2x64xf32>
    %109 = vector.extract_strided_slice %92 {offsets = [0, 192], sizes = [2, 64], strides = [1, 1]} : vector<2x256xf32> to vector<2x64xf32>
    %cst_37 = arith.constant 0.000000e+00 : f32
    %110 = vector.broadcast %cst_37 : f32 to vector<2x64xf32>
    %111 = arith.subf %110, %109 : vector<2x64xf32>
    %112 = math.exp %111 : vector<2x64xf32>
    %cst_38 = arith.constant 1.000000e+00 : f32
    %113 = vector.broadcast %cst_38 : f32 to vector<2x64xf32>
    %114 = arith.addf %113, %112 : vector<2x64xf32>
    %115 = tpu.reciprocal %114 {approx = true} : vector<2x64xf32> -> vector<2x64xf32>
    %116 = arith.mulf %106, %81 : vector<2x64xf32>
    %117 = arith.mulf %99, %108 : vector<2x64xf32>
    %118 = arith.addf %116, %117 : vector<2x64xf32>
    %119 = math.tanh %118 : vector<2x64xf32>
    %120 = arith.mulf %115, %119 : vector<2x64xf32>
    %121 = vector.extract_strided_slice %120 {offsets = [0, 0], sizes = [2, 32], strides = [1, 1]} : vector<2x64xf32> to vector<2x32xf32>
    %c4 = arith.constant 4 : index
    %c0_39 = arith.constant 0 : index
    %122 = vector.load %arg27[%c4, %c0_39] : memref<16x64xf32, #tpu.memory_space<vmem>>, vector<2x32xf32>
    tpu.vector_store %arg27[%c4, %c0_39], %121 {strides = array<i32>} : memref<16x64xf32, #tpu.memory_space<vmem>>, vector<2x32xf32>,
    %123 = vector.extract_strided_slice %120 {offsets = [0, 32], sizes = [2, 32], strides = [1, 1]} : vector<2x64xf32> to vector<2x32xf32>
    %c10 = arith.constant 10 : index
    %c32_40 = arith.constant 32 : index
    %124 = vector.load %arg27[%c10, %c32_40] : memref<16x64xf32, #tpu.memory_space<vmem>>, vector<2x32xf32>
    tpu.vector_store %arg27[%c10, %c32_40], %123 {strides = array<i32>} : memref<16x64xf32, #tpu.memory_space<vmem>>, vector<2x32xf32>,
    %125 = vector.extract_strided_slice %8 {offsets = [6, 0], sizes = [2, 256], strides = [1, 1]} : vector<16x256xf32> to vector<2x256xf32>
    %126 = vector.extract_strided_slice %10 {offsets = [8, 0], sizes = [2, 256], strides = [1, 1]} : vector<16x256xf32> to vector<2x256xf32>
    %127 = arith.addf %125, %126 : vector<2x256xf32>
    %cst_41 = arith.constant dense<0.000000e+00> : vector<2x256xf32>
    %128 = tpu.matmul %120, %11, %cst_41 {dimension_numbers = #tpu.dot_dimension_numbers<[1], [0], [0], [1], [0, 0, 1, 1], [], []>} : vector<2x64xf32>, vector<64x256xf32>, vector<2x256xf32> -> vector<2x256xf32>
    %129 = arith.addf %127, %128 : vector<2x256xf32>
    %130 = vector.extract_strided_slice %129 {offsets = [0, 0], sizes = [2, 64], strides = [1, 1]} : vector<2x256xf32> to vector<2x64xf32>
    %cst_42 = arith.constant 0.000000e+00 : f32
    %131 = vector.broadcast %cst_42 : f32 to vector<2x64xf32>
    %132 = arith.subf %131, %130 : vector<2x64xf32>
    %133 = math.exp %132 : vector<2x64xf32>
    %cst_43 = arith.constant 1.000000e+00 : f32
    %134 = vector.broadcast %cst_43 : f32 to vector<2x64xf32>
    %135 = arith.addf %134, %133 : vector<2x64xf32>
    %136 = tpu.reciprocal %135 {approx = true} : vector<2x64xf32> -> vector<2x64xf32>
    %137 = vector.extract_strided_slice %129 {offsets = [0, 64], sizes = [2, 64], strides = [1, 1]} : vector<2x256xf32> to vector<2x64xf32>
    %cst_44 = arith.constant 0.000000e+00 : f32
    %138 = vector.broadcast %cst_44 : f32 to vector<2x64xf32>
    %139 = arith.subf %138, %137 : vector<2x64xf32>
    %140 = math.exp %139 : vector<2x64xf32>
    %cst_45 = arith.constant 1.000000e+00 : f32
    %141 = vector.broadcast %cst_45 : f32 to vector<2x64xf32>
    %142 = arith.addf %141, %140 : vector<2x64xf32>
    %143 = tpu.reciprocal %142 {approx = true} : vector<2x64xf32> -> vector<2x64xf32>
    %144 = vector.extract_strided_slice %129 {offsets = [0, 128], sizes = [2, 64], strides = [1, 1]} : vector<2x256xf32> to vector<2x64xf32>
    %145 = math.tanh %144 : vector<2x64xf32>
    %146 = vector.extract_strided_slice %129 {offsets = [0, 192], sizes = [2, 64], strides = [1, 1]} : vector<2x256xf32> to vector<2x64xf32>
    %cst_46 = arith.constant 0.000000e+00 : f32
    %147 = vector.broadcast %cst_46 : f32 to vector<2x64xf32>
    %148 = arith.subf %147, %146 : vector<2x64xf32>
    %149 = math.exp %148 : vector<2x64xf32>
    %cst_47 = arith.constant 1.000000e+00 : f32
    %150 = vector.broadcast %cst_47 : f32 to vector<2x64xf32>
    %151 = arith.addf %150, %149 : vector<2x64xf32>
    %152 = tpu.reciprocal %151 {approx = true} : vector<2x64xf32> -> vector<2x64xf32>
    %153 = arith.mulf %143, %118 : vector<2x64xf32>
    %154 = arith.mulf %136, %145 : vector<2x64xf32>
    %155 = arith.addf %153, %154 : vector<2x64xf32>
    %156 = math.tanh %155 : vector<2x64xf32>
    %157 = arith.mulf %152, %156 : vector<2x64xf32>
    %158 = vector.extract_strided_slice %157 {offsets = [0, 0], sizes = [2, 32], strides = [1, 1]} : vector<2x64xf32> to vector<2x32xf32>
    %c6 = arith.constant 6 : index
    %c0_48 = arith.constant 0 : index
    %159 = vector.load %arg27[%c6, %c0_48] : memref<16x64xf32, #tpu.memory_space<vmem>>, vector<2x32xf32>
    tpu.vector_store %arg27[%c6, %c0_48], %158 {strides = array<i32>} : memref<16x64xf32, #tpu.memory_space<vmem>>, vector<2x32xf32>,
    %160 = vector.extract_strided_slice %157 {offsets = [0, 32], sizes = [2, 32], strides = [1, 1]} : vector<2x64xf32> to vector<2x32xf32>
    %c8 = arith.constant 8 : index
    %c32_49 = arith.constant 32 : index
    %161 = vector.load %arg27[%c8, %c32_49] : memref<16x64xf32, #tpu.memory_space<vmem>>, vector<2x32xf32>
    tpu.vector_store %arg27[%c8, %c32_49], %160 {strides = array<i32>} : memref<16x64xf32, #tpu.memory_space<vmem>>, vector<2x32xf32>,
    %162 = vector.extract_strided_slice %8 {offsets = [8, 0], sizes = [2, 256], strides = [1, 1]} : vector<16x256xf32> to vector<2x256xf32>
    %163 = vector.extract_strided_slice %10 {offsets = [6, 0], sizes = [2, 256], strides = [1, 1]} : vector<16x256xf32> to vector<2x256xf32>
    %164 = arith.addf %162, %163 : vector<2x256xf32>
    %cst_50 = arith.constant dense<0.000000e+00> : vector<2x256xf32>
    %165 = tpu.matmul %157, %11, %cst_50 {dimension_numbers = #tpu.dot_dimension_numbers<[1], [0], [0], [1], [0, 0, 1, 1], [], []>} : vector<2x64xf32>, vector<64x256xf32>, vector<2x256xf32> -> vector<2x256xf32>
    %166 = arith.addf %164, %165 : vector<2x256xf32>
    %167 = vector.extract_strided_slice %166 {offsets = [0, 0], sizes = [2, 64], strides = [1, 1]} : vector<2x256xf32> to vector<2x64xf32>
    %cst_51 = arith.constant 0.000000e+00 : f32
    %168 = vector.broadcast %cst_51 : f32 to vector<2x64xf32>
    %169 = arith.subf %168, %167 : vector<2x64xf32>
    %170 = math.exp %169 : vector<2x64xf32>
    %cst_52 = arith.constant 1.000000e+00 : f32
    %171 = vector.broadcast %cst_52 : f32 to vector<2x64xf32>
    %172 = arith.addf %171, %170 : vector<2x64xf32>
    %173 = tpu.reciprocal %172 {approx = true} : vector<2x64xf32> -> vector<2x64xf32>
    %174 = vector.extract_strided_slice %166 {offsets = [0, 64], sizes = [2, 64], strides = [1, 1]} : vector<2x256xf32> to vector<2x64xf32>
    %cst_53 = arith.constant 0.000000e+00 : f32
    %175 = vector.broadcast %cst_53 : f32 to vector<2x64xf32>
    %176 = arith.subf %175, %174 : vector<2x64xf32>
    %177 = math.exp %176 : vector<2x64xf32>
    %cst_54 = arith.constant 1.000000e+00 : f32
    %178 = vector.broadcast %cst_54 : f32 to vector<2x64xf32>
    %179 = arith.addf %178, %177 : vector<2x64xf32>
    %180 = tpu.reciprocal %179 {approx = true} : vector<2x64xf32> -> vector<2x64xf32>
    %181 = vector.extract_strided_slice %166 {offsets = [0, 128], sizes = [2, 64], strides = [1, 1]} : vector<2x256xf32> to vector<2x64xf32>
    %182 = math.tanh %181 : vector<2x64xf32>
    %183 = vector.extract_strided_slice %166 {offsets = [0, 192], sizes = [2, 64], strides = [1, 1]} : vector<2x256xf32> to vector<2x64xf32>
    %cst_55 = arith.constant 0.000000e+00 : f32
    %184 = vector.broadcast %cst_55 : f32 to vector<2x64xf32>
    %185 = arith.subf %184, %183 : vector<2x64xf32>
    %186 = math.exp %185 : vector<2x64xf32>
    %cst_56 = arith.constant 1.000000e+00 : f32
    %187 = vector.broadcast %cst_56 : f32 to vector<2x64xf32>
    %188 = arith.addf %187, %186 : vector<2x64xf32>
    %189 = tpu.reciprocal %188 {approx = true} : vector<2x64xf32> -> vector<2x64xf32>
    %190 = arith.mulf %180, %155 : vector<2x64xf32>
    %191 = arith.mulf %173, %182 : vector<2x64xf32>
    %192 = arith.addf %190, %191 : vector<2x64xf32>
    %193 = math.tanh %192 : vector<2x64xf32>
    %194 = arith.mulf %189, %193 : vector<2x64xf32>
    %195 = vector.extract_strided_slice %194 {offsets = [0, 0], sizes = [2, 32], strides = [1, 1]} : vector<2x64xf32> to vector<2x32xf32>
    %c8_57 = arith.constant 8 : index
    %c0_58 = arith.constant 0 : index
    %196 = vector.load %arg27[%c8_57, %c0_58] : memref<16x64xf32, #tpu.memory_space<vmem>>, vector<2x32xf32>
    tpu.vector_store %arg27[%c8_57, %c0_58], %195 {strides = array<i32>} : memref<16x64xf32, #tpu.memory_space<vmem>>, vector<2x32xf32>,
    %197 = vector.extract_strided_slice %194 {offsets = [0, 32], sizes = [2, 32], strides = [1, 1]} : vector<2x64xf32> to vector<2x32xf32>
    %c6_59 = arith.constant 6 : index
    %c32_60 = arith.constant 32 : index
    %198 = vector.load %arg27[%c6_59, %c32_60] : memref<16x64xf32, #tpu.memory_space<vmem>>, vector<2x32xf32>
    tpu.vector_store %arg27[%c6_59, %c32_60], %197 {strides = array<i32>} : memref<16x64xf32, #tpu.memory_space<vmem>>, vector<2x32xf32>,
    %199 = vector.extract_strided_slice %8 {offsets = [10, 0], sizes = [2, 256], strides = [1, 1]} : vector<16x256xf32> to vector<2x256xf32>
    %200 = vector.extract_strided_slice %10 {offsets = [4, 0], sizes = [2, 256], strides = [1, 1]} : vector<16x256xf32> to vector<2x256xf32>
    %201 = arith.addf %199, %200 : vector<2x256xf32>
    %cst_61 = arith.constant dense<0.000000e+00> : vector<2x256xf32>
    %202 = tpu.matmul %194, %11, %cst_61 {dimension_numbers = #tpu.dot_dimension_numbers<[1], [0], [0], [1], [0, 0, 1, 1], [], []>} : vector<2x64xf32>, vector<64x256xf32>, vector<2x256xf32> -> vector<2x256xf32>
    %203 = arith.addf %201, %202 : vector<2x256xf32>
    %204 = vector.extract_strided_slice %203 {offsets = [0, 0], sizes = [2, 64], strides = [1, 1]} : vector<2x256xf32> to vector<2x64xf32>
    %cst_62 = arith.constant 0.000000e+00 : f32
    %205 = vector.broadcast %cst_62 : f32 to vector<2x64xf32>
    %206 = arith.subf %205, %204 : vector<2x64xf32>
    %207 = math.exp %206 : vector<2x64xf32>
    %cst_63 = arith.constant 1.000000e+00 : f32
    %208 = vector.broadcast %cst_63 : f32 to vector<2x64xf32>
    %209 = arith.addf %208, %207 : vector<2x64xf32>
    %210 = tpu.reciprocal %209 {approx = true} : vector<2x64xf32> -> vector<2x64xf32>
    %211 = vector.extract_strided_slice %203 {offsets = [0, 64], sizes = [2, 64], strides = [1, 1]} : vector<2x256xf32> to vector<2x64xf32>
    %cst_64 = arith.constant 0.000000e+00 : f32
    %212 = vector.broadcast %cst_64 : f32 to vector<2x64xf32>
    %213 = arith.subf %212, %211 : vector<2x64xf32>
    %214 = math.exp %213 : vector<2x64xf32>
    %cst_65 = arith.constant 1.000000e+00 : f32
    %215 = vector.broadcast %cst_65 : f32 to vector<2x64xf32>
    %216 = arith.addf %215, %214 : vector<2x64xf32>
    %217 = tpu.reciprocal %216 {approx = true} : vector<2x64xf32> -> vector<2x64xf32>
    %218 = vector.extract_strided_slice %203 {offsets = [0, 128], sizes = [2, 64], strides = [1, 1]} : vector<2x256xf32> to vector<2x64xf32>
    %219 = math.tanh %218 : vector<2x64xf32>
    %220 = vector.extract_strided_slice %203 {offsets = [0, 192], sizes = [2, 64], strides = [1, 1]} : vector<2x256xf32> to vector<2x64xf32>
    %cst_66 = arith.constant 0.000000e+00 : f32
    %221 = vector.broadcast %cst_66 : f32 to vector<2x64xf32>
    %222 = arith.subf %221, %220 : vector<2x64xf32>
    %223 = math.exp %222 : vector<2x64xf32>
    %cst_67 = arith.constant 1.000000e+00 : f32
    %224 = vector.broadcast %cst_67 : f32 to vector<2x64xf32>
    %225 = arith.addf %224, %223 : vector<2x64xf32>
    %226 = tpu.reciprocal %225 {approx = true} : vector<2x64xf32> -> vector<2x64xf32>
    %227 = arith.mulf %217, %192 : vector<2x64xf32>
    %228 = arith.mulf %210, %219 : vector<2x64xf32>
    %229 = arith.addf %227, %228 : vector<2x64xf32>
    %230 = math.tanh %229 : vector<2x64xf32>
    %231 = arith.mulf %226, %230 : vector<2x64xf32>
    %232 = vector.extract_strided_slice %231 {offsets = [0, 0], sizes = [2, 32], strides = [1, 1]} : vector<2x64xf32> to vector<2x32xf32>
    %c10_68 = arith.constant 10 : index
    %c0_69 = arith.constant 0 : index
    %233 = vector.load %arg27[%c10_68, %c0_69] : memref<16x64xf32, #tpu.memory_space<vmem>>, vector<2x32xf32>
    tpu.vector_store %arg27[%c10_68, %c0_69], %232 {strides = array<i32>} : memref<16x64xf32, #tpu.memory_space<vmem>>, vector<2x32xf32>,
    %234 = vector.extract_strided_slice %231 {offsets = [0, 32], sizes = [2, 32], strides = [1, 1]} : vector<2x64xf32> to vector<2x32xf32>
    %c4_70 = arith.constant 4 : index
    %c32_71 = arith.constant 32 : index
    %235 = vector.load %arg27[%c4_70, %c32_71] : memref<16x64xf32, #tpu.memory_space<vmem>>, vector<2x32xf32>
    tpu.vector_store %arg27[%c4_70, %c32_71], %234 {strides = array<i32>} : memref<16x64xf32, #tpu.memory_space<vmem>>, vector<2x32xf32>,
    %236 = vector.extract_strided_slice %8 {offsets = [12, 0], sizes = [2, 256], strides = [1, 1]} : vector<16x256xf32> to vector<2x256xf32>
    %237 = vector.extract_strided_slice %10 {offsets = [2, 0], sizes = [2, 256], strides = [1, 1]} : vector<16x256xf32> to vector<2x256xf32>
    %238 = arith.addf %236, %237 : vector<2x256xf32>
    %cst_72 = arith.constant dense<0.000000e+00> : vector<2x256xf32>
    %239 = tpu.matmul %231, %11, %cst_72 {dimension_numbers = #tpu.dot_dimension_numbers<[1], [0], [0], [1], [0, 0, 1, 1], [], []>} : vector<2x64xf32>, vector<64x256xf32>, vector<2x256xf32> -> vector<2x256xf32>
    %240 = arith.addf %238, %239 : vector<2x256xf32>
    %241 = vector.extract_strided_slice %240 {offsets = [0, 0], sizes = [2, 64], strides = [1, 1]} : vector<2x256xf32> to vector<2x64xf32>
    %cst_73 = arith.constant 0.000000e+00 : f32
    %242 = vector.broadcast %cst_73 : f32 to vector<2x64xf32>
    %243 = arith.subf %242, %241 : vector<2x64xf32>
    %244 = math.exp %243 : vector<2x64xf32>
    %cst_74 = arith.constant 1.000000e+00 : f32
    %245 = vector.broadcast %cst_74 : f32 to vector<2x64xf32>
    %246 = arith.addf %245, %244 : vector<2x64xf32>
    %247 = tpu.reciprocal %246 {approx = true} : vector<2x64xf32> -> vector<2x64xf32>
    %248 = vector.extract_strided_slice %240 {offsets = [0, 64], sizes = [2, 64], strides = [1, 1]} : vector<2x256xf32> to vector<2x64xf32>
    %cst_75 = arith.constant 0.000000e+00 : f32
    %249 = vector.broadcast %cst_75 : f32 to vector<2x64xf32>
    %250 = arith.subf %249, %248 : vector<2x64xf32>
    %251 = math.exp %250 : vector<2x64xf32>
    %cst_76 = arith.constant 1.000000e+00 : f32
    %252 = vector.broadcast %cst_76 : f32 to vector<2x64xf32>
    %253 = arith.addf %252, %251 : vector<2x64xf32>
    %254 = tpu.reciprocal %253 {approx = true} : vector<2x64xf32> -> vector<2x64xf32>
    %255 = vector.extract_strided_slice %240 {offsets = [0, 128], sizes = [2, 64], strides = [1, 1]} : vector<2x256xf32> to vector<2x64xf32>
    %256 = math.tanh %255 : vector<2x64xf32>
    %257 = vector.extract_strided_slice %240 {offsets = [0, 192], sizes = [2, 64], strides = [1, 1]} : vector<2x256xf32> to vector<2x64xf32>
    %cst_77 = arith.constant 0.000000e+00 : f32
    %258 = vector.broadcast %cst_77 : f32 to vector<2x64xf32>
    %259 = arith.subf %258, %257 : vector<2x64xf32>
    %260 = math.exp %259 : vector<2x64xf32>
    %cst_78 = arith.constant 1.000000e+00 : f32
    %261 = vector.broadcast %cst_78 : f32 to vector<2x64xf32>
    %262 = arith.addf %261, %260 : vector<2x64xf32>
    %263 = tpu.reciprocal %262 {approx = true} : vector<2x64xf32> -> vector<2x64xf32>
    %264 = arith.mulf %254, %229 : vector<2x64xf32>
    %265 = arith.mulf %247, %256 : vector<2x64xf32>
    %266 = arith.addf %264, %265 : vector<2x64xf32>
    %267 = math.tanh %266 : vector<2x64xf32>
    %268 = arith.mulf %263, %267 : vector<2x64xf32>
    %269 = vector.extract_strided_slice %268 {offsets = [0, 0], sizes = [2, 32], strides = [1, 1]} : vector<2x64xf32> to vector<2x32xf32>
    %c12_79 = arith.constant 12 : index
    %c0_80 = arith.constant 0 : index
    %270 = vector.load %arg27[%c12_79, %c0_80] : memref<16x64xf32, #tpu.memory_space<vmem>>, vector<2x32xf32>
    tpu.vector_store %arg27[%c12_79, %c0_80], %269 {strides = array<i32>} : memref<16x64xf32, #tpu.memory_space<vmem>>, vector<2x32xf32>,
    %271 = vector.extract_strided_slice %268 {offsets = [0, 32], sizes = [2, 32], strides = [1, 1]} : vector<2x64xf32> to vector<2x32xf32>
    %c2_81 = arith.constant 2 : index
    %c32_82 = arith.constant 32 : index
    %272 = vector.load %arg27[%c2_81, %c32_82] : memref<16x64xf32, #tpu.memory_space<vmem>>, vector<2x32xf32>
    tpu.vector_store %arg27[%c2_81, %c32_82], %271 {strides = array<i32>} : memref<16x64xf32, #tpu.memory_space<vmem>>, vector<2x32xf32>,
    %273 = vector.extract_strided_slice %8 {offsets = [14, 0], sizes = [2, 256], strides = [1, 1]} : vector<16x256xf32> to vector<2x256xf32>
    %274 = vector.extract_strided_slice %10 {offsets = [0, 0], sizes = [2, 256], strides = [1, 1]} : vector<16x256xf32> to vector<2x256xf32>
    %275 = arith.addf %273, %274 : vector<2x256xf32>
    %cst_83 = arith.constant dense<0.000000e+00> : vector<2x256xf32>
    %276 = tpu.matmul %268, %11, %cst_83 {dimension_numbers = #tpu.dot_dimension_numbers<[1], [0], [0], [1], [0, 0, 1, 1], [], []>} : vector<2x64xf32>, vector<64x256xf32>, vector<2x256xf32> -> vector<2x256xf32>
    %277 = arith.addf %275, %276 : vector<2x256xf32>
    %278 = vector.extract_strided_slice %277 {offsets = [0, 0], sizes = [2, 64], strides = [1, 1]} : vector<2x256xf32> to vector<2x64xf32>
    %cst_84 = arith.constant 0.000000e+00 : f32
    %279 = vector.broadcast %cst_84 : f32 to vector<2x64xf32>
    %280 = arith.subf %279, %278 : vector<2x64xf32>
    %281 = math.exp %280 : vector<2x64xf32>
    %cst_85 = arith.constant 1.000000e+00 : f32
    %282 = vector.broadcast %cst_85 : f32 to vector<2x64xf32>
    %283 = arith.addf %282, %281 : vector<2x64xf32>
    %284 = tpu.reciprocal %283 {approx = true} : vector<2x64xf32> -> vector<2x64xf32>
    %285 = vector.extract_strided_slice %277 {offsets = [0, 64], sizes = [2, 64], strides = [1, 1]} : vector<2x256xf32> to vector<2x64xf32>
    %cst_86 = arith.constant 0.000000e+00 : f32
    %286 = vector.broadcast %cst_86 : f32 to vector<2x64xf32>
    %287 = arith.subf %286, %285 : vector<2x64xf32>
    %288 = math.exp %287 : vector<2x64xf32>
    %cst_87 = arith.constant 1.000000e+00 : f32
    %289 = vector.broadcast %cst_87 : f32 to vector<2x64xf32>
    %290 = arith.addf %289, %288 : vector<2x64xf32>
    %291 = tpu.reciprocal %290 {approx = true} : vector<2x64xf32> -> vector<2x64xf32>
    %292 = vector.extract_strided_slice %277 {offsets = [0, 128], sizes = [2, 64], strides = [1, 1]} : vector<2x256xf32> to vector<2x64xf32>
    %293 = math.tanh %292 : vector<2x64xf32>
    %294 = vector.extract_strided_slice %277 {offsets = [0, 192], sizes = [2, 64], strides = [1, 1]} : vector<2x256xf32> to vector<2x64xf32>
    %cst_88 = arith.constant 0.000000e+00 : f32
    %295 = vector.broadcast %cst_88 : f32 to vector<2x64xf32>
    %296 = arith.subf %295, %294 : vector<2x64xf32>
    %297 = math.exp %296 : vector<2x64xf32>
    %cst_89 = arith.constant 1.000000e+00 : f32
    %298 = vector.broadcast %cst_89 : f32 to vector<2x64xf32>
    %299 = arith.addf %298, %297 : vector<2x64xf32>
    %300 = tpu.reciprocal %299 {approx = true} : vector<2x64xf32> -> vector<2x64xf32>
    %301 = arith.mulf %291, %266 : vector<2x64xf32>
    %302 = arith.mulf %284, %293 : vector<2x64xf32>
    %303 = arith.addf %301, %302 : vector<2x64xf32>
    %304 = math.tanh %303 : vector<2x64xf32>
    %305 = arith.mulf %300, %304 : vector<2x64xf32>
    %306 = vector.extract_strided_slice %305 {offsets = [0, 0], sizes = [2, 32], strides = [1, 1]} : vector<2x64xf32> to vector<2x32xf32>
    %c14_90 = arith.constant 14 : index
    %c0_91 = arith.constant 0 : index
    %307 = vector.load %arg27[%c14_90, %c0_91] : memref<16x64xf32, #tpu.memory_space<vmem>>, vector<2x32xf32>
    tpu.vector_store %arg27[%c14_90, %c0_91], %306 {strides = array<i32>} : memref<16x64xf32, #tpu.memory_space<vmem>>, vector<2x32xf32>,
    %308 = vector.extract_strided_slice %305 {offsets = [0, 32], sizes = [2, 32], strides = [1, 1]} : vector<2x64xf32> to vector<2x32xf32>
    %c0_92 = arith.constant 0 : index
    %c32_93 = arith.constant 32 : index
    %309 = vector.load %arg27[%c0_92, %c32_93] : memref<16x64xf32, #tpu.memory_space<vmem>>, vector<2x32xf32>
    tpu.vector_store %arg27[%c0_92, %c32_93], %308 {strides = array<i32>} : memref<16x64xf32, #tpu.memory_space<vmem>>, vector<2x32xf32>,
    %c0_94 = arith.constant 0 : index
    %c0_95 = arith.constant 0 : index
    %310 = vector.load %arg27[%c0_94, %c0_95] : memref<16x64xf32, #tpu.memory_space<vmem>>, vector<16x64xf32>
    %c0_96 = arith.constant 0 : index
    %c0_97 = arith.constant 0 : index
    %311 = vector.load %arg6[%c0_96, %c0_97] : memref<64x256xf32, #tpu.memory_space<vmem>>, vector<64x256xf32>
    %cst_98 = arith.constant dense<0.000000e+00> : vector<16x256xf32>
    %312 = tpu.matmul %310, %311, %cst_98 {dimension_numbers = #tpu.dot_dimension_numbers<[1], [0], [0], [1], [0, 0, 1, 1], [], []>} : vector<16x64xf32>, vector<64x256xf32>, vector<16x256xf32> -> vector<16x256xf32>
    %c0_99 = arith.constant 0 : index
    %c0_100 = arith.constant 0 : index
    %313 = vector.load %arg9[%c0_99, %c0_100] : memref<1x256xf32, #tpu.memory_space<vmem>>, vector<1x256xf32>
    %314 = vector.broadcast %313 : vector<1x256xf32> to vector<16x256xf32>
    %315 = arith.addf %312, %314 : vector<16x256xf32>
    %c0_101 = arith.constant 0 : index
    %c0_102 = arith.constant 0 : index
    %316 = vector.load %arg7[%c0_101, %c0_102] : memref<64x256xf32, #tpu.memory_space<vmem>>, vector<64x256xf32>
    %cst_103 = arith.constant dense<0.000000e+00> : vector<16x256xf32>
    %317 = tpu.matmul %310, %316, %cst_103 {dimension_numbers = #tpu.dot_dimension_numbers<[1], [0], [0], [1], [0, 0, 1, 1], [], []>} : vector<16x64xf32>, vector<64x256xf32>, vector<16x256xf32> -> vector<16x256xf32>
    %c0_104 = arith.constant 0 : index
    %c0_105 = arith.constant 0 : index
    %318 = vector.load %arg8[%c0_104, %c0_105] : memref<64x256xf32, #tpu.memory_space<vmem>>, vector<64x256xf32>
    %cst_106 = arith.constant 0.000000e+00 : f32
    %319 = vector.broadcast %cst_106 : f32 to vector<2x64xf32>
    %cst_107 = arith.constant 0.000000e+00 : f32
    %320 = vector.broadcast %cst_107 : f32 to vector<2x64xf32>
    %321 = vector.extract_strided_slice %315 {offsets = [0, 0], sizes = [2, 256], strides = [1, 1]} : vector<16x256xf32> to vector<2x256xf32>
    %322 = vector.extract_strided_slice %317 {offsets = [14, 0], sizes = [2, 256], strides = [1, 1]} : vector<16x256xf32> to vector<2x256xf32>
    %323 = arith.addf %321, %322 : vector<2x256xf32>
    %cst_108 = arith.constant dense<0.000000e+00> : vector<2x256xf32>
    %324 = tpu.matmul %319, %318, %cst_108 {dimension_numbers = #tpu.dot_dimension_numbers<[1], [0], [0], [1], [0, 0, 1, 1], [], []>} : vector<2x64xf32>, vector<64x256xf32>, vector<2x256xf32> -> vector<2x256xf32>
    %325 = arith.addf %323, %324 : vector<2x256xf32>
    %326 = vector.extract_strided_slice %325 {offsets = [0, 0], sizes = [2, 64], strides = [1, 1]} : vector<2x256xf32> to vector<2x64xf32>
    %cst_109 = arith.constant 0.000000e+00 : f32
    %327 = vector.broadcast %cst_109 : f32 to vector<2x64xf32>
    %328 = arith.subf %327, %326 : vector<2x64xf32>
    %329 = math.exp %328 : vector<2x64xf32>
    %cst_110 = arith.constant 1.000000e+00 : f32
    %330 = vector.broadcast %cst_110 : f32 to vector<2x64xf32>
    %331 = arith.addf %330, %329 : vector<2x64xf32>
    %332 = tpu.reciprocal %331 {approx = true} : vector<2x64xf32> -> vector<2x64xf32>
    %333 = vector.extract_strided_slice %325 {offsets = [0, 64], sizes = [2, 64], strides = [1, 1]} : vector<2x256xf32> to vector<2x64xf32>
    %cst_111 = arith.constant 0.000000e+00 : f32
    %334 = vector.broadcast %cst_111 : f32 to vector<2x64xf32>
    %335 = arith.subf %334, %333 : vector<2x64xf32>
    %336 = math.exp %335 : vector<2x64xf32>
    %cst_112 = arith.constant 1.000000e+00 : f32
    %337 = vector.broadcast %cst_112 : f32 to vector<2x64xf32>
    %338 = arith.addf %337, %336 : vector<2x64xf32>
    %339 = tpu.reciprocal %338 {approx = true} : vector<2x64xf32> -> vector<2x64xf32>
    %340 = vector.extract_strided_slice %325 {offsets = [0, 128], sizes = [2, 64], strides = [1, 1]} : vector<2x256xf32> to vector<2x64xf32>
    %341 = math.tanh %340 : vector<2x64xf32>
    %342 = vector.extract_strided_slice %325 {offsets = [0, 192], sizes = [2, 64], strides = [1, 1]} : vector<2x256xf32> to vector<2x64xf32>
    %cst_113 = arith.constant 0.000000e+00 : f32
    %343 = vector.broadcast %cst_113 : f32 to vector<2x64xf32>
    %344 = arith.subf %343, %342 : vector<2x64xf32>
    %345 = math.exp %344 : vector<2x64xf32>
    %cst_114 = arith.constant 1.000000e+00 : f32
    %346 = vector.broadcast %cst_114 : f32 to vector<2x64xf32>
    %347 = arith.addf %346, %345 : vector<2x64xf32>
    %348 = tpu.reciprocal %347 {approx = true} : vector<2x64xf32> -> vector<2x64xf32>
    %349 = arith.mulf %339, %320 : vector<2x64xf32>
    %350 = arith.mulf %332, %341 : vector<2x64xf32>
    %351 = arith.addf %349, %350 : vector<2x64xf32>
    %352 = math.tanh %351 : vector<2x64xf32>
    %353 = arith.mulf %348, %352 : vector<2x64xf32>
    %354 = vector.extract_strided_slice %353 {offsets = [0, 0], sizes = [1, 32], strides = [1, 1]} : vector<2x64xf32> to vector<1x32xf32>
    %c0_115 = arith.constant 0 : index
    %c0_116 = arith.constant 0 : index
    %355 = vector.load %arg28[%c0_115, %c0_116] : memref<8x128xf32, #tpu.memory_space<vmem>>, vector<1x32xf32>
    tpu.vector_store %arg28[%c0_115, %c0_116], %354 {strides = array<i32>} : memref<8x128xf32, #tpu.memory_space<vmem>>, vector<1x32xf32>,
    %356 = vector.extract_strided_slice %353 {offsets = [0, 32], sizes = [1, 32], strides = [1, 1]} : vector<2x64xf32> to vector<1x32xf32>
    %c7 = arith.constant 7 : index
    %c32_117 = arith.constant 32 : index
    %357 = vector.load %arg28[%c7, %c32_117] : memref<8x128xf32, #tpu.memory_space<vmem>>, vector<1x32xf32>
    tpu.vector_store %arg28[%c7, %c32_117], %356 {strides = array<i32>} : memref<8x128xf32, #tpu.memory_space<vmem>>, vector<1x32xf32>,
    %358 = vector.extract_strided_slice %353 {offsets = [1, 0], sizes = [1, 32], strides = [1, 1]} : vector<2x64xf32> to vector<1x32xf32>
    %c0_118 = arith.constant 0 : index
    %c64 = arith.constant 64 : index
    %359 = vector.load %arg28[%c0_118, %c64] : memref<8x128xf32, #tpu.memory_space<vmem>>, vector<1x32xf32>
    tpu.vector_store %arg28[%c0_118, %c64], %358 {strides = array<i32>} : memref<8x128xf32, #tpu.memory_space<vmem>>, vector<1x32xf32>,
    %360 = vector.extract_strided_slice %353 {offsets = [1, 32], sizes = [1, 32], strides = [1, 1]} : vector<2x64xf32> to vector<1x32xf32>
    %c7_119 = arith.constant 7 : index
    %c96 = arith.constant 96 : index
    %361 = vector.load %arg28[%c7_119, %c96] : memref<8x128xf32, #tpu.memory_space<vmem>>, vector<1x32xf32>
    tpu.vector_store %arg28[%c7_119, %c96], %360 {strides = array<i32>} : memref<8x128xf32, #tpu.memory_space<vmem>>, vector<1x32xf32>,
    %362 = vector.extract_strided_slice %315 {offsets = [2, 0], sizes = [2, 256], strides = [1, 1]} : vector<16x256xf32> to vector<2x256xf32>
    %363 = vector.extract_strided_slice %317 {offsets = [12, 0], sizes = [2, 256], strides = [1, 1]} : vector<16x256xf32> to vector<2x256xf32>
    %364 = arith.addf %362, %363 : vector<2x256xf32>
    %cst_120 = arith.constant dense<0.000000e+00> : vector<2x256xf32>
    %365 = tpu.matmul %353, %318, %cst_120 {dimension_numbers = #tpu.dot_dimension_numbers<[1], [0], [0], [1], [0, 0, 1, 1], [], []>} : vector<2x64xf32>, vector<64x256xf32>, vector<2x256xf32> -> vector<2x256xf32>
    %366 = arith.addf %364, %365 : vector<2x256xf32>
    %367 = vector.extract_strided_slice %366 {offsets = [0, 0], sizes = [2, 64], strides = [1, 1]} : vector<2x256xf32> to vector<2x64xf32>
    %cst_121 = arith.constant 0.000000e+00 : f32
    %368 = vector.broadcast %cst_121 : f32 to vector<2x64xf32>
    %369 = arith.subf %368, %367 : vector<2x64xf32>
    %370 = math.exp %369 : vector<2x64xf32>
    %cst_122 = arith.constant 1.000000e+00 : f32
    %371 = vector.broadcast %cst_122 : f32 to vector<2x64xf32>
    %372 = arith.addf %371, %370 : vector<2x64xf32>
    %373 = tpu.reciprocal %372 {approx = true} : vector<2x64xf32> -> vector<2x64xf32>
    %374 = vector.extract_strided_slice %366 {offsets = [0, 64], sizes = [2, 64], strides = [1, 1]} : vector<2x256xf32> to vector<2x64xf32>
    %cst_123 = arith.constant 0.000000e+00 : f32
    %375 = vector.broadcast %cst_123 : f32 to vector<2x64xf32>
    %376 = arith.subf %375, %374 : vector<2x64xf32>
    %377 = math.exp %376 : vector<2x64xf32>
    %cst_124 = arith.constant 1.000000e+00 : f32
    %378 = vector.broadcast %cst_124 : f32 to vector<2x64xf32>
    %379 = arith.addf %378, %377 : vector<2x64xf32>
    %380 = tpu.reciprocal %379 {approx = true} : vector<2x64xf32> -> vector<2x64xf32>
    %381 = vector.extract_strided_slice %366 {offsets = [0, 128], sizes = [2, 64], strides = [1, 1]} : vector<2x256xf32> to vector<2x64xf32>
    %382 = math.tanh %381 : vector<2x64xf32>
    %383 = vector.extract_strided_slice %366 {offsets = [0, 192], sizes = [2, 64], strides = [1, 1]} : vector<2x256xf32> to vector<2x64xf32>
    %cst_125 = arith.constant 0.000000e+00 : f32
    %384 = vector.broadcast %cst_125 : f32 to vector<2x64xf32>
    %385 = arith.subf %384, %383 : vector<2x64xf32>
    %386 = math.exp %385 : vector<2x64xf32>
    %cst_126 = arith.constant 1.000000e+00 : f32
    %387 = vector.broadcast %cst_126 : f32 to vector<2x64xf32>
    %388 = arith.addf %387, %386 : vector<2x64xf32>
    %389 = tpu.reciprocal %388 {approx = true} : vector<2x64xf32> -> vector<2x64xf32>
    %390 = arith.mulf %380, %351 : vector<2x64xf32>
    %391 = arith.mulf %373, %382 : vector<2x64xf32>
    %392 = arith.addf %390, %391 : vector<2x64xf32>
    %393 = math.tanh %392 : vector<2x64xf32>
    %394 = arith.mulf %389, %393 : vector<2x64xf32>
    %395 = vector.extract_strided_slice %394 {offsets = [0, 0], sizes = [1, 32], strides = [1, 1]} : vector<2x64xf32> to vector<1x32xf32>
    %c1 = arith.constant 1 : index
    %c0_127 = arith.constant 0 : index
    %396 = vector.load %arg28[%c1, %c0_127] : memref<8x128xf32, #tpu.memory_space<vmem>>, vector<1x32xf32>
    tpu.vector_store %arg28[%c1, %c0_127], %395 {strides = array<i32>} : memref<8x128xf32, #tpu.memory_space<vmem>>, vector<1x32xf32>,
    %397 = vector.extract_strided_slice %394 {offsets = [0, 32], sizes = [1, 32], strides = [1, 1]} : vector<2x64xf32> to vector<1x32xf32>
    %c6_128 = arith.constant 6 : index
    %c32_129 = arith.constant 32 : index
    %398 = vector.load %arg28[%c6_128, %c32_129] : memref<8x128xf32, #tpu.memory_space<vmem>>, vector<1x32xf32>
    tpu.vector_store %arg28[%c6_128, %c32_129], %397 {strides = array<i32>} : memref<8x128xf32, #tpu.memory_space<vmem>>, vector<1x32xf32>,
    %399 = vector.extract_strided_slice %394 {offsets = [1, 0], sizes = [1, 32], strides = [1, 1]} : vector<2x64xf32> to vector<1x32xf32>
    %c1_130 = arith.constant 1 : index
    %c64_131 = arith.constant 64 : index
    %400 = vector.load %arg28[%c1_130, %c64_131] : memref<8x128xf32, #tpu.memory_space<vmem>>, vector<1x32xf32>
    tpu.vector_store %arg28[%c1_130, %c64_131], %399 {strides = array<i32>} : memref<8x128xf32, #tpu.memory_space<vmem>>, vector<1x32xf32>,
    %401 = vector.extract_strided_slice %394 {offsets = [1, 32], sizes = [1, 32], strides = [1, 1]} : vector<2x64xf32> to vector<1x32xf32>
    %c6_132 = arith.constant 6 : index
    %c96_133 = arith.constant 96 : index
    %402 = vector.load %arg28[%c6_132, %c96_133] : memref<8x128xf32, #tpu.memory_space<vmem>>, vector<1x32xf32>
    tpu.vector_store %arg28[%c6_132, %c96_133], %401 {strides = array<i32>} : memref<8x128xf32, #tpu.memory_space<vmem>>, vector<1x32xf32>,
    %403 = vector.extract_strided_slice %315 {offsets = [4, 0], sizes = [2, 256], strides = [1, 1]} : vector<16x256xf32> to vector<2x256xf32>
    %404 = vector.extract_strided_slice %317 {offsets = [10, 0], sizes = [2, 256], strides = [1, 1]} : vector<16x256xf32> to vector<2x256xf32>
    %405 = arith.addf %403, %404 : vector<2x256xf32>
    %cst_134 = arith.constant dense<0.000000e+00> : vector<2x256xf32>
    %406 = tpu.matmul %394, %318, %cst_134 {dimension_numbers = #tpu.dot_dimension_numbers<[1], [0], [0], [1], [0, 0, 1, 1], [], []>} : vector<2x64xf32>, vector<64x256xf32>, vector<2x256xf32> -> vector<2x256xf32>
    %407 = arith.addf %405, %406 : vector<2x256xf32>
    %408 = vector.extract_strided_slice %407 {offsets = [0, 0], sizes = [2, 64], strides = [1, 1]} : vector<2x256xf32> to vector<2x64xf32>
    %cst_135 = arith.constant 0.000000e+00 : f32
    %409 = vector.broadcast %cst_135 : f32 to vector<2x64xf32>
    %410 = arith.subf %409, %408 : vector<2x64xf32>
    %411 = math.exp %410 : vector<2x64xf32>
    %cst_136 = arith.constant 1.000000e+00 : f32
    %412 = vector.broadcast %cst_136 : f32 to vector<2x64xf32>
    %413 = arith.addf %412, %411 : vector<2x64xf32>
    %414 = tpu.reciprocal %413 {approx = true} : vector<2x64xf32> -> vector<2x64xf32>
    %415 = vector.extract_strided_slice %407 {offsets = [0, 64], sizes = [2, 64], strides = [1, 1]} : vector<2x256xf32> to vector<2x64xf32>
    %cst_137 = arith.constant 0.000000e+00 : f32
    %416 = vector.broadcast %cst_137 : f32 to vector<2x64xf32>
    %417 = arith.subf %416, %415 : vector<2x64xf32>
    %418 = math.exp %417 : vector<2x64xf32>
    %cst_138 = arith.constant 1.000000e+00 : f32
    %419 = vector.broadcast %cst_138 : f32 to vector<2x64xf32>
    %420 = arith.addf %419, %418 : vector<2x64xf32>
    %421 = tpu.reciprocal %420 {approx = true} : vector<2x64xf32> -> vector<2x64xf32>
    %422 = vector.extract_strided_slice %407 {offsets = [0, 128], sizes = [2, 64], strides = [1, 1]} : vector<2x256xf32> to vector<2x64xf32>
    %423 = math.tanh %422 : vector<2x64xf32>
    %424 = vector.extract_strided_slice %407 {offsets = [0, 192], sizes = [2, 64], strides = [1, 1]} : vector<2x256xf32> to vector<2x64xf32>
    %cst_139 = arith.constant 0.000000e+00 : f32
    %425 = vector.broadcast %cst_139 : f32 to vector<2x64xf32>
    %426 = arith.subf %425, %424 : vector<2x64xf32>
    %427 = math.exp %426 : vector<2x64xf32>
    %cst_140 = arith.constant 1.000000e+00 : f32
    %428 = vector.broadcast %cst_140 : f32 to vector<2x64xf32>
    %429 = arith.addf %428, %427 : vector<2x64xf32>
    %430 = tpu.reciprocal %429 {approx = true} : vector<2x64xf32> -> vector<2x64xf32>
    %431 = arith.mulf %421, %392 : vector<2x64xf32>
    %432 = arith.mulf %414, %423 : vector<2x64xf32>
    %433 = arith.addf %431, %432 : vector<2x64xf32>
    %434 = math.tanh %433 : vector<2x64xf32>
    %435 = arith.mulf %430, %434 : vector<2x64xf32>
    %436 = vector.extract_strided_slice %435 {offsets = [0, 0], sizes = [1, 32], strides = [1, 1]} : vector<2x64xf32> to vector<1x32xf32>
    %c2_141 = arith.constant 2 : index
    %c0_142 = arith.constant 0 : index
    %437 = vector.load %arg28[%c2_141, %c0_142] : memref<8x128xf32, #tpu.memory_space<vmem>>, vector<1x32xf32>
    tpu.vector_store %arg28[%c2_141, %c0_142], %436 {strides = array<i32>} : memref<8x128xf32, #tpu.memory_space<vmem>>, vector<1x32xf32>,
    %438 = vector.extract_strided_slice %435 {offsets = [0, 32], sizes = [1, 32], strides = [1, 1]} : vector<2x64xf32> to vector<1x32xf32>
    %c5 = arith.constant 5 : index
    %c32_143 = arith.constant 32 : index
    %439 = vector.load %arg28[%c5, %c32_143] : memref<8x128xf32, #tpu.memory_space<vmem>>, vector<1x32xf32>
    tpu.vector_store %arg28[%c5, %c32_143], %438 {strides = array<i32>} : memref<8x128xf32, #tpu.memory_space<vmem>>, vector<1x32xf32>,
    %440 = vector.extract_strided_slice %435 {offsets = [1, 0], sizes = [1, 32], strides = [1, 1]} : vector<2x64xf32> to vector<1x32xf32>
    %c2_144 = arith.constant 2 : index
    %c64_145 = arith.constant 64 : index
    %441 = vector.load %arg28[%c2_144, %c64_145] : memref<8x128xf32, #tpu.memory_space<vmem>>, vector<1x32xf32>
    tpu.vector_store %arg28[%c2_144, %c64_145], %440 {strides = array<i32>} : memref<8x128xf32, #tpu.memory_space<vmem>>, vector<1x32xf32>,
    %442 = vector.extract_strided_slice %435 {offsets = [1, 32], sizes = [1, 32], strides = [1, 1]} : vector<2x64xf32> to vector<1x32xf32>
    %c5_146 = arith.constant 5 : index
    %c96_147 = arith.constant 96 : index
    %443 = vector.load %arg28[%c5_146, %c96_147] : memref<8x128xf32, #tpu.memory_space<vmem>>, vector<1x32xf32>
    tpu.vector_store %arg28[%c5_146, %c96_147], %442 {strides = array<i32>} : memref<8x128xf32, #tpu.memory_space<vmem>>, vector<1x32xf32>,
    %444 = vector.extract_strided_slice %315 {offsets = [6, 0], sizes = [2, 256], strides = [1, 1]} : vector<16x256xf32> to vector<2x256xf32>
    %445 = vector.extract_strided_slice %317 {offsets = [8, 0], sizes = [2, 256], strides = [1, 1]} : vector<16x256xf32> to vector<2x256xf32>
    %446 = arith.addf %444, %445 : vector<2x256xf32>
    %cst_148 = arith.constant dense<0.000000e+00> : vector<2x256xf32>
    %447 = tpu.matmul %435, %318, %cst_148 {dimension_numbers = #tpu.dot_dimension_numbers<[1], [0], [0], [1], [0, 0, 1, 1], [], []>} : vector<2x64xf32>, vector<64x256xf32>, vector<2x256xf32> -> vector<2x256xf32>
    %448 = arith.addf %446, %447 : vector<2x256xf32>
    %449 = vector.extract_strided_slice %448 {offsets = [0, 0], sizes = [2, 64], strides = [1, 1]} : vector<2x256xf32> to vector<2x64xf32>
    %cst_149 = arith.constant 0.000000e+00 : f32
    %450 = vector.broadcast %cst_149 : f32 to vector<2x64xf32>
    %451 = arith.subf %450, %449 : vector<2x64xf32>
    %452 = math.exp %451 : vector<2x64xf32>
    %cst_150 = arith.constant 1.000000e+00 : f32
    %453 = vector.broadcast %cst_150 : f32 to vector<2x64xf32>
    %454 = arith.addf %453, %452 : vector<2x64xf32>
    %455 = tpu.reciprocal %454 {approx = true} : vector<2x64xf32> -> vector<2x64xf32>
    %456 = vector.extract_strided_slice %448 {offsets = [0, 64], sizes = [2, 64], strides = [1, 1]} : vector<2x256xf32> to vector<2x64xf32>
    %cst_151 = arith.constant 0.000000e+00 : f32
    %457 = vector.broadcast %cst_151 : f32 to vector<2x64xf32>
    %458 = arith.subf %457, %456 : vector<2x64xf32>
    %459 = math.exp %458 : vector<2x64xf32>
    %cst_152 = arith.constant 1.000000e+00 : f32
    %460 = vector.broadcast %cst_152 : f32 to vector<2x64xf32>
    %461 = arith.addf %460, %459 : vector<2x64xf32>
    %462 = tpu.reciprocal %461 {approx = true} : vector<2x64xf32> -> vector<2x64xf32>
    %463 = vector.extract_strided_slice %448 {offsets = [0, 128], sizes = [2, 64], strides = [1, 1]} : vector<2x256xf32> to vector<2x64xf32>
    %464 = math.tanh %463 : vector<2x64xf32>
    %465 = vector.extract_strided_slice %448 {offsets = [0, 192], sizes = [2, 64], strides = [1, 1]} : vector<2x256xf32> to vector<2x64xf32>
    %cst_153 = arith.constant 0.000000e+00 : f32
    %466 = vector.broadcast %cst_153 : f32 to vector<2x64xf32>
    %467 = arith.subf %466, %465 : vector<2x64xf32>
    %468 = math.exp %467 : vector<2x64xf32>
    %cst_154 = arith.constant 1.000000e+00 : f32
    %469 = vector.broadcast %cst_154 : f32 to vector<2x64xf32>
    %470 = arith.addf %469, %468 : vector<2x64xf32>
    %471 = tpu.reciprocal %470 {approx = true} : vector<2x64xf32> -> vector<2x64xf32>
    %472 = arith.mulf %462, %433 : vector<2x64xf32>
    %473 = arith.mulf %455, %464 : vector<2x64xf32>
    %474 = arith.addf %472, %473 : vector<2x64xf32>
    %475 = math.tanh %474 : vector<2x64xf32>
    %476 = arith.mulf %471, %475 : vector<2x64xf32>
    %477 = vector.extract_strided_slice %476 {offsets = [0, 0], sizes = [1, 32], strides = [1, 1]} : vector<2x64xf32> to vector<1x32xf32>
    %c3 = arith.constant 3 : index
    %c0_155 = arith.constant 0 : index
    %478 = vector.load %arg28[%c3, %c0_155] : memref<8x128xf32, #tpu.memory_space<vmem>>, vector<1x32xf32>
    tpu.vector_store %arg28[%c3, %c0_155], %477 {strides = array<i32>} : memref<8x128xf32, #tpu.memory_space<vmem>>, vector<1x32xf32>,
    %479 = vector.extract_strided_slice %476 {offsets = [0, 32], sizes = [1, 32], strides = [1, 1]} : vector<2x64xf32> to vector<1x32xf32>
    %c4_156 = arith.constant 4 : index
    %c32_157 = arith.constant 32 : index
    %480 = vector.load %arg28[%c4_156, %c32_157] : memref<8x128xf32, #tpu.memory_space<vmem>>, vector<1x32xf32>
    tpu.vector_store %arg28[%c4_156, %c32_157], %479 {strides = array<i32>} : memref<8x128xf32, #tpu.memory_space<vmem>>, vector<1x32xf32>,
    %481 = vector.extract_strided_slice %476 {offsets = [1, 0], sizes = [1, 32], strides = [1, 1]} : vector<2x64xf32> to vector<1x32xf32>
    %c3_158 = arith.constant 3 : index
    %c64_159 = arith.constant 64 : index
    %482 = vector.load %arg28[%c3_158, %c64_159] : memref<8x128xf32, #tpu.memory_space<vmem>>, vector<1x32xf32>
    tpu.vector_store %arg28[%c3_158, %c64_159], %481 {strides = array<i32>} : memref<8x128xf32, #tpu.memory_space<vmem>>, vector<1x32xf32>,
    %483 = vector.extract_strided_slice %476 {offsets = [1, 32], sizes = [1, 32], strides = [1, 1]} : vector<2x64xf32> to vector<1x32xf32>
    %c4_160 = arith.constant 4 : index
    %c96_161 = arith.constant 96 : index
    %484 = vector.load %arg28[%c4_160, %c96_161] : memref<8x128xf32, #tpu.memory_space<vmem>>, vector<1x32xf32>
    tpu.vector_store %arg28[%c4_160, %c96_161], %483 {strides = array<i32>} : memref<8x128xf32, #tpu.memory_space<vmem>>, vector<1x32xf32>,
    %485 = vector.extract_strided_slice %315 {offsets = [8, 0], sizes = [2, 256], strides = [1, 1]} : vector<16x256xf32> to vector<2x256xf32>
    %486 = vector.extract_strided_slice %317 {offsets = [6, 0], sizes = [2, 256], strides = [1, 1]} : vector<16x256xf32> to vector<2x256xf32>
    %487 = arith.addf %485, %486 : vector<2x256xf32>
    %cst_162 = arith.constant dense<0.000000e+00> : vector<2x256xf32>
    %488 = tpu.matmul %476, %318, %cst_162 {dimension_numbers = #tpu.dot_dimension_numbers<[1], [0], [0], [1], [0, 0, 1, 1], [], []>} : vector<2x64xf32>, vector<64x256xf32>, vector<2x256xf32> -> vector<2x256xf32>
    %489 = arith.addf %487, %488 : vector<2x256xf32>
    %490 = vector.extract_strided_slice %489 {offsets = [0, 0], sizes = [2, 64], strides = [1, 1]} : vector<2x256xf32> to vector<2x64xf32>
    %cst_163 = arith.constant 0.000000e+00 : f32
    %491 = vector.broadcast %cst_163 : f32 to vector<2x64xf32>
    %492 = arith.subf %491, %490 : vector<2x64xf32>
    %493 = math.exp %492 : vector<2x64xf32>
    %cst_164 = arith.constant 1.000000e+00 : f32
    %494 = vector.broadcast %cst_164 : f32 to vector<2x64xf32>
    %495 = arith.addf %494, %493 : vector<2x64xf32>
    %496 = tpu.reciprocal %495 {approx = true} : vector<2x64xf32> -> vector<2x64xf32>
    %497 = vector.extract_strided_slice %489 {offsets = [0, 64], sizes = [2, 64], strides = [1, 1]} : vector<2x256xf32> to vector<2x64xf32>
    %cst_165 = arith.constant 0.000000e+00 : f32
    %498 = vector.broadcast %cst_165 : f32 to vector<2x64xf32>
    %499 = arith.subf %498, %497 : vector<2x64xf32>
    %500 = math.exp %499 : vector<2x64xf32>
    %cst_166 = arith.constant 1.000000e+00 : f32
    %501 = vector.broadcast %cst_166 : f32 to vector<2x64xf32>
    %502 = arith.addf %501, %500 : vector<2x64xf32>
    %503 = tpu.reciprocal %502 {approx = true} : vector<2x64xf32> -> vector<2x64xf32>
    %504 = vector.extract_strided_slice %489 {offsets = [0, 128], sizes = [2, 64], strides = [1, 1]} : vector<2x256xf32> to vector<2x64xf32>
    %505 = math.tanh %504 : vector<2x64xf32>
    %506 = vector.extract_strided_slice %489 {offsets = [0, 192], sizes = [2, 64], strides = [1, 1]} : vector<2x256xf32> to vector<2x64xf32>
    %cst_167 = arith.constant 0.000000e+00 : f32
    %507 = vector.broadcast %cst_167 : f32 to vector<2x64xf32>
    %508 = arith.subf %507, %506 : vector<2x64xf32>
    %509 = math.exp %508 : vector<2x64xf32>
    %cst_168 = arith.constant 1.000000e+00 : f32
    %510 = vector.broadcast %cst_168 : f32 to vector<2x64xf32>
    %511 = arith.addf %510, %509 : vector<2x64xf32>
    %512 = tpu.reciprocal %511 {approx = true} : vector<2x64xf32> -> vector<2x64xf32>
    %513 = arith.mulf %503, %474 : vector<2x64xf32>
    %514 = arith.mulf %496, %505 : vector<2x64xf32>
    %515 = arith.addf %513, %514 : vector<2x64xf32>
    %516 = math.tanh %515 : vector<2x64xf32>
    %517 = arith.mulf %512, %516 : vector<2x64xf32>
    %518 = vector.extract_strided_slice %517 {offsets = [0, 0], sizes = [1, 32], strides = [1, 1]} : vector<2x64xf32> to vector<1x32xf32>
    %c4_169 = arith.constant 4 : index
    %c0_170 = arith.constant 0 : index
    %519 = vector.load %arg28[%c4_169, %c0_170] : memref<8x128xf32, #tpu.memory_space<vmem>>, vector<1x32xf32>
    tpu.vector_store %arg28[%c4_169, %c0_170], %518 {strides = array<i32>} : memref<8x128xf32, #tpu.memory_space<vmem>>, vector<1x32xf32>,
    %520 = vector.extract_strided_slice %517 {offsets = [0, 32], sizes = [1, 32], strides = [1, 1]} : vector<2x64xf32> to vector<1x32xf32>
    %c3_171 = arith.constant 3 : index
    %c32_172 = arith.constant 32 : index
    %521 = vector.load %arg28[%c3_171, %c32_172] : memref<8x128xf32, #tpu.memory_space<vmem>>, vector<1x32xf32>
    tpu.vector_store %arg28[%c3_171, %c32_172], %520 {strides = array<i32>} : memref<8x128xf32, #tpu.memory_space<vmem>>, vector<1x32xf32>,
    %522 = vector.extract_strided_slice %517 {offsets = [1, 0], sizes = [1, 32], strides = [1, 1]} : vector<2x64xf32> to vector<1x32xf32>
    %c4_173 = arith.constant 4 : index
    %c64_174 = arith.constant 64 : index
    %523 = vector.load %arg28[%c4_173, %c64_174] : memref<8x128xf32, #tpu.memory_space<vmem>>, vector<1x32xf32>
    tpu.vector_store %arg28[%c4_173, %c64_174], %522 {strides = array<i32>} : memref<8x128xf32, #tpu.memory_space<vmem>>, vector<1x32xf32>,
    %524 = vector.extract_strided_slice %517 {offsets = [1, 32], sizes = [1, 32], strides = [1, 1]} : vector<2x64xf32> to vector<1x32xf32>
    %c3_175 = arith.constant 3 : index
    %c96_176 = arith.constant 96 : index
    %525 = vector.load %arg28[%c3_175, %c96_176] : memref<8x128xf32, #tpu.memory_space<vmem>>, vector<1x32xf32>
    tpu.vector_store %arg28[%c3_175, %c96_176], %524 {strides = array<i32>} : memref<8x128xf32, #tpu.memory_space<vmem>>, vector<1x32xf32>,
    %526 = vector.extract_strided_slice %315 {offsets = [10, 0], sizes = [2, 256], strides = [1, 1]} : vector<16x256xf32> to vector<2x256xf32>
    %527 = vector.extract_strided_slice %317 {offsets = [4, 0], sizes = [2, 256], strides = [1, 1]} : vector<16x256xf32> to vector<2x256xf32>
    %528 = arith.addf %526, %527 : vector<2x256xf32>
    %cst_177 = arith.constant dense<0.000000e+00> : vector<2x256xf32>
    %529 = tpu.matmul %517, %318, %cst_177 {dimension_numbers = #tpu.dot_dimension_numbers<[1], [0], [0], [1], [0, 0, 1, 1], [], []>} : vector<2x64xf32>, vector<64x256xf32>, vector<2x256xf32> -> vector<2x256xf32>
    %530 = arith.addf %528, %529 : vector<2x256xf32>
    %531 = vector.extract_strided_slice %530 {offsets = [0, 0], sizes = [2, 64], strides = [1, 1]} : vector<2x256xf32> to vector<2x64xf32>
    %cst_178 = arith.constant 0.000000e+00 : f32
    %532 = vector.broadcast %cst_178 : f32 to vector<2x64xf32>
    %533 = arith.subf %532, %531 : vector<2x64xf32>
    %534 = math.exp %533 : vector<2x64xf32>
    %cst_179 = arith.constant 1.000000e+00 : f32
    %535 = vector.broadcast %cst_179 : f32 to vector<2x64xf32>
    %536 = arith.addf %535, %534 : vector<2x64xf32>
    %537 = tpu.reciprocal %536 {approx = true} : vector<2x64xf32> -> vector<2x64xf32>
    %538 = vector.extract_strided_slice %530 {offsets = [0, 64], sizes = [2, 64], strides = [1, 1]} : vector<2x256xf32> to vector<2x64xf32>
    %cst_180 = arith.constant 0.000000e+00 : f32
    %539 = vector.broadcast %cst_180 : f32 to vector<2x64xf32>
    %540 = arith.subf %539, %538 : vector<2x64xf32>
    %541 = math.exp %540 : vector<2x64xf32>
    %cst_181 = arith.constant 1.000000e+00 : f32
    %542 = vector.broadcast %cst_181 : f32 to vector<2x64xf32>
    %543 = arith.addf %542, %541 : vector<2x64xf32>
    %544 = tpu.reciprocal %543 {approx = true} : vector<2x64xf32> -> vector<2x64xf32>
    %545 = vector.extract_strided_slice %530 {offsets = [0, 128], sizes = [2, 64], strides = [1, 1]} : vector<2x256xf32> to vector<2x64xf32>
    %546 = math.tanh %545 : vector<2x64xf32>
    %547 = vector.extract_strided_slice %530 {offsets = [0, 192], sizes = [2, 64], strides = [1, 1]} : vector<2x256xf32> to vector<2x64xf32>
    %cst_182 = arith.constant 0.000000e+00 : f32
    %548 = vector.broadcast %cst_182 : f32 to vector<2x64xf32>
    %549 = arith.subf %548, %547 : vector<2x64xf32>
    %550 = math.exp %549 : vector<2x64xf32>
    %cst_183 = arith.constant 1.000000e+00 : f32
    %551 = vector.broadcast %cst_183 : f32 to vector<2x64xf32>
    %552 = arith.addf %551, %550 : vector<2x64xf32>
    %553 = tpu.reciprocal %552 {approx = true} : vector<2x64xf32> -> vector<2x64xf32>
    %554 = arith.mulf %544, %515 : vector<2x64xf32>
    %555 = arith.mulf %537, %546 : vector<2x64xf32>
    %556 = arith.addf %554, %555 : vector<2x64xf32>
    %557 = math.tanh %556 : vector<2x64xf32>
    %558 = arith.mulf %553, %557 : vector<2x64xf32>
    %559 = vector.extract_strided_slice %558 {offsets = [0, 0], sizes = [1, 32], strides = [1, 1]} : vector<2x64xf32> to vector<1x32xf32>
    %c5_184 = arith.constant 5 : index
    %c0_185 = arith.constant 0 : index
    %560 = vector.load %arg28[%c5_184, %c0_185] : memref<8x128xf32, #tpu.memory_space<vmem>>, vector<1x32xf32>
    tpu.vector_store %arg28[%c5_184, %c0_185], %559 {strides = array<i32>} : memref<8x128xf32, #tpu.memory_space<vmem>>, vector<1x32xf32>,
    %561 = vector.extract_strided_slice %558 {offsets = [0, 32], sizes = [1, 32], strides = [1, 1]} : vector<2x64xf32> to vector<1x32xf32>
    %c2_186 = arith.constant 2 : index
    %c32_187 = arith.constant 32 : index
    %562 = vector.load %arg28[%c2_186, %c32_187] : memref<8x128xf32, #tpu.memory_space<vmem>>, vector<1x32xf32>
    tpu.vector_store %arg28[%c2_186, %c32_187], %561 {strides = array<i32>} : memref<8x128xf32, #tpu.memory_space<vmem>>, vector<1x32xf32>,
    %563 = vector.extract_strided_slice %558 {offsets = [1, 0], sizes = [1, 32], strides = [1, 1]} : vector<2x64xf32> to vector<1x32xf32>
    %c5_188 = arith.constant 5 : index
    %c64_189 = arith.constant 64 : index
    %564 = vector.load %arg28[%c5_188, %c64_189] : memref<8x128xf32, #tpu.memory_space<vmem>>, vector<1x32xf32>
    tpu.vector_store %arg28[%c5_188, %c64_189], %563 {strides = array<i32>} : memref<8x128xf32, #tpu.memory_space<vmem>>, vector<1x32xf32>,
    %565 = vector.extract_strided_slice %558 {offsets = [1, 32], sizes = [1, 32], strides = [1, 1]} : vector<2x64xf32> to vector<1x32xf32>
    %c2_190 = arith.constant 2 : index
    %c96_191 = arith.constant 96 : index
    %566 = vector.load %arg28[%c2_190, %c96_191] : memref<8x128xf32, #tpu.memory_space<vmem>>, vector<1x32xf32>
    tpu.vector_store %arg28[%c2_190, %c96_191], %565 {strides = array<i32>} : memref<8x128xf32, #tpu.memory_space<vmem>>, vector<1x32xf32>,
    %567 = vector.extract_strided_slice %315 {offsets = [12, 0], sizes = [2, 256], strides = [1, 1]} : vector<16x256xf32> to vector<2x256xf32>
    %568 = vector.extract_strided_slice %317 {offsets = [2, 0], sizes = [2, 256], strides = [1, 1]} : vector<16x256xf32> to vector<2x256xf32>
    %569 = arith.addf %567, %568 : vector<2x256xf32>
    %cst_192 = arith.constant dense<0.000000e+00> : vector<2x256xf32>
    %570 = tpu.matmul %558, %318, %cst_192 {dimension_numbers = #tpu.dot_dimension_numbers<[1], [0], [0], [1], [0, 0, 1, 1], [], []>} : vector<2x64xf32>, vector<64x256xf32>, vector<2x256xf32> -> vector<2x256xf32>
    %571 = arith.addf %569, %570 : vector<2x256xf32>
    %572 = vector.extract_strided_slice %571 {offsets = [0, 0], sizes = [2, 64], strides = [1, 1]} : vector<2x256xf32> to vector<2x64xf32>
    %cst_193 = arith.constant 0.000000e+00 : f32
    %573 = vector.broadcast %cst_193 : f32 to vector<2x64xf32>
    %574 = arith.subf %573, %572 : vector<2x64xf32>
    %575 = math.exp %574 : vector<2x64xf32>
    %cst_194 = arith.constant 1.000000e+00 : f32
    %576 = vector.broadcast %cst_194 : f32 to vector<2x64xf32>
    %577 = arith.addf %576, %575 : vector<2x64xf32>
    %578 = tpu.reciprocal %577 {approx = true} : vector<2x64xf32> -> vector<2x64xf32>
    %579 = vector.extract_strided_slice %571 {offsets = [0, 64], sizes = [2, 64], strides = [1, 1]} : vector<2x256xf32> to vector<2x64xf32>
    %cst_195 = arith.constant 0.000000e+00 : f32
    %580 = vector.broadcast %cst_195 : f32 to vector<2x64xf32>
    %581 = arith.subf %580, %579 : vector<2x64xf32>
    %582 = math.exp %581 : vector<2x64xf32>
    %cst_196 = arith.constant 1.000000e+00 : f32
    %583 = vector.broadcast %cst_196 : f32 to vector<2x64xf32>
    %584 = arith.addf %583, %582 : vector<2x64xf32>
    %585 = tpu.reciprocal %584 {approx = true} : vector<2x64xf32> -> vector<2x64xf32>
    %586 = vector.extract_strided_slice %571 {offsets = [0, 128], sizes = [2, 64], strides = [1, 1]} : vector<2x256xf32> to vector<2x64xf32>
    %587 = math.tanh %586 : vector<2x64xf32>
    %588 = vector.extract_strided_slice %571 {offsets = [0, 192], sizes = [2, 64], strides = [1, 1]} : vector<2x256xf32> to vector<2x64xf32>
    %cst_197 = arith.constant 0.000000e+00 : f32
    %589 = vector.broadcast %cst_197 : f32 to vector<2x64xf32>
    %590 = arith.subf %589, %588 : vector<2x64xf32>
    %591 = math.exp %590 : vector<2x64xf32>
    %cst_198 = arith.constant 1.000000e+00 : f32
    %592 = vector.broadcast %cst_198 : f32 to vector<2x64xf32>
    %593 = arith.addf %592, %591 : vector<2x64xf32>
    %594 = tpu.reciprocal %593 {approx = true} : vector<2x64xf32> -> vector<2x64xf32>
    %595 = arith.mulf %585, %556 : vector<2x64xf32>
    %596 = arith.mulf %578, %587 : vector<2x64xf32>
    %597 = arith.addf %595, %596 : vector<2x64xf32>
    %598 = math.tanh %597 : vector<2x64xf32>
    %599 = arith.mulf %594, %598 : vector<2x64xf32>
    %600 = vector.extract_strided_slice %599 {offsets = [0, 0], sizes = [1, 32], strides = [1, 1]} : vector<2x64xf32> to vector<1x32xf32>
    %c6_199 = arith.constant 6 : index
    %c0_200 = arith.constant 0 : index
    %601 = vector.load %arg28[%c6_199, %c0_200] : memref<8x128xf32, #tpu.memory_space<vmem>>, vector<1x32xf32>
    tpu.vector_store %arg28[%c6_199, %c0_200], %600 {strides = array<i32>} : memref<8x128xf32, #tpu.memory_space<vmem>>, vector<1x32xf32>,
    %602 = vector.extract_strided_slice %599 {offsets = [0, 32], sizes = [1, 32], strides = [1, 1]} : vector<2x64xf32> to vector<1x32xf32>
    %c1_201 = arith.constant 1 : index
    %c32_202 = arith.constant 32 : index
    %603 = vector.load %arg28[%c1_201, %c32_202] : memref<8x128xf32, #tpu.memory_space<vmem>>, vector<1x32xf32>
    tpu.vector_store %arg28[%c1_201, %c32_202], %602 {strides = array<i32>} : memref<8x128xf32, #tpu.memory_space<vmem>>, vector<1x32xf32>,
    %604 = vector.extract_strided_slice %599 {offsets = [1, 0], sizes = [1, 32], strides = [1, 1]} : vector<2x64xf32> to vector<1x32xf32>
    %c6_203 = arith.constant 6 : index
    %c64_204 = arith.constant 64 : index
    %605 = vector.load %arg28[%c6_203, %c64_204] : memref<8x128xf32, #tpu.memory_space<vmem>>, vector<1x32xf32>
    tpu.vector_store %arg28[%c6_203, %c64_204], %604 {strides = array<i32>} : memref<8x128xf32, #tpu.memory_space<vmem>>, vector<1x32xf32>,
    %606 = vector.extract_strided_slice %599 {offsets = [1, 32], sizes = [1, 32], strides = [1, 1]} : vector<2x64xf32> to vector<1x32xf32>
    %c1_205 = arith.constant 1 : index
    %c96_206 = arith.constant 96 : index
    %607 = vector.load %arg28[%c1_205, %c96_206] : memref<8x128xf32, #tpu.memory_space<vmem>>, vector<1x32xf32>
    tpu.vector_store %arg28[%c1_205, %c96_206], %606 {strides = array<i32>} : memref<8x128xf32, #tpu.memory_space<vmem>>, vector<1x32xf32>,
    %608 = vector.extract_strided_slice %315 {offsets = [14, 0], sizes = [2, 256], strides = [1, 1]} : vector<16x256xf32> to vector<2x256xf32>
    %609 = vector.extract_strided_slice %317 {offsets = [0, 0], sizes = [2, 256], strides = [1, 1]} : vector<16x256xf32> to vector<2x256xf32>
    %610 = arith.addf %608, %609 : vector<2x256xf32>
    %cst_207 = arith.constant dense<0.000000e+00> : vector<2x256xf32>
    %611 = tpu.matmul %599, %318, %cst_207 {dimension_numbers = #tpu.dot_dimension_numbers<[1], [0], [0], [1], [0, 0, 1, 1], [], []>} : vector<2x64xf32>, vector<64x256xf32>, vector<2x256xf32> -> vector<2x256xf32>
    %612 = arith.addf %610, %611 : vector<2x256xf32>
    %613 = vector.extract_strided_slice %612 {offsets = [0, 0], sizes = [2, 64], strides = [1, 1]} : vector<2x256xf32> to vector<2x64xf32>
    %cst_208 = arith.constant 0.000000e+00 : f32
    %614 = vector.broadcast %cst_208 : f32 to vector<2x64xf32>
    %615 = arith.subf %614, %613 : vector<2x64xf32>
    %616 = math.exp %615 : vector<2x64xf32>
    %cst_209 = arith.constant 1.000000e+00 : f32
    %617 = vector.broadcast %cst_209 : f32 to vector<2x64xf32>
    %618 = arith.addf %617, %616 : vector<2x64xf32>
    %619 = tpu.reciprocal %618 {approx = true} : vector<2x64xf32> -> vector<2x64xf32>
    %620 = vector.extract_strided_slice %612 {offsets = [0, 64], sizes = [2, 64], strides = [1, 1]} : vector<2x256xf32> to vector<2x64xf32>
    %cst_210 = arith.constant 0.000000e+00 : f32
    %621 = vector.broadcast %cst_210 : f32 to vector<2x64xf32>
    %622 = arith.subf %621, %620 : vector<2x64xf32>
    %623 = math.exp %622 : vector<2x64xf32>
    %cst_211 = arith.constant 1.000000e+00 : f32
    %624 = vector.broadcast %cst_211 : f32 to vector<2x64xf32>
    %625 = arith.addf %624, %623 : vector<2x64xf32>
    %626 = tpu.reciprocal %625 {approx = true} : vector<2x64xf32> -> vector<2x64xf32>
    %627 = vector.extract_strided_slice %612 {offsets = [0, 128], sizes = [2, 64], strides = [1, 1]} : vector<2x256xf32> to vector<2x64xf32>
    %628 = math.tanh %627 : vector<2x64xf32>
    %629 = vector.extract_strided_slice %612 {offsets = [0, 192], sizes = [2, 64], strides = [1, 1]} : vector<2x256xf32> to vector<2x64xf32>
    %cst_212 = arith.constant 0.000000e+00 : f32
    %630 = vector.broadcast %cst_212 : f32 to vector<2x64xf32>
    %631 = arith.subf %630, %629 : vector<2x64xf32>
    %632 = math.exp %631 : vector<2x64xf32>
    %cst_213 = arith.constant 1.000000e+00 : f32
    %633 = vector.broadcast %cst_213 : f32 to vector<2x64xf32>
    %634 = arith.addf %633, %632 : vector<2x64xf32>
    %635 = tpu.reciprocal %634 {approx = true} : vector<2x64xf32> -> vector<2x64xf32>
    %636 = arith.mulf %626, %597 : vector<2x64xf32>
    %637 = arith.mulf %619, %628 : vector<2x64xf32>
    %638 = arith.addf %636, %637 : vector<2x64xf32>
    %639 = math.tanh %638 : vector<2x64xf32>
    %640 = arith.mulf %635, %639 : vector<2x64xf32>
    %641 = vector.extract_strided_slice %640 {offsets = [0, 0], sizes = [1, 32], strides = [1, 1]} : vector<2x64xf32> to vector<1x32xf32>
    %c7_214 = arith.constant 7 : index
    %c0_215 = arith.constant 0 : index
    %642 = vector.load %arg28[%c7_214, %c0_215] : memref<8x128xf32, #tpu.memory_space<vmem>>, vector<1x32xf32>
    tpu.vector_store %arg28[%c7_214, %c0_215], %641 {strides = array<i32>} : memref<8x128xf32, #tpu.memory_space<vmem>>, vector<1x32xf32>,
    %643 = vector.extract_strided_slice %640 {offsets = [0, 32], sizes = [1, 32], strides = [1, 1]} : vector<2x64xf32> to vector<1x32xf32>
    %c0_216 = arith.constant 0 : index
    %c32_217 = arith.constant 32 : index
    %644 = vector.load %arg28[%c0_216, %c32_217] : memref<8x128xf32, #tpu.memory_space<vmem>>, vector<1x32xf32>
    tpu.vector_store %arg28[%c0_216, %c32_217], %643 {strides = array<i32>} : memref<8x128xf32, #tpu.memory_space<vmem>>, vector<1x32xf32>,
    %645 = vector.extract_strided_slice %640 {offsets = [1, 0], sizes = [1, 32], strides = [1, 1]} : vector<2x64xf32> to vector<1x32xf32>
    %c7_218 = arith.constant 7 : index
    %c64_219 = arith.constant 64 : index
    %646 = vector.load %arg28[%c7_218, %c64_219] : memref<8x128xf32, #tpu.memory_space<vmem>>, vector<1x32xf32>
    tpu.vector_store %arg28[%c7_218, %c64_219], %645 {strides = array<i32>} : memref<8x128xf32, #tpu.memory_space<vmem>>, vector<1x32xf32>,
    %647 = vector.extract_strided_slice %640 {offsets = [1, 32], sizes = [1, 32], strides = [1, 1]} : vector<2x64xf32> to vector<1x32xf32>
    %c0_220 = arith.constant 0 : index
    %c96_221 = arith.constant 96 : index
    %648 = vector.load %arg28[%c0_220, %c96_221] : memref<8x128xf32, #tpu.memory_space<vmem>>, vector<1x32xf32>
    tpu.vector_store %arg28[%c0_220, %c96_221], %647 {strides = array<i32>} : memref<8x128xf32, #tpu.memory_space<vmem>>, vector<1x32xf32>,
    %c0_222 = arith.constant 0 : index
    %c0_223 = arith.constant 0 : index
    %649 = vector.load %arg28[%c0_222, %c0_223] : memref<8x128xf32, #tpu.memory_space<vmem>>, vector<8x128xf32>
    %c0_224 = arith.constant 0 : index
    %c0_225 = arith.constant 0 : index
    %650 = vector.load %arg14[%c0_224, %c0_225] : memref<2x128xf32, #tpu.memory_space<vmem>>, vector<2x128xf32>
    %c1_i32 = arith.constant 1 : i32
    %651 = tpu.dynamic_rotate %649 by %c1_i32 dim 1 : vector<8x128xf32>, i32 -> vector<8x128xf32>
    %652 = vector.extract_strided_slice %650 {offsets = [0, 0], sizes = [1, 128], strides = [1, 1]} : vector<2x128xf32> to vector<1x128xf32>
    %653 = vector.broadcast %652 : vector<1x128xf32> to vector<8x128xf32>
    %654 = arith.mulf %651, %653 : vector<8x128xf32>
    %c127_i32 = arith.constant 127 : i32
    %655 = tpu.dynamic_rotate %649 by %c127_i32 dim 1 : vector<8x128xf32>, i32 -> vector<8x128xf32>
    %656 = vector.extract_strided_slice %650 {offsets = [1, 0], sizes = [1, 128], strides = [1, 1]} : vector<2x128xf32> to vector<1x128xf32>
    %657 = vector.broadcast %656 : vector<1x128xf32> to vector<8x128xf32>
    %658 = arith.mulf %655, %657 : vector<8x128xf32>
    %c0_226 = arith.constant 0 : index
    %c0_227 = arith.constant 0 : index
    %c0_228 = arith.constant 0 : index
    %659 = vector.load %arg10[%c0_226, %c0_227, %c0_228] : memref<3x4x8xf32, #tpu.memory_space<vmem>>, vector<1x4x8xf32>
    %660 = vector.shape_cast %659 : vector<1x4x8xf32> to vector<4x8xf32>
    %cst_229 = arith.constant dense<0.000000e+00> : vector<4x128xf32>
    %661 = tpu.matmul %660, %654, %cst_229 {dimension_numbers = #tpu.dot_dimension_numbers<[1], [0], [0], [1], [0, 0, 1, 1], [], []>} : vector<4x8xf32>, vector<8x128xf32>, vector<4x128xf32> -> vector<4x128xf32>
    %c1_230 = arith.constant 1 : index
    %c0_231 = arith.constant 0 : index
    %c0_232 = arith.constant 0 : index
    %662 = vector.load %arg10[%c1_230, %c0_231, %c0_232] : memref<3x4x8xf32, #tpu.memory_space<vmem>>, vector<1x4x8xf32>
    %663 = vector.shape_cast %662 : vector<1x4x8xf32> to vector<4x8xf32>
    %cst_233 = arith.constant dense<0.000000e+00> : vector<4x128xf32>
    %664 = tpu.matmul %663, %649, %cst_233 {dimension_numbers = #tpu.dot_dimension_numbers<[1], [0], [0], [1], [0, 0, 1, 1], [], []>} : vector<4x8xf32>, vector<8x128xf32>, vector<4x128xf32> -> vector<4x128xf32>
    %665 = arith.addf %661, %664 : vector<4x128xf32>
    %c2_234 = arith.constant 2 : index
    %c0_235 = arith.constant 0 : index
    %c0_236 = arith.constant 0 : index
    %666 = vector.load %arg10[%c2_234, %c0_235, %c0_236] : memref<3x4x8xf32, #tpu.memory_space<vmem>>, vector<1x4x8xf32>
    %667 = vector.shape_cast %666 : vector<1x4x8xf32> to vector<4x8xf32>
    %cst_237 = arith.constant dense<0.000000e+00> : vector<4x128xf32>
    %668 = tpu.matmul %667, %658, %cst_237 {dimension_numbers = #tpu.dot_dimension_numbers<[1], [0], [0], [1], [0, 0, 1, 1], [], []>} : vector<4x8xf32>, vector<8x128xf32>, vector<4x128xf32> -> vector<4x128xf32>
    %669 = arith.addf %665, %668 : vector<4x128xf32>
    %c0_238 = arith.constant 0 : index
    %c0_239 = arith.constant 0 : index
    %670 = vector.load %arg11[%c0_238, %c0_239] : memref<4x1xf32, #tpu.memory_space<vmem>>, vector<4x1xf32>
    %671 = vector.broadcast %670 : vector<4x1xf32> to vector<4x128xf32>
    %672 = arith.addf %669, %671 : vector<4x128xf32>
    %cst_240 = arith.constant dense<0.000000e+00> : vector<4xf32>
    %673 = vector.multi_reduction <add>, %672, %cst_240 [1] : vector<4x128xf32> to vector<4xf32>
    %674 = vector.shape_cast %673 : vector<4xf32> to vector<4x1xf32>
    %cst_241 = arith.constant 7.812500e-03 : f32
    %675 = vector.broadcast %cst_241 : f32 to vector<4x1xf32>
    %676 = arith.mulf %674, %675 : vector<4x1xf32>
    %677 = vector.broadcast %676 : vector<4x1xf32> to vector<4x128xf32>
    %678 = arith.subf %672, %677 : vector<4x128xf32>
    %679 = arith.mulf %678, %678 : vector<4x128xf32>
    %cst_242 = arith.constant dense<0.000000e+00> : vector<4xf32>
    %680 = vector.multi_reduction <add>, %679, %cst_242 [1] : vector<4x128xf32> to vector<4xf32>
    %681 = vector.shape_cast %680 : vector<4xf32> to vector<4x1xf32>
    %cst_243 = arith.constant 7.812500e-03 : f32
    %682 = vector.broadcast %cst_243 : f32 to vector<4x1xf32>
    %683 = arith.mulf %681, %682 : vector<4x1xf32>
    %cst_244 = arith.constant 9.99999974E-6 : f32
    %684 = vector.broadcast %cst_244 : f32 to vector<4x1xf32>
    %685 = arith.addf %683, %684 : vector<4x1xf32>
    %686 = math.rsqrt %685 : vector<4x1xf32>
    %687 = vector.broadcast %686 : vector<4x1xf32> to vector<4x128xf32>
    %688 = arith.mulf %678, %687 : vector<4x128xf32>
    %c0_245 = arith.constant 0 : index
    %c0_246 = arith.constant 0 : index
    %689 = vector.load %arg12[%c0_245, %c0_246] : memref<4x1xf32, #tpu.memory_space<vmem>>, vector<4x1xf32>
    %690 = vector.broadcast %689 : vector<4x1xf32> to vector<4x128xf32>
    %691 = arith.mulf %688, %690 : vector<4x128xf32>
    %c0_247 = arith.constant 0 : index
    %c0_248 = arith.constant 0 : index
    %692 = vector.load %arg13[%c0_247, %c0_248] : memref<4x1xf32, #tpu.memory_space<vmem>>, vector<4x1xf32>
    %693 = vector.broadcast %692 : vector<4x1xf32> to vector<4x128xf32>
    %694 = arith.addf %691, %693 : vector<4x128xf32>
    %cst_249 = arith.constant 0.000000e+00 : f32
    %695 = vector.broadcast %cst_249 : f32 to vector<4x128xf32>
    %696 = arith.maximumf %694, %695 : vector<4x128xf32>
    %c0_250 = arith.constant 0 : index
    %c0_251 = arith.constant 0 : index
    %697 = vector.load %arg15[%c0_250, %c0_251] : memref<64x32xf32, #tpu.memory_space<vmem>>, vector<64x32xf32>
    %c0_252 = arith.constant 0 : index
    %c0_253 = arith.constant 0 : index
    %698 = vector.load %arg16[%c0_252, %c0_253] : memref<64x32xf32, #tpu.memory_space<vmem>>, vector<64x32xf32>
    %699 = vector.extract_strided_slice %696 {offsets = [0, 0], sizes = [4, 64], strides = [1, 1]} : vector<4x128xf32> to vector<4x64xf32>
    %cst_254 = arith.constant dense<0.000000e+00> : vector<4x32xf32>
    %700 = tpu.matmul %699, %697, %cst_254 {dimension_numbers = #tpu.dot_dimension_numbers<[1], [0], [0], [1], [0, 0, 1, 1], [], []>} : vector<4x64xf32>, vector<64x32xf32>, vector<4x32xf32> -> vector<4x32xf32>
    %cst_255 = arith.constant dense<0.000000e+00> : vector<4x32xf32>
    %701 = tpu.matmul %699, %698, %cst_255 {dimension_numbers = #tpu.dot_dimension_numbers<[1], [0], [0], [1], [0, 0, 1, 1], [], []>} : vector<4x64xf32>, vector<64x32xf32>, vector<4x32xf32> -> vector<4x32xf32>
    %702 = arith.maximumf %700, %701 : vector<4x32xf32>
    %703 = vector.extract_strided_slice %696 {offsets = [0, 64], sizes = [4, 64], strides = [1, 1]} : vector<4x128xf32> to vector<4x64xf32>
    %cst_256 = arith.constant dense<0.000000e+00> : vector<4x32xf32>
    %704 = tpu.matmul %703, %697, %cst_256 {dimension_numbers = #tpu.dot_dimension_numbers<[1], [0], [0], [1], [0, 0, 1, 1], [], []>} : vector<4x64xf32>, vector<64x32xf32>, vector<4x32xf32> -> vector<4x32xf32>
    %cst_257 = arith.constant dense<0.000000e+00> : vector<4x32xf32>
    %705 = tpu.matmul %703, %698, %cst_257 {dimension_numbers = #tpu.dot_dimension_numbers<[1], [0], [0], [1], [0, 0, 1, 1], [], []>} : vector<4x64xf32>, vector<64x32xf32>, vector<4x32xf32> -> vector<4x32xf32>
    %706 = arith.maximumf %704, %705 : vector<4x32xf32>
    %707 = tpu.concatenate %702, %706 in 1 : vector<4x32xf32>, vector<4x32xf32> -> vector<4x64xf32>
    %c0_258 = arith.constant 0 : index
    %c0_259 = arith.constant 0 : index
    %708 = vector.load %arg21[%c0_258, %c0_259] : memref<2x64xf32, #tpu.memory_space<vmem>>, vector<2x64xf32>
    %c1_i32_260 = arith.constant 1 : i32
    %709 = tpu.dynamic_rotate %707 by %c1_i32_260 dim 1 : vector<4x64xf32>, i32 -> vector<4x64xf32>
    %710 = vector.extract_strided_slice %708 {offsets = [0, 0], sizes = [1, 64], strides = [1, 1]} : vector<2x64xf32> to vector<1x64xf32>
    %711 = vector.broadcast %710 : vector<1x64xf32> to vector<4x64xf32>
    %712 = arith.mulf %709, %711 : vector<4x64xf32>
    %c63_i32 = arith.constant 63 : i32
    %713 = tpu.dynamic_rotate %707 by %c63_i32 dim 1 : vector<4x64xf32>, i32 -> vector<4x64xf32>
    %714 = vector.extract_strided_slice %708 {offsets = [1, 0], sizes = [1, 64], strides = [1, 1]} : vector<2x64xf32> to vector<1x64xf32>
    %715 = vector.broadcast %714 : vector<1x64xf32> to vector<4x64xf32>
    %716 = arith.mulf %713, %715 : vector<4x64xf32>
    %c0_261 = arith.constant 0 : index
    %c0_262 = arith.constant 0 : index
    %c0_263 = arith.constant 0 : index
    %717 = vector.load %arg17[%c0_261, %c0_262, %c0_263] : memref<3x8x4xf32, #tpu.memory_space<vmem>>, vector<1x8x4xf32>
    %718 = vector.shape_cast %717 : vector<1x8x4xf32> to vector<8x4xf32>
    %cst_264 = arith.constant dense<0.000000e+00> : vector<8x64xf32>
    %719 = tpu.matmul %718, %712, %cst_264 {dimension_numbers = #tpu.dot_dimension_numbers<[1], [0], [0], [1], [0, 0, 1, 1], [], []>} : vector<8x4xf32>, vector<4x64xf32>, vector<8x64xf32> -> vector<8x64xf32>
    %c1_265 = arith.constant 1 : index
    %c0_266 = arith.constant 0 : index
    %c0_267 = arith.constant 0 : index
    %720 = vector.load %arg17[%c1_265, %c0_266, %c0_267] : memref<3x8x4xf32, #tpu.memory_space<vmem>>, vector<1x8x4xf32>
    %721 = vector.shape_cast %720 : vector<1x8x4xf32> to vector<8x4xf32>
    %cst_268 = arith.constant dense<0.000000e+00> : vector<8x64xf32>
    %722 = tpu.matmul %721, %707, %cst_268 {dimension_numbers = #tpu.dot_dimension_numbers<[1], [0], [0], [1], [0, 0, 1, 1], [], []>} : vector<8x4xf32>, vector<4x64xf32>, vector<8x64xf32> -> vector<8x64xf32>
    %723 = arith.addf %719, %722 : vector<8x64xf32>
    %c2_269 = arith.constant 2 : index
    %c0_270 = arith.constant 0 : index
    %c0_271 = arith.constant 0 : index
    %724 = vector.load %arg17[%c2_269, %c0_270, %c0_271] : memref<3x8x4xf32, #tpu.memory_space<vmem>>, vector<1x8x4xf32>
    %725 = vector.shape_cast %724 : vector<1x8x4xf32> to vector<8x4xf32>
    %cst_272 = arith.constant dense<0.000000e+00> : vector<8x64xf32>
    %726 = tpu.matmul %725, %716, %cst_272 {dimension_numbers = #tpu.dot_dimension_numbers<[1], [0], [0], [1], [0, 0, 1, 1], [], []>} : vector<8x4xf32>, vector<4x64xf32>, vector<8x64xf32> -> vector<8x64xf32>
    %727 = arith.addf %723, %726 : vector<8x64xf32>
    %c0_273 = arith.constant 0 : index
    %c0_274 = arith.constant 0 : index
    %728 = vector.load %arg18[%c0_273, %c0_274] : memref<8x1xf32, #tpu.memory_space<vmem>>, vector<8x1xf32>
    %729 = vector.broadcast %728 : vector<8x1xf32> to vector<8x64xf32>
    %730 = arith.addf %727, %729 : vector<8x64xf32>
    %cst_275 = arith.constant dense<0.000000e+00> : vector<8xf32>
    %731 = vector.multi_reduction <add>, %730, %cst_275 [1] : vector<8x64xf32> to vector<8xf32>
    %732 = vector.shape_cast %731 : vector<8xf32> to vector<8x1xf32>
    %cst_276 = arith.constant 1.562500e-02 : f32
    %733 = vector.broadcast %cst_276 : f32 to vector<8x1xf32>
    %734 = arith.mulf %732, %733 : vector<8x1xf32>
    %735 = vector.broadcast %734 : vector<8x1xf32> to vector<8x64xf32>
    %736 = arith.subf %730, %735 : vector<8x64xf32>
    %737 = arith.mulf %736, %736 : vector<8x64xf32>
    %cst_277 = arith.constant dense<0.000000e+00> : vector<8xf32>
    %738 = vector.multi_reduction <add>, %737, %cst_277 [1] : vector<8x64xf32> to vector<8xf32>
    %739 = vector.shape_cast %738 : vector<8xf32> to vector<8x1xf32>
    %cst_278 = arith.constant 1.562500e-02 : f32
    %740 = vector.broadcast %cst_278 : f32 to vector<8x1xf32>
    %741 = arith.mulf %739, %740 : vector<8x1xf32>
    %cst_279 = arith.constant 9.99999974E-6 : f32
    %742 = vector.broadcast %cst_279 : f32 to vector<8x1xf32>
    %743 = arith.addf %741, %742 : vector<8x1xf32>
    %744 = math.rsqrt %743 : vector<8x1xf32>
    %745 = vector.broadcast %744 : vector<8x1xf32> to vector<8x64xf32>
    %746 = arith.mulf %736, %745 : vector<8x64xf32>
    %c0_280 = arith.constant 0 : index
    %c0_281 = arith.constant 0 : index
    %747 = vector.load %arg19[%c0_280, %c0_281] : memref<8x1xf32, #tpu.memory_space<vmem>>, vector<8x1xf32>
    %748 = vector.broadcast %747 : vector<8x1xf32> to vector<8x64xf32>
    %749 = arith.mulf %746, %748 : vector<8x64xf32>
    %c0_282 = arith.constant 0 : index
    %c0_283 = arith.constant 0 : index
    %750 = vector.load %arg20[%c0_282, %c0_283] : memref<8x1xf32, #tpu.memory_space<vmem>>, vector<8x1xf32>
    %751 = vector.broadcast %750 : vector<8x1xf32> to vector<8x64xf32>
    %752 = arith.addf %749, %751 : vector<8x64xf32>
    %cst_284 = arith.constant 0.000000e+00 : f32
    %753 = vector.broadcast %cst_284 : f32 to vector<8x64xf32>
    %754 = arith.maximumf %752, %753 : vector<8x64xf32>
    %755 = vector.extract_strided_slice %754 {offsets = [0, 0], sizes = [1, 32], strides = [1, 1]} : vector<8x64xf32> to vector<1x32xf32>
    %756 = vector.extract_strided_slice %754 {offsets = [1, 0], sizes = [1, 32], strides = [1, 1]} : vector<8x64xf32> to vector<1x32xf32>
    %757 = vector.extract_strided_slice %754 {offsets = [2, 0], sizes = [1, 32], strides = [1, 1]} : vector<8x64xf32> to vector<1x32xf32>
    %758 = vector.extract_strided_slice %754 {offsets = [3, 0], sizes = [1, 32], strides = [1, 1]} : vector<8x64xf32> to vector<1x32xf32>
    %759 = vector.extract_strided_slice %754 {offsets = [4, 0], sizes = [1, 32], strides = [1, 1]} : vector<8x64xf32> to vector<1x32xf32>
    %760 = vector.extract_strided_slice %754 {offsets = [5, 0], sizes = [1, 32], strides = [1, 1]} : vector<8x64xf32> to vector<1x32xf32>
    %761 = vector.extract_strided_slice %754 {offsets = [6, 0], sizes = [1, 32], strides = [1, 1]} : vector<8x64xf32> to vector<1x32xf32>
    %762 = vector.extract_strided_slice %754 {offsets = [7, 0], sizes = [1, 32], strides = [1, 1]} : vector<8x64xf32> to vector<1x32xf32>
    %763 = tpu.concatenate %755, %756, %757, %758, %759, %760, %761, %762 in 1 : vector<1x32xf32>, vector<1x32xf32>, vector<1x32xf32>, vector<1x32xf32>, vector<1x32xf32>, vector<1x32xf32>, vector<1x32xf32>, vector<1x32xf32> -> vector<1x256xf32>
    %764 = vector.extract_strided_slice %754 {offsets = [0, 32], sizes = [1, 32], strides = [1, 1]} : vector<8x64xf32> to vector<1x32xf32>
    %765 = vector.extract_strided_slice %754 {offsets = [1, 32], sizes = [1, 32], strides = [1, 1]} : vector<8x64xf32> to vector<1x32xf32>
    %766 = vector.extract_strided_slice %754 {offsets = [2, 32], sizes = [1, 32], strides = [1, 1]} : vector<8x64xf32> to vector<1x32xf32>
    %767 = vector.extract_strided_slice %754 {offsets = [3, 32], sizes = [1, 32], strides = [1, 1]} : vector<8x64xf32> to vector<1x32xf32>
    %768 = vector.extract_strided_slice %754 {offsets = [4, 32], sizes = [1, 32], strides = [1, 1]} : vector<8x64xf32> to vector<1x32xf32>
    %769 = vector.extract_strided_slice %754 {offsets = [5, 32], sizes = [1, 32], strides = [1, 1]} : vector<8x64xf32> to vector<1x32xf32>
    %770 = vector.extract_strided_slice %754 {offsets = [6, 32], sizes = [1, 32], strides = [1, 1]} : vector<8x64xf32> to vector<1x32xf32>
    %771 = vector.extract_strided_slice %754 {offsets = [7, 32], sizes = [1, 32], strides = [1, 1]} : vector<8x64xf32> to vector<1x32xf32>
    %772 = tpu.concatenate %764, %765, %766, %767, %768, %769, %770, %771 in 1 : vector<1x32xf32>, vector<1x32xf32>, vector<1x32xf32>, vector<1x32xf32>, vector<1x32xf32>, vector<1x32xf32>, vector<1x32xf32>, vector<1x32xf32> -> vector<1x256xf32>
    %773 = tpu.concatenate %763, %772 in 0 : vector<1x256xf32>, vector<1x256xf32> -> vector<2x256xf32>
    %c0_285 = arith.constant 0 : index
    %c0_286 = arith.constant 0 : index
    %774 = vector.load %arg22[%c0_285, %c0_286] : memref<256x16xf32, #tpu.memory_space<vmem>>, vector<256x16xf32>
    %cst_287 = arith.constant dense<0.000000e+00> : vector<2x16xf32>
    %775 = tpu.matmul %773, %774, %cst_287 {dimension_numbers = #tpu.dot_dimension_numbers<[1], [0], [0], [1], [0, 0, 1, 1], [], []>} : vector<2x256xf32>, vector<256x16xf32>, vector<2x16xf32> -> vector<2x16xf32>
    %c0_288 = arith.constant 0 : index
    %c0_289 = arith.constant 0 : index
    %776 = vector.load %arg23[%c0_288, %c0_289] : memref<1x16xf32, #tpu.memory_space<vmem>>, vector<1x16xf32>
    %777 = vector.broadcast %776 : vector<1x16xf32> to vector<2x16xf32>
    %778 = arith.addf %775, %777 : vector<2x16xf32>
    %cst_290 = arith.constant 0.000000e+00 : f32
    %779 = vector.broadcast %cst_290 : f32 to vector<2x16xf32>
    %780 = arith.maximumf %778, %779 : vector<2x16xf32>
    %c0_291 = arith.constant 0 : index
    %c0_292 = arith.constant 0 : index
    %781 = vector.load %arg24[%c0_291, %c0_292] : memref<16x16xf32, #tpu.memory_space<vmem>>, vector<16x16xf32>
    %cst_293 = arith.constant dense<0.000000e+00> : vector<2x16xf32>
    %782 = tpu.matmul %780, %781, %cst_293 {dimension_numbers = #tpu.dot_dimension_numbers<[1], [0], [0], [1], [0, 0, 1, 1], [], []>} : vector<2x16xf32>, vector<16x16xf32>, vector<2x16xf32> -> vector<2x16xf32>
    %c0_294 = arith.constant 0 : index
    %c0_295 = arith.constant 0 : index
    %783 = vector.load %arg25[%c0_294, %c0_295] : memref<1x16xf32, #tpu.memory_space<vmem>>, vector<1x16xf32>
    %784 = vector.broadcast %783 : vector<1x16xf32> to vector<2x16xf32>
    %785 = arith.addf %782, %784 : vector<2x16xf32>
    %c0_296 = arith.constant 0 : index
    %c0_297 = arith.constant 0 : index
    %786 = vector.load %arg26[%c0_296, %c0_297] : memref<2x16xf32, #tpu.memory_space<vmem>>, vector<2x16xf32>
    tpu.vector_store %arg26[%c0_296, %c0_297], %785 {strides = array<i32>} : memref<2x16xf32, #tpu.memory_space<vmem>>, vector<2x16xf32>,
    return
  }
}

</mosaic_0001>

<bundles_post_ra>
// kernel: tpu_custom_call.1
= control target key start
LH: loop header
LB: loop body
LE: loop exit
PB: predicated region body
PF: predicated region fallthrough
CT: control target
= control target key end

     0   :  { %s5856_s0 = inlined_call_operand.hbm [shape: f32[16,16], index: 0, kind: input, shape index: {}]   ;;  %s5857_s1 = inlined_call_operand.vmem [shape: f32[16,1], index: 1, kind: input, shape index: {}]   ;;  %s5858_s2 = inlined_call_operand.hbm [shape: f32[16,256], index: 2, kind: input, shape index: {}]   ;;  %s5859_s3 = inlined_call_operand.hbm [shape: f32[16,256], index: 3, kind: input, shape index: {}]   ;;  %s5860_s4 = inlined_call_operand.vmem [shape: f32[64,256], index: 4, kind: input, shape index: {}]   ;;  %s5861_s5 = inlined_call_operand.hbm [shape: f32[1,256], index: 5, kind: input, shape index: {}]   ;;  %s5862_s6 = inlined_call_operand.vmem [shape: f32[64,256], index: 6, kind: input, shape index: {}]   ;;  %s5863_s7 = inlined_call_operand.vmem [shape: f32[64,256], index: 7, kind: input, shape index: {}]   ;;  %s5864_s8 = inlined_call_operand.vmem [shape: f32[64,256], index: 8, kind: input, shape index: {}]   ;;  %s5865_s9 = inlined_call_operand.hbm [shape: f32[1,256], index: 9, kind: input, shape index: {}]   ;;  %s5866_s10 = inlined_call_operand.hbm [shape: f32[3,4,8], index: 10, kind: input, shape index: {}]   ;;  %s5867_s11 = inlined_call_operand.vmem [shape: f32[4,1], index: 11, kind: input, shape index: {}]   ;;  %s5868_s12 = inlined_call_operand.vmem [shape: f32[4,1], index: 12, kind: input, shape index: {}]   ;;  %s5869_s13 = inlined_call_operand.vmem [shape: f32[4,1], index: 13, kind: input, shape index: {}]   ;;  %s5870_s14 = inlined_call_operand.hbm [shape: f32[2,128], index: 14, kind: input, shape index: {}]   ;;  %s5871_s15 = inlined_call_operand.vmem [shape: f32[64,32], index: 15, kind: input, shape index: {}]   ;;  %s5872_s16 = inlined_call_operand.vmem [shape: f32[64,32], index: 16, kind: input, shape index: {}]   ;;  %s5873_s17 = inlined_call_operand.vmem [shape: f32[3,8,4], index: 17, kind: input, shape index: {}]   ;;  %s5874_s18 = inlined_call_operand.vmem [shape: f32[8,1], index: 18, kind: input, shape index: {}]   ;;  %s5875_s19 = inlined_call_operand.vmem [shape: f32[8,1], index: 19, kind: input, shape index: {}]   ;;  %s5876_s20 = inlined_call_operand.vmem [shape: f32[8,1], index: 20, kind: input, shape index: {}]   ;;  %s5877_s21 = inlined_call_operand.vmem [shape: f32[2,64], index: 21, kind: input, shape index: {}]   ;;  %s5878_s22 = inlined_call_operand.vmem [shape: f32[256,16], index: 22, kind: input, shape index: {}]   ;;  %s5879_s23 = inlined_call_operand.vmem [shape: f32[1,16], index: 23, kind: input, shape index: {}]   ;;  %s5880_s24 = inlined_call_operand.vmem [shape: f32[16,16], index: 24, kind: input, shape index: {}]   ;;  %s5881_s25 = inlined_call_operand.vmem [shape: f32[1,16], index: 25, kind: input, shape index: {}]   ;;  %s5882_s26 = inlined_call_operand.hbm [shape: f32[2,16], index: 26, kind: output, shape index: {}]  }
   0x1   :  { %5901 = sst [smem:[#allocation22_spill]] %s5856_s0 }
   0x2   :  { %5902 = sst [smem:[#allocation23_spill]] %s5857_s1 }
   0x3   :  { %5903 = sst [smem:[#allocation24_spill]] %s5858_s2 }
   0x4   :  { %5904 = sst [smem:[#allocation25_spill]] %s5859_s3 }
   0x5   :  { %5905 = sst [smem:[#allocation26_spill]] %s5860_s4 }
   0x6   :  { %5906 = sst [smem:[#allocation27_spill]] %s5861_s5 }
   0x7   :  { %5907 = sst [smem:[#allocation28_spill]] %s5862_s6 }
   0x8   :  { %5908 = sst [smem:[#allocation29_spill]] %s5863_s7 }
   0x9   :  { %5909 = sst [smem:[#allocation30_spill]] %s5864_s8 }
   0xa   :  { %5910 = sst [smem:[#allocation31_spill]] %s5865_s9 }
   0xb   :  { %5911 = sst [smem:[#allocation32_spill]] %s5866_s10 }
   0xc   :  { %5912 = sst [smem:[#allocation33_spill]] %s5879_s23 }
   0xd   :  { %5913 = sst [smem:[#allocation34_spill]] %s5881_s25 }
   0xe   :  { %5914 = sst [smem:[#allocation35_spill]] %s5882_s26 }
   0xf   :  { %31 = vsyncpa [#allocation5], 0 }
  0x10   :  { %32 = vsyncpa [#allocation8], 0 }
  0x11   :  { %33 = vsyncpa [#allocation11], 0 }
  0x12   :  { %34 = vsyncpa [#allocation14], 0 }
  0x13   :  { %35 = vsyncpa [#allocation6], 0  ;;  %s4690_s27 = smov [#allocation7]   ;;  %s5915_s8 = sld [smem:[#allocation24_spill]] }
  0x14   :  { %s55_s3 = sshll.u32 %s4690_s27, 4  ;;  %s56_s3 = int_to_ptr.vmem [resolvable:$true] %s55_s3 }
  0x19   :  { %s4504_s4 = scalar_lea.hbm %s5915_s8, 512 }
  0x1a   :  { %p4505_p0 = scmp.ne.s32.totalorder %s5915_s8, %s4504_s4  ;;  %p4508_p1 = scmp.lt.u32.totalorder %s4504_s4, %s5915_s8 }
  0x1c   :  { %p4510_p2 = pnand %p4508_p1, %p4505_p0 }
  0x1e   :  { %4513 = shalt.err (!%p4510_p2)
}
  0x1f   :  { %s4514_s2 = scalar_lea.vmem %s56_s3, 512  ;;  %p4519_p4 = scmp.lt.s32.totalorder %s56_s3, %s56_s3 }
  0x20   :  { %p4515_p3 = scmp.ne.s32.totalorder %s56_s3, %s4514_s2  ;;  %p4520_p5 = scmp.lt.s32.totalorder %s4514_s2, %s4514_s2 }
  0x22   :  { %p4521_p6 = por %p4520_p5, %p4519_p4 }
  0x24   :  { %p4522_p7 = pnand %p4521_p6, %p4515_p3 }
  0x26   :  { %4525 = shalt.err (!%p4522_p7)
}
  0x27   :  { %s5895_s5 = smov 256   ;;  %s5898_s10 = smov 16  }
  0x28   :  { %61 = dma.hbm_to_vmem [thread:$0]  %s5915_s8, 512, %s56_s3, [#allocation8], %s5895_s5, %s5895_s5, %s5898_s10  }
  0x29   :  { %s4693_s27 = smov [#allocation10]   ;;  %s4694_s28 = smov [#allocation13]  }
  0x2a   :  { %s82_s7 = sshll.u32 %s4693_s27, 4  ;;  %s107_s4 = sshll.u32 %s4694_s28, 4  ;;  %s83_s7 = int_to_ptr.vmem [resolvable:$true] %s82_s7  ;;  %s108_s4 = int_to_ptr.vmem [resolvable:$true] %s107_s4 }
  0x2b   :  { %s5916_s9 = sld [smem:[#allocation27_spill]] }
  0x31   :  { %s4526_s30 = scalar_lea.hbm %s5916_s9, 32 }
  0x32   :  { %p4527_p8 = scmp.ne.s32.totalorder %s5916_s9, %s4526_s30  ;;  %p4530_p9 = scmp.lt.u32.totalorder %s4526_s30, %s5916_s9 }
  0x34   :  { %p4532_p10 = pnand %p4530_p9, %p4527_p8 }
  0x36   :  { %4535 = shalt.err (!%p4532_p10)
}
  0x37   :  { %s4536_s3 = scalar_lea.vmem %s83_s7, 32  ;;  %p4541_p12 = scmp.lt.s32.totalorder %s83_s7, %s83_s7 }
  0x38   :  { %p4537_p11 = scmp.ne.s32.totalorder %s83_s7, %s4536_s3  ;;  %p4542_p13 = scmp.lt.s32.totalorder %s4536_s3, %s4536_s3 }
  0x3a   :  { %p4543_p0 = por %p4542_p13, %p4541_p12 }
  0x3c   :  { %p4544_p1 = pnand %p4543_p0, %p4537_p11 }
  0x3e   :  { %4547 = shalt.err (!%p4544_p1)
}
  0x3f   :  { %85 = dma.hbm_to_vmem [thread:$0]  %s5916_s9, 32, %s83_s7, [#allocation11]  }
  0x40   :  { %s5917_s27 = sld [smem:[#allocation32_spill]] }
  0x46   :  { %s4548_s28 = scalar_lea.hbm %s5917_s27, 192 }
  0x47   :  { %p4549_p2 = scmp.ne.s32.totalorder %s5917_s27, %s4548_s28  ;;  %p4552_p3 = scmp.lt.u32.totalorder %s4548_s28, %s5917_s27 }
  0x49   :  { %p4554_p4 = pnand %p4552_p3, %p4549_p2 }
  0x4b   :  { %4557 = shalt.err (!%p4554_p4)
}
  0x4c   :  { %s4558_s30 = scalar_lea.vmem %s108_s4, 192  ;;  %p4563_p6 = scmp.lt.s32.totalorder %s108_s4, %s108_s4 }
  0x4d   :  { %p4559_p5 = scmp.ne.s32.totalorder %s108_s4, %s4558_s30  ;;  %p4564_p7 = scmp.lt.s32.totalorder %s4558_s30, %s4558_s30 }
  0x4f   :  { %p4565_p8 = por %p4564_p7, %p4563_p6 }
  0x51   :  { %p4566_p9 = pnand %p4565_p8, %p4559_p5 }
  0x53   :  { %4569 = shalt.err (!%p4566_p9)
}
  0x54   :  { %s5896_s7 = smov 64   ;;  %s4696_s9 = smov 4  }
  0x55   :  { %113 = dma.hbm_to_vmem [thread:$0]  %s5917_s27, 192, %s108_s4, [#allocation14], %s5896_s7, %s5896_s7, %s4696_s9  }
  0x56   :  { %s4697_s8 = smov [#allocation4]   ;;  %s5918_s28 = sld [smem:[#allocation22_spill]] }
  0x57   :  { %s41_s6 = sshll.u32 %s4697_s8, 4  ;;  %s42_s6 = int_to_ptr.vmem [resolvable:$true] %s41_s6 }
  0x5c   :  { %s4570_s23 = scalar_lea.hbm %s5918_s28, 256 }
  0x5d   :  { %p4571_p10 = scmp.ne.s32.totalorder %s5918_s28, %s4570_s23  ;;  %p4574_p11 = scmp.lt.u32.totalorder %s4570_s23, %s5918_s28 }
  0x5f   :  { %p4576_p12 = pnand %p4574_p11, %p4571_p10 }
  0x61   :  { %4579 = shalt.err (!%p4576_p12)
}
  0x62   :  { %s4580_s5 = scalar_lea.vmem %s42_s6, 256  ;;  %p4585_p0 = scmp.lt.s32.totalorder %s42_s6, %s42_s6 }
  0x63   :  { %p4581_p13 = scmp.ne.s32.totalorder %s42_s6, %s4580_s5  ;;  %p4586_p1 = scmp.lt.s32.totalorder %s4580_s5, %s4580_s5 }
  0x65   :  { %p4587_p2 = por %p4586_p1, %p4585_p0 }
  0x67   :  { %p4588_p3 = pnand %p4587_p2, %p4581_p13 }
  0x69   :  { %4591 = shalt.err (!%p4588_p3)
}
  0x6a   :  { %s4698_s4 = smov 128   ;;  %s4699_s27 = smov 8  }
  0x6b   :  { %47 = dma.hbm_to_vmem [thread:$0]  %s5918_s28, 256, %s42_s6, [#allocation5], %s4698_s4, %s4698_s4, %s4699_s27  }
  0x6c   :  { %s4700_s3 = smov [#allocation9]   ;;  %s4701_s26 = smov [#allocation12]  }
  0x6d   :  { %s67_s8 = sshll.u32 %s4700_s3, 4  ;;  %s98_s1 = sshll.u32 %s4701_s26, 4  ;;  %s68_s8 = int_to_ptr.vmem [resolvable:$true] %s67_s8  ;;  %s99_s1 = int_to_ptr.vmem [resolvable:$true] %s98_s1 }
  0x6e   :  { %s5919_s29 = sld [smem:[#allocation25_spill]] }
  0x74   :  { %s4592_s0 = scalar_lea.hbm %s5919_s29, 512 }
  0x75   :  { %p4593_p4 = scmp.ne.s32.totalorder %s5919_s29, %s4592_s0  ;;  %p4596_p5 = scmp.lt.u32.totalorder %s4592_s0, %s5919_s29 }
  0x77   :  { %p4598_p6 = pnand %p4596_p5, %p4593_p4 }
  0x79   :  { %4601 = shalt.err (!%p4598_p6)
}
  0x7a   :  { %s4602_s6 = scalar_lea.vmem %s68_s8, 512  ;;  %p4607_p8 = scmp.lt.s32.totalorder %s68_s8, %s68_s8 }
  0x7b   :  { %p4603_p7 = scmp.ne.s32.totalorder %s68_s8, %s4602_s6  ;;  %p4608_p9 = scmp.lt.s32.totalorder %s4602_s6, %s4602_s6 }
  0x7d   :  { %p4609_p10 = por %p4608_p9, %p4607_p8 }
  0x7f   :  { %p4610_p11 = pnand %p4609_p10, %p4603_p7 }
  0x81   :  { %4613 = shalt.err (!%p4610_p11)
}
  0x82   :  { %s5920_s28 = smov 16   ;;  %s5921_s4 = smov 256  }
  0x83   :  { %73 = dma.hbm_to_vmem [thread:$0]  %s5919_s29, 512, %s68_s8, [#allocation8], %s5921_s4, %s5921_s4, %s5920_s28  }
  0x84   :  { %s5922_s10 = sld [smem:[#allocation31_spill]] }
  0x8a   :  { %s4614_s7 = scalar_lea.hbm %s5922_s10, 32 }
  0x8b   :  { %p4615_p12 = scmp.ne.s32.totalorder %s5922_s10, %s4614_s7  ;;  %p4618_p13 = scmp.lt.u32.totalorder %s4614_s7, %s5922_s10 }
  0x8d   :  { %p4620_p0 = pnand %p4618_p13, %p4615_p12 }
  0x8f   :  { %4623 = shalt.err (!%p4620_p0)
}
  0x90   :  { %s4624_s5 = scalar_lea.vmem %s99_s1, 32  ;;  %p4629_p2 = scmp.lt.s32.totalorder %s99_s1, %s99_s1 }
  0x91   :  { %p4625_p1 = scmp.ne.s32.totalorder %s99_s1, %s4624_s5  ;;  %p4630_p3 = scmp.lt.s32.totalorder %s4624_s5, %s4624_s5 }
  0x93   :  { %p4631_p4 = por %p4630_p3, %p4629_p2 }
  0x95   :  { %p4632_p5 = pnand %p4631_p4, %p4625_p1 }
  0x97   :  { %4635 = shalt.err (!%p4632_p5)
}
  0x98   :  { %101 = dma.hbm_to_vmem [thread:$0]  %s5922_s10, 32, %s99_s1, [#allocation11]  }
  0x99   :  { %s4702_s30 = smov [#allocation15]   ;;  %s4636_s27 = scalar_lea.hbm %s5870_s14, 32 }
  0x9a   :  { %s126_s6 = sshll.u32 %s4702_s30, 4  ;;  %p4637_p6 = scmp.ne.s32.totalorder %s5870_s14, %s4636_s27  ;;  %s127_s6 = int_to_ptr.vmem [resolvable:$true] %s126_s6 }
  0x9b   :  { %p4640_p7 = scmp.lt.u32.totalorder %s4636_s27, %s5870_s14 }
  0x9d   :  { %p4642_p8 = pnand %p4640_p7, %p4637_p6 }
  0x9f   :  { %4645 = shalt.err (!%p4642_p8)
}
  0xa0   :  { %s4646_s26 = scalar_lea.vmem %s127_s6, 32  ;;  %p4651_p10 = scmp.lt.s32.totalorder %s127_s6, %s127_s6 }
  0xa1   :  { %p4647_p9 = scmp.ne.s32.totalorder %s127_s6, %s4646_s26  ;;  %p4652_p11 = scmp.lt.s32.totalorder %s4646_s26, %s4646_s26 }
  0xa3   :  { %p4653_p12 = por %p4652_p11, %p4651_p10 }
  0xa5   :  { %p4654_p13 = pnand %p4653_p12, %p4647_p9 }
  0xa7   :  { %4657 = shalt.err (!%p4654_p13)
}
  0xa8   :  { %129 = dma.hbm_to_vmem [thread:$0]  %s5870_s14, 32, %s127_s6, [#allocation14]  }
  0xa9   :  { %4680 = dma.done.wait [#allocation5], 256  }
  0xaa   :  { %4681 = vsyncadd [#allocation5], 4294967040 }
  0xab   :  { %4682 = dma.done.wait [#allocation8], 1024  }
  0xac   :  { %4683 = vsyncadd [#allocation8], 4294966272 }
  0xad   :  { %4684 = dma.done.wait [#allocation11], 64  }
  0xae   :  { %4685 = vsyncadd [#allocation11], 4294967232 }
  0xaf   :  { %4686 = dma.done.wait [#allocation14], 224  }
  0xb0   :  { %4687 = vsyncadd [#allocation14], 4294967072  ;;  %v4703_v0 = vmov 0   ;;  %s5923_s0 = sld [smem:[#allocation23_spill]]  ;;  %v290_v3 = vld [vmem:[#allocation9 + $0x8] sm:$0xff]  ;;  %v292_v4 = vld [vmem:[#allocation9 + $0x18] sm:$0xff]  ;;  %v195_v46 = vlaneseq }
  0xb1   :  { %4276 = vset.pattern.permute.xlu0 %v4703_v0  ;;  %4277 = vset.pattern.permute.xlu1 %v4703_v0  ;;  %v190_v5 = vld [vmem:[#allocation7 + $0x8] sm:$0xff]  ;;  %v192_v6 = vld [vmem:[#allocation7 + $0x18] sm:$0xff]  ;;  %v3877_v7 = vpack.c.bf16 %v292_v4, %v290_v3  ;;  %v289_v9 = vld [vmem:[#allocation9] sm:$0xff]  ;;  %v4704_v12 = vmov 0.0   ;;  %s5924_s30 = sld [smem:[#allocation26_spill]]  ;;  %vm5899_vm0 = vcmask 130048  }
  0xb2   :  { %v3873_v8 = vpack.c.bf16 %v192_v6, %v190_v5  ;;  %v291_v10 = vld [vmem:[#allocation9 + $0x10] sm:$0xff]  ;;  %v189_v11 = vld [vmem:[#allocation7] sm:$0xff]  ;;  %276 = vmatprep.mubr.f32.mxu0 %v4704_v12  ;;  %357 = vmatprep.mubr.f32.mxu1 %v4704_v12  ;;  %v174_v30 = vld [vmem:[#allocation4 + $0x8] sm:$0xff]  ;;  %v196_v47 = vshrl.u32 %v195_v46, 7  ;;  %vm495_vm1 = vcmask 254976   ;;  %vm497_vm2 = vcmask 517376  }
  0xb3   :  { %v3879_v13 = vpack.c.bf16 %v291_v10, %v289_v9  ;;  %v191_v14 = vld [vmem:[#allocation7 + $0x10] sm:$0xff]  ;;  %3878 = vmatprep.subr.bf16.mxu1 %v3877_v7  ;;  %v193_v50 = vld [vmem:[#allocation10] sm:$0x3]  ;;  %vm5900_vm3 = vcmask 523264   ;;  %vm613_vm4 = vcmask 257026   ;;  %vm615_vm5 = vcmask 519426  }
  0xb4   :  { %3874 = vmatprep.subr.bf16.mxu0 %v3873_v8  ;;  %v3875_v16 = vpack.c.bf16 %v191_v14, %v189_v11  ;;  %v173_v21 = vld [vmem:[#allocation4] sm:$0xff]  ;;  %v5049_v48 = vsub.s32 0, %v196_v47  ;;  %v5051_v49 = vsub.s32 1, %v196_v47  ;;  %vm843_vm6 = vcmask 261126   ;;  %s5926_s5 = sld [smem:[#allocation28_spill]]  ;;  %s5927_s2 = sld [smem:[#allocation29_spill]] }
  0xb5   :  { %3880 = vmatpush1.bf16.msra.mxu1 %v3879_v13  ;;  %vm845_vm7 = vcmask 523526   ;;  %vm728_vm8 = vcmask 259076   ;;  %vm730_vm9 = vcmask 521476   ;;  %vm1631_vm10 = vcmask 253952   ;;  %s4710_s23 = smov 63   ;;  %s4711_s25 = smov 65  }
  0xb6   :  { %v175_v1 = vld [vmem:[%s5923_s0] sm:$0xff]  ;;  %v176_v2 = vld [vmem:[%s5923_s0 + $0x8] sm:$0xff]  ;;  %3876 = vmatpush1.bf16.msra.mxu0 %v3875_v16  ;;  %v198_v51 = vrot.slane %v193_v50, %v5049_v48  ;;  %v202_v54 = vrot.slane %v193_v50, %v5051_v49  ;;  %s5928_s0 = sld [smem:[#allocation30_spill]]  ;;  %vm1633_vm11 = vcmask 516352   ;;  %vm1635_vm12 = vcmask 779777   ;;  %s4712_s1 = smov 96  }
  0xb7   :  { %179 = vperm.xlu0 %4276, %v175_v1   ;;  %v371_v15 = vld [vmem:[%s5924_s30 + $0x8] sm:$0xff]  ;;  %v373_v17 = vld [vmem:[%s5924_s30 + $0x18] sm:$0xff]  ;;  %v370_v19 = vld [vmem:[%s5924_s30] sm:$0xff]  ;;  %vm1637_vm13 = vcmask 1042177   ;;  %vm1753_vm14 = vcmask 256002   ;;  %vm1755_vm15 = vcmask 518402  }
  0xb8   :  { %v4955_v18 = vpack.c.bf16 %v373_v17, %v371_v15  ;;  %v372_v20 = vld [vmem:[%s5924_s30 + $0x10] sm:$0xff]  ;;  %v375_v22 = vld [vmem:[%s5924_s30 + $0x28] sm:$0xff]  ;;  %v377_v23 = vld [vmem:[%s5924_s30 + $0x38] sm:$0xff]  ;;  %s5941_s8 = sld [smem:[#allocation34_spill]] }
  0xb9   :  { %v4971_v25 = vpack.c.bf16 %v372_v20, %v370_v19  ;;  %v4973_v27 = vpack.c.bf16 %v377_v23, %v375_v22  ;;  %v374_v28 = vld [vmem:[%s5924_s30 + $0x20] sm:$0xff]  ;;  %v376_v29 = vld [vmem:[%s5924_s30 + $0x30] sm:$0xff]  ;;  %v379_v31 = vld [vmem:[%s5924_s30 + $0x48] sm:$0xff] }
  0xba   :  { %3882 = vmatprep.subr.bf16.mxu1 %v4955_v18  ;;  %3914 = vmatprep.subr.bf16.mxu0 %v4955_v18  ;;  %v381_v32 = vld [vmem:[%s5924_s30 + $0x58] sm:$0xff]  ;;  %v4991_v34 = vpack.c.bf16 %v376_v29, %v374_v28  ;;  %v378_v37 = vld [vmem:[%s5924_s30 + $0x40] sm:$0xff]  ;;  %v380_v38 = vld [vmem:[%s5924_s30 + $0x50] sm:$0xff] }
  0xbb   :  { %184 = vperm.xlu0 %4276, %v176_v2   ;;  %v4995_v36 = vpack.c.bf16 %v381_v32, %v379_v31  ;;  %v383_v39 = vld [vmem:[%s5924_s30 + $0x68] sm:$0xff]  ;;  %v385_v40 = vld [vmem:[%s5924_s30 + $0x78] sm:$0xff]  ;;  %v5013_v41 = vpack.c.bf16 %v380_v38, %v378_v37  ;;  %v382_v43 = vld [vmem:[%s5924_s30 + $0x60] sm:$0xff] }
  0xbc   :  { %v5017_v42 = vpack.c.bf16 %v385_v40, %v383_v39  ;;  %v384_v44 = vld [vmem:[%s5924_s30 + $0x70] sm:$0xff]  ;;  %s5925_s30 = smov 64  }
  0xbd   :  { %v5030_v45 = vpack.c.bf16 %v384_v44, %v382_v43 }
 0x136   :  { %v180_v24 = vpop.permute.xlu0 %179 }
 0x137   :  { %v187_v26 = vadd.f32 %v180_v24, %v173_v21 }
 0x139   :  { %3634 = vmatmul.mubr.msk.f32.vlgmr.msra.gmra.mrb[0].mxu0 %vm5899_vm0, %v187_v26  ;;  %3636 = vmatmul.mubr.msk.f32.vlgmr.msra.gmra.mrb[0].mxu1 %vm5899_vm0, %v187_v26 }
 0x13a   :  { %3884 = vmatpush1.bf16.msra.mxu1 %v4971_v25  ;;  %v185_v33 = vpop.permute.xlu0 %184  ;;  %282 = vmatprep.mubr.f32.mxu0 %v4704_v12 }
 0x13b   :  { %v188_v35 = vadd.f32 %v185_v33, %v174_v30  ;;  %363 = vmatprep.mubr.f32.mxu1 %v4704_v12  ;;  %3886 = vmatprep.subr.bf16.mxu1 %v4973_v27 }
 0x13c   :  { %3916 = vmatpush1.bf16.msra.mxu0 %v4971_v25 }
 0x13d   :  { %3635 = vmatmul.mubr.msk.f32.gmra.mrb[2].mxu0 %vm5899_vm0, %v188_v35  ;;  %3637 = vmatmul.mubr.msk.f32.gmra.mrb[2].mxu1 %vm5899_vm0, %v188_v35  ;;  %vm1876_vm0 = vcmask 783877  }
 0x13e   :  { %3888 = vmatpush1.bf16.msra.mxu1 %v4991_v34  ;;  %462 = vmatprep.mubr.f32.mxu1 %v4704_v12 }
 0x13f   :  { %3890 = vmatprep.subr.bf16.mxu1 %v4995_v36  ;;  %3918 = vmatprep.subr.bf16.mxu0 %v4973_v27 }
 0x140   :  { %3920 = vmatpush1.bf16.msra.mxu0 %v4991_v34  ;;  %686 = vmatprep.mubr.f32.mxu0 %v4704_v12 }
 0x141   :  { %3922 = vmatprep.subr.bf16.mxu0 %v4995_v36 }
 0x142   :  { %3892 = vmatpush1.bf16.msra.mxu1 %v5013_v41 }
 0x143   :  { %3894 = vmatprep.subr.bf16.mxu1 %v5017_v42 }
 0x144   :  { %3924 = vmatpush1.bf16.msra.mxu0 %v5013_v41 }
 0x145   :  { %3926 = vmatprep.subr.bf16.mxu0 %v5017_v42 }
 0x146   :  { %3896 = vmatpush1.bf16.msra.mxu1 %v5030_v45 }
 0x147   :  { %3898 = vmatprep.subr.bf16.mxu1 %v4955_v18 }
 0x148   :  { %3928 = vmatpush1.bf16.msra.mxu0 %v5030_v45 }
 0x149   :  { %463 = vmatmul.mubr.f32.vlgmr.msra.gmra.mrb[4].mxu1 %v4704_v12  ;;  %3946 = vmatprep.subr.bf16.mxu0 %v4955_v18 }
 0x14a   :  { %3900 = vmatpush1.bf16.msra.mxu1 %v4971_v25  ;;  %571 = vmatprep.mubr.f32.mxu1 %v4704_v12 }
 0x14b   :  { %3902 = vmatprep.subr.bf16.mxu1 %v4973_v27 }
 0x14e   :  { %3904 = vmatpush1.bf16.msra.mxu1 %v4991_v34 }
 0x14f   :  { %3906 = vmatprep.subr.bf16.mxu1 %v4995_v36 }
 0x152   :  { %3908 = vmatpush1.bf16.msra.mxu1 %v5013_v41 }
 0x153   :  { %3910 = vmatprep.subr.bf16.mxu1 %v5017_v42 }
 0x156   :  { %3912 = vmatpush1.bf16.msra.mxu1 %v5030_v45 }
 0x157   :  { %3930 = vmatprep.subr.bf16.mxu1 %v4955_v18 }
 0x20c   :  { %v278_v52 = vpop.f32.mrb[0].mxu0  ;;  %v359_v53 = vpop.f32.mrb[0].mxu1 }
 0x20d   :  { %v280_v55 = vpop.f32.mrb[1].mxu0  ;;  %v361_v56 = vpop.f32.mrb[1].mxu1  ;;  %v279_v57 = vadd.f32 %v278_v52, %v198_v51  ;;  %v849_v58 = vrot.slane %v359_v53, 6  ;;  %v962_v59 = vrot.slane %v359_v53, 2 }
 0x20e   :  { %v281_v60 = vadd.f32 %v280_v55, %v202_v54  ;;  %v850_v63 = vrot.slane %v361_v56, 6  ;;  %v963_v5 = vrot.slane %v361_v56, 2 }
 0x210   :  { %v284_v61 = vpop.f32.mrb[2].mxu0  ;;  %v365_v62 = vpop.f32.mrb[2].mxu1 }
 0x211   :  { %v285_v0 = vadd.f32 %v284_v61, %v198_v51  ;;  %v388_v1 = vrot.slane %v365_v62, 6  ;;  %v499_v2 = vrot.slane %v365_v62, 2  ;;  %v286_v3 = vpop.f32.mrb[3].mxu0  ;;  %v367_v4 = vpop.f32.mrb[3].mxu1 }
 0x212   :  { %v287_v6 = vadd.f32 %v286_v3, %v202_v54  ;;  %v389_v7 = vrot.slane %v367_v4, 6  ;;  %v500_v8 = vrot.slane %v367_v4, 2 }
 0x213   :  { %v5055_v9 = vadd.f32 %v962_v59, %v285_v0  ;;  %v5057_v10 = vadd.f32 %v499_v2, %v279_v57  ;;  %v5059_v11 = vadd.f32 %v388_v1, %v279_v57  ;;  %v5061_v13 = vadd.f32 %v849_v58, %v285_v0 }
 0x214   :  { %v5063_v14 = vadd.f32 %v963_v5, %v287_v6  ;;  %v5065_v15 = vadd.f32 %v500_v8, %v281_v60  ;;  %v5067_v16 = vadd.f32 %v389_v7, %v281_v60  ;;  %v5069_v17 = vadd.f32 %v850_v63, %v287_v6 }
 0x21c   :  { %v464_v19 = vpop.f32.mrb[4].mxu1 }
 0x21d   :  { %v469_v20 = vadd.f32 %v464_v19, %v5059_v11  ;;  %v466_v21 = vpop.f32.mrb[5].mxu1 }
 0x21e   :  { %v470_v24 = vadd.f32 %v466_v21, %v5067_v16 }
 0x21f   :  { %v471_v22 = vsub.f32 0.0, %v469_v20 }
 0x220   :  { %v477_v32 = vsub.f32 0.0, %v470_v24 }
 0x221   :  { %v472_v23 = vmul.f32 1.442695, %v471_v22 }
 0x222   :  { %v478_v33 = vmul.f32 1.442695, %v477_v32 }
 0x223   :  { %4308 = vpow2.f32 %v472_v23 }
 0x224   :  { %4310 = vtanh.f32 %v470_v24 }
 0x22d   :  { %v4309_v26 = vpop.eup %4308 }
 0x22e   :  { %v474_v28 = vadd.f32 1.0, %v4309_v26  ;;  %v4311_v29 = vpop.eup %4310 }
 0x230   :  { %4312 = vrcp.f32 %v474_v28 }
 0x231   :  { %4314 = vpow2.f32 %v478_v33 }
 0x23a   :  { %v4313_v30 = vpop.eup %4312 }
 0x23b   :  { %v483_v31 = vmul.f32 %v4313_v30, %v4311_v29  ;;  %v4315_v35 = vpop.eup %4314  ;;  %v482_v38 = vmul.f32 0.0, %v4313_v30 }
 0x23c   :  { %v480_v37 = vadd.f32 1.0, %v4315_v35 }
 0x23d   :  { %485 = vrot.lane.b32.xlu1 %v483_v31, %s5925_s30 }
 0x23e   :  { %4316 = vrcp.f32 %v480_v37 }
 0x248   :  { %v4317_v43 = vpop.eup %4316 }
 0x2af   :  { %v486_v39 = vpop.permute.xlu1 %485 }
 0x2b0   :  { %v488_v40 = vadd.f32 %v486_v39, %v482_v38 }
 0x2b2   :  { %4318 = vtanh.f32 %v488_v40  ;;  %v598_v61 = vrot.slane %v488_v40, 6 }
 0x2bc   :  { %v4319_v44 = vpop.eup %4318 }
 0x2bd   :  { %v490_v46 = vmul.f32 %v4319_v44, %v4317_v43 }
 0x2bf   :  { %492 = vrot.lane.b32.xlu1 %v490_v46, %s5925_s30 }
 0x331   :  { %v493_v47 = vpop.permute.xlu1 %492 }
 0x332   :  { %496 = vst.msk [vmem:[#allocation2] sm:$0x3] %vm495_vm1, %v493_v47  ;;  %3638 = vmatmul.mubr.msk.f32.vlgmr.msra.gmra.mrb[6].mxu1 %vm5900_vm3, %v493_v47 }
 0x333   :  { %498 = vst.msk [vmem:[#allocation2 + $0xe] sm:$0x3] %vm497_vm2, %v493_v47  ;;  %3932 = vmatpush1.bf16.msra.mxu1 %v4971_v25  ;;  %801 = vmatprep.mubr.f32.mxu1 %v4704_v12 }
 0x334   :  { %3934 = vmatprep.subr.bf16.mxu1 %v4973_v27 }
 0x337   :  { %3936 = vmatpush1.bf16.msra.mxu1 %v4991_v34 }
 0x338   :  { %3938 = vmatprep.subr.bf16.mxu1 %v4995_v36 }
 0x33b   :  { %3940 = vmatpush1.bf16.msra.mxu1 %v5013_v41 }
 0x33c   :  { %3942 = vmatprep.subr.bf16.mxu1 %v5017_v42 }
 0x33f   :  { %3944 = vmatpush1.bf16.msra.mxu1 %v5030_v45 }
 0x340   :  { %3962 = vmatprep.subr.bf16.mxu1 %v4955_v18 }
 0x405   :  { %v573_v50 = vpop.f32.mrb[6].mxu1 }
 0x406   :  { %v580_v51 = vrot.slane %v573_v50, 6  ;;  %v575_v52 = vpop.f32.mrb[7].mxu1 }
 0x407   :  { %v581_v56 = vrot.slane %v575_v52, 6 }
 0x408   :  { %v584_v53 = vadd.f32 %v580_v51, %v5057_v10 }
 0x409   :  { %v585_v57 = vadd.f32 %v581_v56, %v5065_v15 }
 0x40a   :  { %v586_v54 = vsub.f32 0.0, %v584_v53 }
 0x40b   :  { %v592_v1 = vsub.f32 0.0, %v585_v57 }
 0x40c   :  { %v587_v55 = vmul.f32 1.442695, %v586_v54 }
 0x40d   :  { %v593_v2 = vmul.f32 1.442695, %v592_v1 }
 0x40e   :  { %4320 = vpow2.f32 %v587_v55 }
 0x40f   :  { %4322 = vtanh.f32 %v585_v57 }
 0x418   :  { %v4321_v58 = vpop.eup %4320 }
 0x419   :  { %v589_v59 = vadd.f32 1.0, %v4321_v58  ;;  %v4323_v60 = vpop.eup %4322 }
 0x41b   :  { %4324 = vrcp.f32 %v589_v59 }
 0x41c   :  { %4326 = vpow2.f32 %v593_v2 }
 0x425   :  { %v4325_v62 = vpop.eup %4324 }
 0x426   :  { %v601_v63 = vmul.f32 %v4325_v62, %v4323_v60  ;;  %v600_v0 = vmul.f32 %v4325_v62, %v598_v61  ;;  %v4327_v3 = vpop.eup %4326 }
 0x427   :  { %v595_v4 = vadd.f32 1.0, %v4327_v3 }
 0x428   :  { %603 = vrot.lane.b32.xlu0 %v601_v63, %s5925_s30 }
 0x429   :  { %4328 = vrcp.f32 %v595_v4 }
 0x433   :  { %v4329_v7 = vpop.eup %4328 }
 0x49a   :  { %v604_v5 = vpop.permute.xlu0 %603 }
 0x49b   :  { %v606_v6 = vadd.f32 %v604_v5, %v600_v0 }
 0x49d   :  { %4330 = vtanh.f32 %v606_v6  ;;  %v713_v37 = vrot.slane %v606_v6, 6 }
 0x4a7   :  { %v4331_v8 = vpop.eup %4330 }
 0x4a8   :  { %v5090_v19 = vmul.f32 %v4331_v8, %v4329_v7 }
 0x4aa   :  { %v617_v20 = vrot.slane %v5090_v19, 2 }
 0x4ac   :  { %618 = vrot.lane.b32.xlu1 %v617_v20, %s5925_s30 }
 0x51e   :  { %v619_v21 = vpop.permute.xlu1 %618 }
 0x51f   :  { %3639 = vmatmul.mubr.msk.f32.vlgmr.msra.gmra.mrb[4].mxu0 %vm5900_vm3, %v619_v21 }
 0x520   :  { %3948 = vmatpush1.bf16.msra.mxu0 %v4971_v25  ;;  %924 = vmatprep.mubr.f32.mxu0 %v4704_v12 }
 0x521   :  { %3950 = vmatprep.subr.bf16.mxu0 %v4973_v27 }
 0x524   :  { %3952 = vmatpush1.bf16.msra.mxu0 %v4991_v34 }
 0x525   :  { %3954 = vmatprep.subr.bf16.mxu0 %v4995_v36 }
 0x528   :  { %3956 = vmatpush1.bf16.msra.mxu0 %v5013_v41 }
 0x529   :  { %3958 = vmatprep.subr.bf16.mxu0 %v5017_v42 }
 0x52c   :  { %3960 = vmatpush1.bf16.msra.mxu0 %v5030_v45 }
 0x52d   :  { %3978 = vmatprep.subr.bf16.mxu0 %v4955_v18 }
 0x5f2   :  { %v688_v22 = vpop.f32.mrb[4].mxu0 }
 0x5f3   :  { %v695_v23 = vrot.slane %v688_v22, 4  ;;  %v690_v24 = vpop.f32.mrb[5].mxu0 }
 0x5f4   :  { %v696_v30 = vrot.slane %v690_v24, 4 }
 0x5f5   :  { %v699_v26 = vadd.f32 %v695_v23, %v5059_v11 }
 0x5f6   :  { %v700_v31 = vadd.f32 %v696_v30, %v5067_v16 }
 0x5f7   :  { %v701_v28 = vsub.f32 0.0, %v699_v26 }
 0x5f8   :  { %v707_v43 = vsub.f32 0.0, %v700_v31 }
 0x5f9   :  { %v702_v29 = vmul.f32 1.442695, %v701_v28 }
 0x5fa   :  { %v708_v44 = vmul.f32 1.442695, %v707_v43 }
 0x5fb   :  { %4332 = vpow2.f32 %v702_v29 }
 0x5fc   :  { %4334 = vtanh.f32 %v700_v31 }
 0x605   :  { %v4333_v32 = vpop.eup %4332 }
 0x606   :  { %v704_v33 = vadd.f32 1.0, %v4333_v32  ;;  %v4335_v35 = vpop.eup %4334 }
 0x608   :  { %4336 = vrcp.f32 %v704_v33 }
 0x609   :  { %4338 = vpow2.f32 %v708_v44 }
 0x612   :  { %v4337_v38 = vpop.eup %4336 }
 0x613   :  { %v716_v39 = vmul.f32 %v4337_v38, %v4335_v35  ;;  %v715_v40 = vmul.f32 %v4337_v38, %v713_v37  ;;  %v4339_v11 = vpop.eup %4338 }
 0x614   :  { %v710_v46 = vadd.f32 1.0, %v4339_v11 }
 0x615   :  { %718 = vrot.lane.b32.xlu0 %v716_v39, %s5925_s30 }
 0x616   :  { %4340 = vrcp.f32 %v710_v46 }
 0x620   :  { %v4341_v16 = vpop.eup %4340 }
 0x687   :  { %v719_v47 = vpop.permute.xlu0 %718 }
 0x688   :  { %v721_v50 = vadd.f32 %v719_v47, %v715_v40 }
 0x68a   :  { %4342 = vtanh.f32 %v721_v50  ;;  %v828_v2 = vrot.slane %v721_v50, 6 }
 0x694   :  { %v4343_v51 = vpop.eup %4342 }
 0x695   :  { %v5107_v52 = vmul.f32 %v4343_v51, %v4341_v16 }
 0x697   :  { %v732_v53 = vrot.slane %v5107_v52, 4 }
 0x699   :  { %733 = vrot.lane.b32.xlu1 %v732_v53, %s5925_s30 }
 0x70b   :  { %v734_v54 = vpop.permute.xlu1 %733 }
 0x70c   :  { %3640 = vmatmul.mubr.msk.f32.vlgmr.msra.gmra.mrb[8].mxu1 %vm5900_vm3, %v734_v54 }
 0x70d   :  { %3964 = vmatpush1.bf16.msra.mxu1 %v4971_v25  ;;  %1034 = vmatprep.mubr.f32.mxu1 %v4704_v12 }
 0x70e   :  { %3966 = vmatprep.subr.bf16.mxu1 %v4973_v27 }
 0x711   :  { %3968 = vmatpush1.bf16.msra.mxu1 %v4991_v34 }
 0x712   :  { %3970 = vmatprep.subr.bf16.mxu1 %v4995_v36 }
 0x715   :  { %3972 = vmatpush1.bf16.msra.mxu1 %v5013_v41 }
 0x716   :  { %3974 = vmatprep.subr.bf16.mxu1 %v5017_v42 }
 0x719   :  { %3976 = vmatpush1.bf16.msra.mxu1 %v5030_v45 }
 0x71a   :  { %3994 = vmatprep.subr.bf16.mxu1 %v4955_v18 }
 0x7df   :  { %v803_v55 = vpop.f32.mrb[8].mxu1 }
 0x7e0   :  { %v810_v56 = vrot.slane %v803_v55, 2  ;;  %v805_v57 = vpop.f32.mrb[9].mxu1 }
 0x7e1   :  { %v811_v61 = vrot.slane %v805_v57, 2 }
 0x7e2   :  { %v814_v58 = vadd.f32 %v810_v56, %v5057_v10 }
 0x7e3   :  { %v815_v62 = vadd.f32 %v811_v61, %v5065_v15 }
 0x7e4   :  { %v816_v59 = vsub.f32 0.0, %v814_v58 }
 0x7e5   :  { %v822_v5 = vsub.f32 0.0, %v815_v62 }
 0x7e6   :  { %v817_v60 = vmul.f32 1.442695, %v816_v59 }
 0x7e7   :  { %v823_v6 = vmul.f32 1.442695, %v822_v5 }
 0x7e8   :  { %4344 = vpow2.f32 %v817_v60 }
 0x7e9   :  { %4346 = vtanh.f32 %v815_v62 }
 0x7f2   :  { %v4345_v63 = vpop.eup %4344 }
 0x7f3   :  { %v819_v0 = vadd.f32 1.0, %v4345_v63  ;;  %v4347_v1 = vpop.eup %4346 }
 0x7f5   :  { %4348 = vrcp.f32 %v819_v0 }
 0x7f6   :  { %4350 = vpow2.f32 %v823_v6 }
 0x7ff   :  { %v4349_v3 = vpop.eup %4348 }
 0x800   :  { %v831_v4 = vmul.f32 %v4349_v3, %v4347_v1  ;;  %v830_v18 = vmul.f32 %v4349_v3, %v828_v2  ;;  %v4351_v10 = vpop.eup %4350 }
 0x801   :  { %v825_v7 = vadd.f32 1.0, %v4351_v10 }
 0x802   :  { %833 = vrot.lane.b32.xlu0 %v831_v4, %s5925_s30 }
 0x803   :  { %4352 = vrcp.f32 %v825_v7 }
 0x80d   :  { %v4353_v15 = vpop.eup %4352 }
 0x874   :  { %v834_v8 = vpop.permute.xlu0 %833 }
 0x875   :  { %v836_v20 = vadd.f32 %v834_v8, %v830_v18 }
 0x877   :  { %4354 = vtanh.f32 %v836_v20  ;;  %v945_v38 = vrot.slane %v836_v20, 6 }
 0x881   :  { %v4355_v21 = vpop.eup %4354 }
 0x882   :  { %v5124_v22 = vmul.f32 %v4355_v21, %v4353_v15 }
 0x884   :  { %v855_v23 = vrot.slane %v5124_v22, 6 }
 0x886   :  { %856 = vrot.lane.b32.xlu1 %v855_v23, %s5925_s30 }
 0x8f8   :  { %v857_v24 = vpop.permute.xlu1 %856 }
 0x8f9   :  { %3641 = vmatmul.mubr.msk.f32.vlgmr.msra.gmra.mrb[6].mxu0 %vm5900_vm3, %v857_v24 }
 0x8fa   :  { %3980 = vmatpush1.bf16.msra.mxu0 %v4971_v25  ;;  %1147 = vmatprep.mubr.f32.mxu0 %v4704_v12 }
 0x8fb   :  { %3982 = vmatprep.subr.bf16.mxu0 %v4973_v27 }
 0x8fe   :  { %3984 = vmatpush1.bf16.msra.mxu0 %v4991_v34 }
 0x8ff   :  { %3986 = vmatprep.subr.bf16.mxu0 %v4995_v36 }
 0x902   :  { %3988 = vmatpush1.bf16.msra.mxu0 %v5013_v41 }
 0x903   :  { %3990 = vmatprep.subr.bf16.mxu0 %v5017_v42 }
 0x906   :  { %3992 = vmatpush1.bf16.msra.mxu0 %v5030_v45 }
 0x9cc   :  { %v926_v26 = vpop.f32.mrb[6].mxu0 }
 0x9cd   :  { %v931_v28 = vadd.f32 %v926_v26, %v5061_v13  ;;  %v928_v29 = vpop.f32.mrb[7].mxu0 }
 0x9ce   :  { %v932_v32 = vadd.f32 %v928_v29, %v5069_v17 }
 0x9cf   :  { %v933_v30 = vsub.f32 0.0, %v931_v28 }
 0x9d0   :  { %v939_v44 = vsub.f32 0.0, %v932_v32 }
 0x9d1   :  { %v934_v31 = vmul.f32 1.442695, %v933_v30 }
 0x9d2   :  { %v940_v11 = vmul.f32 1.442695, %v939_v44 }
 0x9d3   :  { %4356 = vpow2.f32 %v934_v31 }
 0x9d4   :  { %4358 = vtanh.f32 %v932_v32 }
 0x9dd   :  { %v4357_v33 = vpop.eup %4356 }
 0x9de   :  { %v936_v35 = vadd.f32 1.0, %v4357_v33  ;;  %v4359_v37 = vpop.eup %4358 }
 0x9e0   :  { %4360 = vrcp.f32 %v936_v35 }
 0x9e1   :  { %4362 = vpow2.f32 %v940_v11 }
 0x9ea   :  { %v4361_v39 = vpop.eup %4360 }
 0x9eb   :  { %v948_v40 = vmul.f32 %v4361_v39, %v4359_v37  ;;  %v947_v43 = vmul.f32 %v4361_v39, %v945_v38  ;;  %v4363_v46 = vpop.eup %4362 }
 0x9ec   :  { %v942_v47 = vadd.f32 1.0, %v4363_v46 }
 0x9ed   :  { %950 = vrot.lane.b32.xlu0 %v948_v40, %s5925_s30 }
 0x9ee   :  { %4364 = vrcp.f32 %v942_v47 }
 0x9f8   :  { %v4365_v51 = vpop.eup %4364 }
 0xa5f   :  { %v951_v50 = vpop.permute.xlu0 %950 }
 0xa60   :  { %v953_v16 = vadd.f32 %v951_v50, %v947_v43 }
 0xa62   :  { %4366 = vtanh.f32 %v953_v16 }
 0xa6c   :  { %v4367_v53 = vpop.eup %4366 }
 0xa6d   :  { %v955_v54 = vmul.f32 %v4367_v53, %v4365_v51 }
 0xa6f   :  { %957 = vrot.lane.b32.xlu1 %v955_v54, %s5925_s30 }
 0xae1   :  { %v5141_v55 = vpop.permute.xlu1 %957 }
 0xae2   :  { %3642 = vmatmul.mubr.msk.f32.vlgmr.msra.gmra.mrb[10].mxu1 %vm5900_vm3, %v5141_v55 }
 0xae3   :  { %3996 = vmatpush1.bf16.msra.mxu1 %v4971_v25  ;;  %1260 = vmatprep.mubr.f32.mxu1 %v4704_v12 }
 0xae4   :  { %3998 = vmatprep.subr.bf16.mxu1 %v4973_v27 }
 0xae7   :  { %4000 = vmatpush1.bf16.msra.mxu1 %v4991_v34 }
 0xae8   :  { %4002 = vmatprep.subr.bf16.mxu1 %v4995_v36 }
 0xaeb   :  { %4004 = vmatpush1.bf16.msra.mxu1 %v5013_v41  ;;  %v1061_v41 = vrot.slane %v953_v16, 6 }
 0xaec   :  { %4006 = vmatprep.subr.bf16.mxu1 %v5017_v42 }
 0xaef   :  { %4008 = vmatpush1.bf16.msra.mxu1 %v5030_v45 }
 0xbb5   :  { %v1036_v56 = vpop.f32.mrb[10].mxu1 }
 0xbb6   :  { %v1043_v57 = vrot.slane %v1036_v56, 6  ;;  %v1038_v58 = vpop.f32.mrb[11].mxu1 }
 0xbb7   :  { %v1044_v61 = vrot.slane %v1038_v58, 6 }
 0xbb8   :  { %v1047_v59 = vadd.f32 %v1043_v57, %v5055_v9 }
 0xbb9   :  { %v1048_v27 = vadd.f32 %v1044_v61, %v5063_v14 }
 0xbba   :  { %v1049_v25 = vsub.f32 0.0, %v1047_v59 }
 0xbbb   :  { %v1055_v0 = vsub.f32 0.0, %v1048_v27 }
 0xbbc   :  { %v1050_v60 = vmul.f32 1.442695, %v1049_v25 }
 0xbbd   :  { %v1056_v1 = vmul.f32 1.442695, %v1055_v0  ;;  %v1418_v0 = vld [vmem:[%s5927_s2 + $0x8] sm:$0xff] }
 0xbbe   :  { %4368 = vpow2.f32 %v1050_v60 }
 0xbbf   :  { %4370 = vtanh.f32 %v1048_v27 }
 0xbc8   :  { %v4369_v34 = vpop.eup %4368 }
 0xbc9   :  { %v1052_v62 = vadd.f32 1.0, %v4369_v34  ;;  %v4371_v36 = vpop.eup %4370 }
 0xbcb   :  { %4372 = vrcp.f32 %v1052_v62 }
 0xbcc   :  { %4374 = vpow2.f32 %v1056_v1  ;;  %v1420_v1 = vld [vmem:[%s5927_s2 + $0x18] sm:$0xff] }
 0xbd5   :  { %v4373_v42 = vpop.eup %4372 }
 0xbd6   :  { %v1064_v63 = vmul.f32 %v4373_v42, %v4371_v36  ;;  %v1063_v45 = vmul.f32 %v4373_v42, %v1061_v41  ;;  %v4375_v2 = vpop.eup %4374  ;;  %v1309_v42 = vld [vmem:[%s5926_s5 + $0x18] sm:$0xff] }
 0xbd7   :  { %v1058_v3 = vadd.f32 1.0, %v4375_v2 }
 0xbd8   :  { %1066 = vrot.lane.b32.xlu0 %v1064_v63, %s5925_s30 }
 0xbd9   :  { %4376 = vrcp.f32 %v1058_v3  ;;  %v4025_v3 = vpack.c.bf16 %v1420_v1, %v1418_v0  ;;  %v1517_v0 = vld [vmem:[%s5928_s0 + $0x38] sm:$0xff] }
 0xbdb   :  { %4026 = vmatprep.subr.bf16.mxu1 %v4025_v3  ;;  %v1514_v3 = vld [vmem:[%s5928_s0 + $0x20] sm:$0xff] }
 0xbe3   :  { %v4377_v5 = vpop.eup %4376 }
 0xc4a   :  { %v1067_v4 = vpop.permute.xlu0 %1066 }
 0xc4b   :  { %v1069_v18 = vadd.f32 %v1067_v4, %v1063_v45  ;;  %v1308_v45 = vld [vmem:[%s5926_s5 + $0x10] sm:$0xff]  ;;  %v1417_v4 = vld [vmem:[%s5927_s2] sm:$0xff] }
 0xc4d   :  { %4378 = vtanh.f32 %v1069_v18  ;;  %v1174_v33 = vrot.slane %v1069_v18, 6  ;;  %v1419_v18 = vld [vmem:[%s5927_s2 + $0x10] sm:$0xff] }
 0xc57   :  { %v4379_v6 = vpop.eup %4378 }
 0xc58   :  { %v5156_v10 = vmul.f32 %v4379_v6, %v4377_v5  ;;  %v1311_v5 = vld [vmem:[%s5926_s5 + $0x28] sm:$0xff]  ;;  %v4027_v6 = vpack.c.bf16 %v1419_v18, %v1417_v4  ;;  %v1516_v4 = vld [vmem:[%s5928_s0 + $0x30] sm:$0xff] }
 0xc5a   :  { %v1078_v7 = vrot.slane %v5156_v10, 2 }
 0xc5c   :  { %1079 = vrot.lane.b32.xlu1 %v1078_v7, %s5925_s30  ;;  %v1310_v7 = vld [vmem:[%s5926_s5 + $0x20] sm:$0xff] }
 0xcce   :  { %v1080_v8 = vpop.permute.xlu1 %1079 }
 0xccf   :  { %3643 = vmatmul.mubr.msk.f32.vlgmr.msra.gmra.mrb[8].mxu0 %vm5900_vm3, %v1080_v8  ;;  %v1312_v8 = vld [vmem:[%s5926_s5 + $0x30] sm:$0xff] }
 0xcd0   :  { %1404 = vmatprep.mubr.f32.mxu0 %v4704_v12 }
 0xda2   :  { %v1149_v20 = vpop.f32.mrb[8].mxu0 }
 0xda3   :  { %v1156_v15 = vrot.slane %v1149_v20, 4  ;;  %v1151_v21 = vpop.f32.mrb[9].mxu0 }
 0xda4   :  { %v1157_v28 = vrot.slane %v1151_v21, 4  ;;  %v1422_v21 = vld [vmem:[%s5927_s2 + $0x28] sm:$0xff] }
 0xda5   :  { %v1160_v23 = vadd.f32 %v1156_v15, %v5061_v13  ;;  %v4015_v15 = vpack.c.bf16 %v1312_v8, %v1310_v7  ;;  %v1518_v8 = vld [vmem:[%s5928_s0 + $0x40] sm:$0xff] }
 0xda6   :  { %v1161_v29 = vadd.f32 %v1157_v28, %v5069_v17  ;;  %v1423_v28 = vld [vmem:[%s5927_s2 + $0x30] sm:$0xff] }
 0xda7   :  { %v1162_v24 = vsub.f32 0.0, %v1160_v23  ;;  %v1424_v23 = vld [vmem:[%s5927_s2 + $0x38] sm:$0xff] }
 0xda8   :  { %v1168_v39 = vsub.f32 0.0, %v1161_v29 }
 0xda9   :  { %v1163_v26 = vmul.f32 1.442695, %v1162_v24  ;;  %v1421_v24 = vld [vmem:[%s5927_s2 + $0x20] sm:$0xff] }
 0xdaa   :  { %v1169_v40 = vmul.f32 1.442695, %v1168_v39 }
 0xdab   :  { %4380 = vpow2.f32 %v1163_v26  ;;  %v4029_v26 = vpack.c.bf16 %v1424_v23, %v1422_v21  ;;  %v1523_v21 = vld [vmem:[%s5928_s0 + $0x68] sm:$0xff]  ;;  %v1525_v23 = vld [vmem:[%s5928_s0 + $0x78] sm:$0xff] }
 0xdac   :  { %4382 = vtanh.f32 %v1161_v29  ;;  %v1315_v29 = vld [vmem:[%s5926_s5 + $0x48] sm:$0xff] }
 0xdb5   :  { %v4381_v30 = vpop.eup %4380 }
 0xdb6   :  { %v1165_v31 = vadd.f32 1.0, %v4381_v30  ;;  %v4383_v32 = vpop.eup %4382  ;;  %v1317_v30 = vld [vmem:[%s5926_s5 + $0x58] sm:$0xff] }
 0xdb8   :  { %4384 = vrcp.f32 %v1165_v31  ;;  %v4031_v31 = vpack.c.bf16 %v1423_v28, %v1421_v24  ;;  %v1522_v28 = vld [vmem:[%s5928_s0 + $0x60] sm:$0xff] }
 0xdb9   :  { %4386 = vpow2.f32 %v1169_v40  ;;  %v1314_v40 = vld [vmem:[%s5926_s5 + $0x40] sm:$0xff] }
 0xdc2   :  { %v4385_v35 = vpop.eup %4384 }
 0xdc3   :  { %v1177_v37 = vmul.f32 %v4385_v35, %v4383_v32  ;;  %v1176_v38 = vmul.f32 %v4385_v35, %v1174_v33  ;;  %v4387_v13 = vpop.eup %4386  ;;  %v4017_v32 = vpack.c.bf16 %v1317_v30, %v1315_v29  ;;  %v1524_v29 = vld [vmem:[%s5928_s0 + $0x70] sm:$0xff] }
 0xdc4   :  { %v1171_v43 = vadd.f32 1.0, %v4387_v13  ;;  %v1426_v13 = vld [vmem:[%s5927_s2 + $0x48] sm:$0xff]  ;;  %v5374_v30 = vpack.c.bf16 %v1524_v29, %v1522_v28 }
 0xdc5   :  { %1179 = vrot.lane.b32.xlu0 %v1177_v37, %s5925_s30 }
 0xdc6   :  { %4388 = vrcp.f32 %v1171_v43 }
 0xdd0   :  { %v4389_v17 = vpop.eup %4388 }
 0xe37   :  { %v1180_v44 = vpop.permute.xlu0 %1179 }
 0xe38   :  { %v1182_v11 = vadd.f32 %v1180_v44, %v1176_v38 }
 0xe3a   :  { %4390 = vtanh.f32 %v1182_v11  ;;  %v1287_v34 = vrot.slane %v1182_v11, 6  ;;  %v1428_v11 = vld [vmem:[%s5927_s2 + $0x58] sm:$0xff] }
 0xe44   :  { %v4391_v46 = vpop.eup %4390 }
 0xe45   :  { %v1184_v47 = vmul.f32 %v4391_v46, %v4389_v17  ;;  %v1425_v17 = vld [vmem:[%s5927_s2 + $0x40] sm:$0xff]  ;;  %v1427_v46 = vld [vmem:[%s5927_s2 + $0x50] sm:$0xff] }
 0xe47   :  { %v1191_v50 = vrot.slane %v1184_v47, 4 }
 0xe49   :  { %1192 = vrot.lane.b32.xlu1 %v1191_v50, %s5925_s30  ;;  %v4035_v50 = vpack.c.bf16 %v1427_v46, %v1425_v17 }
 0xe4d   :  { %610 = vrot.lane.b32.xlu1 %v5090_v19, %s5925_s30 }
 0xe51   :  { %840 = vrot.lane.b32.xlu1 %v5124_v22, %s5925_s30 }
 0xe55   :  { %1186 = vrot.lane.b32.xlu1 %v1184_v47, %s5925_s30  ;;  %v4033_v47 = vpack.c.bf16 %v1428_v11, %v1426_v13 }
 0xebb   :  { %v1193_v16 = vpop.permute.xlu1 %1192 }
 0xebc   :  { %3644 = vmatmul.mubr.msk.f32.vlgmr.msra.gmra.mrb[12].mxu1 %vm5900_vm3, %v1193_v16  ;;  %v1319_v16 = vld [vmem:[%s5926_s5 + $0x68] sm:$0xff] }
 0xebd   :  { %1497 = vmatprep.mubr.f32.mxu1 %v4704_v12  ;;  %4028 = vmatpush1.bf16.msra.mxu1 %v4027_v6  ;;  %v1521_v6 = vld [vmem:[%s5928_s0 + $0x58] sm:$0xff] }
 0xebe   :  { %4030 = vmatprep.subr.bf16.mxu1 %v4029_v26  ;;  %v5361_v26 = vpack.c.bf16 %v1525_v23, %v1523_v21 }
 0xebf   :  { %v611_v51 = vpop.permute.xlu1 %610 }
 0xec0   :  { %614 = vst.msk [vmem:[#allocation2] sm:$0xc] %vm613_vm4, %v611_v51 }
 0xec1   :  { %616 = vst.msk [vmem:[#allocation2 + $0xa] sm:$0xc] %vm615_vm5, %v611_v51  ;;  %4032 = vmatpush1.bf16.msra.mxu1 %v4031_v31  ;;  %v1321_v51 = vld [vmem:[%s5926_s5 + $0x78] sm:$0xff]  ;;  %v1322_v31 = vld [vmem:[#allocation12] sm:$0x3] }
 0xec2   :  { %4034 = vmatprep.subr.bf16.mxu1 %v4033_v47 }
 0xec3   :  { %v841_v19 = vpop.permute.xlu1 %840 }
 0xec4   :  { %844 = vst.msk [vmem:[#allocation2] sm:$0xc0] %vm843_vm6, %v841_v19 }
 0xec5   :  { %846 = vst.msk [vmem:[#allocation2 + $0x2] sm:$0xc0] %vm845_vm7, %v841_v19  ;;  %v1318_v19 = vld [vmem:[%s5926_s5 + $0x60] sm:$0xff]  ;;  %4036 = vmatpush1.bf16.msra.mxu1 %v4035_v50 }
 0xec6   :  { %960 = vst.msk [vmem:[#allocation2 + $0x8] sm:$0x3] %vm495_vm1, %v5141_v55  ;;  %vm1757_vm1 = vcmask 781827  }
 0xec7   :  { %961 = vst.msk [vmem:[#allocation2 + $0x6] sm:$0x3] %vm497_vm2, %v5141_v55  ;;  %v1187_v22 = vpop.permute.xlu1 %1186  ;;  %vm1759_vm2 = vcmask 1044227  }
 0xec8   :  { %1189 = vst.msk [vmem:[#allocation2 + $0x8] sm:$0x30] %vm728_vm8, %v1187_v22 }
 0xec9   :  { %1190 = vst.msk [vmem:[#allocation2 - $0x2] sm:$0x30] %vm730_vm9, %v1187_v22 }
 0xf8f   :  { %v1262_v53 = vpop.f32.mrb[12].mxu1 }
 0xf90   :  { %v1269_v54 = vrot.slane %v1262_v53, 2  ;;  %v1264_v56 = vpop.f32.mrb[13].mxu1  ;;  %v4021_v53 = vpack.c.bf16 %v1321_v51, %v1319_v16 }
 0xf91   :  { %v1270_v25 = vrot.slane %v1264_v56, 2  ;;  %v1430_v56 = vld [vmem:[%s5927_s2 + $0x68] sm:$0xff] }
 0xf92   :  { %v1273_v57 = vadd.f32 %v1269_v54, %v5055_v9  ;;  %v1307_v9 = vld [vmem:[%s5926_s5 + $0x8] sm:$0xff]  ;;  %v1320_v54 = vld [vmem:[%s5926_s5 + $0x70] sm:$0xff] }
 0xf93   :  { %v1274_v60 = vadd.f32 %v1270_v25, %v5063_v14  ;;  %v1306_v14 = vld [vmem:[%s5926_s5] sm:$0xff]  ;;  %v4009_v63 = vpack.c.bf16 %v1309_v42, %v1307_v9 }
 0xf94   :  { %v1275_v58 = vsub.f32 0.0, %v1273_v57  ;;  %v4011_v2 = vpack.c.bf16 %v1308_v45, %v1306_v14  ;;  %v1432_v57 = vld [vmem:[%s5927_s2 + $0x78] sm:$0xff]  ;;  %v1429_v25 = vld [vmem:[%s5927_s2 + $0x60] sm:$0xff]  ;;  %v1515_v45 = vld [vmem:[%s5928_s0 + $0x28] sm:$0xff] }
 0xf95   :  { %4010 = vmatprep.subr.bf16.mxu0 %v4009_v63  ;;  %v1281_v33 = vsub.f32 0.0, %v1274_v60  ;;  %v1510_v14 = vld [vmem:[%s5928_s0] sm:$0xff]  ;;  %v1512_v63 = vld [vmem:[%s5928_s0 + $0x10] sm:$0xff] }
 0xf96   :  { %v1276_v59 = vmul.f32 1.442695, %v1275_v58  ;;  %4012 = vmatpush1.bf16.msra.mxu0 %v4011_v2  ;;  %v4023_v58 = vpack.c.bf16 %v1320_v54, %v1318_v19  ;;  %v5315_v1 = vpack.c.bf16 %v1512_v63, %v1510_v14  ;;  %v5317_v2 = vpack.c.bf16 %v1517_v0, %v1515_v45 }
 0xf97   :  { %v1282_v35 = vmul.f32 1.442695, %v1281_v33 }
 0xf98   :  { %4392 = vpow2.f32 %v1276_v59  ;;  %v4037_v59 = vpack.c.bf16 %v1432_v57, %v1430_v56 }
 0xf99   :  { %4394 = vtanh.f32 %v1274_v60  ;;  %v1431_v60 = vld [vmem:[%s5927_s2 + $0x70] sm:$0xff] }
 0xf9a   :  { %4038 = vmatprep.subr.bf16.mxu1 %v4037_v59 }
 0xfa2   :  { %v4393_v61 = vpop.eup %4392 }
 0xfa3   :  { %v1278_v55 = vadd.f32 1.0, %v4393_v61  ;;  %v4395_v27 = vpop.eup %4394  ;;  %v1511_v61 = vld [vmem:[%s5928_s0 + $0x8] sm:$0xff] }
 0xfa5   :  { %4396 = vrcp.f32 %v1278_v55  ;;  %v4039_v55 = vpack.c.bf16 %v1431_v60, %v1429_v25 }
 0xfa6   :  { %4398 = vpow2.f32 %v1282_v35 }
 0xfa7   :  { %4040 = vmatpush1.bf16.msra.mxu1 %v4039_v55 }
 0xfaf   :  { %v4397_v62 = vpop.eup %4396 }
 0xfb0   :  { %v1290_v36 = vmul.f32 %v4397_v62, %v4395_v27  ;;  %v1289_v41 = vmul.f32 %v4397_v62, %v1287_v34  ;;  %v4399_v37 = vpop.eup %4398  ;;  %v1513_v27 = vld [vmem:[%s5928_s0 + $0x18] sm:$0xff] }
 0xfb1   :  { %v1284_v38 = vadd.f32 1.0, %v4399_v37  ;;  %v5294_v34 = vpack.c.bf16 %v1513_v27, %v1511_v61  ;;  %v1331_v37 = vrot.slane %v1322_v31, %v5051_v49 }
 0xfb2   :  { %1292 = vrot.lane.b32.xlu0 %v1290_v36, %s5925_s30 }
 0xfb3   :  { %4400 = vrcp.f32 %v1284_v38  ;;  %4058 = vmatprep.subr.bf16.mxu1 %v5294_v34 }
 0xfb6   :  { %725 = vrot.lane.b32.xlu0 %v5107_v52, %s5925_s30  ;;  %v1313_v52 = vld [vmem:[%s5926_s5 + $0x38] sm:$0xff] }
 0xfb7   :  { %v4013_v20 = vpack.c.bf16 %v1313_v52, %v1311_v5  ;;  %v1519_v5 = vld [vmem:[%s5928_s0 + $0x48] sm:$0xff]  ;;  %v5335_v52 = vpack.c.bf16 %v1516_v4, %v1514_v3 }
 0xfb8   :  { %v5339_v7 = vpack.c.bf16 %v1521_v6, %v1519_v5 }
 0xfb9   :  { %4014 = vmatprep.subr.bf16.mxu0 %v4013_v20  ;;  %v1520_v20 = vld [vmem:[%s5928_s0 + $0x50] sm:$0xff]  ;;  %s4706_s0 = smov 127  }
 0xfba   :  { %1073 = vrot.lane.b32.xlu0 %v5156_v10, %s5925_s30  ;;  %4016 = vmatpush1.bf16.msra.mxu0 %v4015_v15  ;;  %v1316_v10 = vld [vmem:[%s5926_s5 + $0x50] sm:$0xff]  ;;  %v5357_v24 = vpack.c.bf16 %v1520_v20, %v1518_v8  ;;  %s4707_s5 = smov 1  }
 0xfbb   :  { %4018 = vmatprep.subr.bf16.mxu0 %v4017_v32  ;;  %v4019_v44 = vpack.c.bf16 %v1316_v10, %v1314_v40  ;;  %v1327_v32 = vrot.slane %v1322_v31, %v5049_v48 }
 0xfbd   :  { %v4401_v36 = vpop.eup %4400 }
 0xfbe   :  { %4020 = vmatpush1.bf16.msra.mxu0 %v4019_v44 }
 0xfbf   :  { %4022 = vmatprep.subr.bf16.mxu0 %v4021_v53 }
 0xfc2   :  { %4024 = vmatpush1.bf16.msra.mxu0 %v4023_v58 }
 0xfc3   :  { %4042 = vmatprep.subr.bf16.mxu0 %v5294_v34 }
0x1024   :  { %v1293_v39 = vpop.permute.xlu0 %1292 }
0x1025   :  { %v1295_v43 = vadd.f32 %v1293_v39, %v1289_v41 }
0x1027   :  { %4402 = vtanh.f32 %v1295_v43 }
0x1028   :  { %v726_v22 = vpop.permute.xlu0 %725 }
0x1029   :  { %729 = vst.msk [vmem:[#allocation2] sm:$0x30] %vm728_vm8, %v726_v22  ;;  %vm1872_vm8 = vcmask 258052  }
0x102a   :  { %731 = vst.msk [vmem:[#allocation2 + $0x6] sm:$0x30] %vm730_vm9, %v726_v22  ;;  %vm1874_vm9 = vcmask 520452  }
0x102c   :  { %v1074_v62 = vpop.permute.xlu0 %1073 }
0x102d   :  { %1076 = vst.msk [vmem:[#allocation2 + $0x8] sm:$0xc] %vm613_vm4, %v1074_v62  ;;  %vm1991_vm4 = vcmask 260102  }
0x102e   :  { %1077 = vst.msk [vmem:[#allocation2 + $0x2] sm:$0xc] %vm615_vm5, %v1074_v62  ;;  %vm1993_vm5 = vcmask 522502  }
0x1031   :  { %v4403_v41 = vpop.eup %4402 }
0x1032   :  { %v1297_v9 = vmul.f32 %v4403_v41, %v4401_v36 }
0x1034   :  { %1299 = vrot.lane.b32.xlu0 %v1297_v9, %s5925_s30 }
0x10a6   :  { %v1300_v42 = vpop.permute.xlu0 %1299 }
0x10a7   :  { %1302 = vst.msk [vmem:[#allocation2 + $0x8] sm:$0xc0] %vm843_vm6, %v1300_v42  ;;  %vm1995_vm6 = vcmask 785927  }
0x10a8   :  { %1303 = vst.msk [vmem:[#allocation2 - $0x6] sm:$0xc0] %vm845_vm7, %v1300_v42  ;;  %vm1997_vm7 = vcmask 1048327  }
0x10ae   :  { %v1305_v15 = vld [vmem:[#allocation2 + $0x8] sm:$0xff] }
0x10af   :  { %v1304_v18 = vld [vmem:[#allocation2] sm:$0xff] }
0x10b0   :  { %3645 = vmatmul.mubr.msk.f32.vlgmr.msra.gmra.mrb[10].mxu0 %vm5900_vm3, %v1304_v18  ;;  %3647 = vmatmul.mubr.msk.f32.vlgmr.msra.gmra.mrb[14].mxu1 %vm5900_vm3, %v1304_v18 }
0x10b1   :  { %4044 = vmatpush1.bf16.msra.mxu0 %v5315_v1  ;;  %1410 = vmatprep.mubr.f32.mxu0 %v4704_v12 }
0x10b2   :  { %1503 = vmatprep.mubr.f32.mxu1 %v4704_v12  ;;  %4046 = vmatprep.subr.bf16.mxu0 %v5317_v2 }
0x10b3   :  { %4060 = vmatpush1.bf16.msra.mxu1 %v5315_v1 }
0x10b4   :  { %3646 = vmatmul.mubr.msk.f32.gmra.mrb[12].mxu0 %vm5900_vm3, %v1305_v15  ;;  %3648 = vmatmul.mubr.msk.f32.gmra.mrb[16].mxu1 %vm5900_vm3, %v1305_v15 }
0x10b5   :  { %4048 = vmatpush1.bf16.msra.mxu0 %v5335_v52  ;;  %1598 = vmatprep.mubr.f32.mxu0 %v4704_v12 }
0x10b6   :  { %4050 = vmatprep.subr.bf16.mxu0 %v5339_v7  ;;  %4062 = vmatprep.subr.bf16.mxu1 %v5317_v2 }
0x10b7   :  { %4064 = vmatpush1.bf16.msra.mxu1 %v5335_v52  ;;  %1711 = vmatprep.mubr.f32.mxu1 %v4704_v12 }
0x10b8   :  { %4066 = vmatprep.subr.bf16.mxu1 %v5339_v7 }
0x10b9   :  { %4052 = vmatpush1.bf16.msra.mxu0 %v5357_v24 }
0x10ba   :  { %4054 = vmatprep.subr.bf16.mxu0 %v5361_v26 }
0x10bb   :  { %4068 = vmatpush1.bf16.msra.mxu1 %v5357_v24 }
0x10bc   :  { %4070 = vmatprep.subr.bf16.mxu1 %v5361_v26 }
0x10bd   :  { %4056 = vmatpush1.bf16.msra.mxu0 %v5374_v30 }
0x10be   :  { %4074 = vmatprep.subr.bf16.mxu0 %v5294_v34 }
0x10bf   :  { %4072 = vmatpush1.bf16.msra.mxu1 %v5374_v30 }
0x10c0   :  { %1599 = vmatmul.mubr.f32.vlgmr.msra.gmra.mrb[14].mxu0 %v4704_v12  ;;  %4090 = vmatprep.subr.bf16.mxu1 %v5294_v34 }
0x10c1   :  { %4076 = vmatpush1.bf16.msra.mxu0 %v5315_v1  ;;  %1830 = vmatprep.mubr.f32.mxu0 %v4704_v12 }
0x10c2   :  { %4078 = vmatprep.subr.bf16.mxu0 %v5317_v2 }
0x10c5   :  { %4080 = vmatpush1.bf16.msra.mxu0 %v5335_v52 }
0x10c6   :  { %4082 = vmatprep.subr.bf16.mxu0 %v5339_v7 }
0x10c9   :  { %4084 = vmatpush1.bf16.msra.mxu0 %v5357_v24 }
0x10ca   :  { %4086 = vmatprep.subr.bf16.mxu0 %v5361_v26 }
0x10cd   :  { %4088 = vmatpush1.bf16.msra.mxu0 %v5374_v30 }
0x10ce   :  { %4106 = vmatprep.subr.bf16.mxu0 %v5294_v34 }
0x1183   :  { %v1406_v33 = vpop.f32.mrb[10].mxu0  ;;  %v1499_v35 = vpop.f32.mrb[14].mxu1 }
0x1184   :  { %v1408_v38 = vpop.f32.mrb[11].mxu0  ;;  %v1501_v39 = vpop.f32.mrb[15].mxu1  ;;  %v1407_v40 = vadd.f32 %v1406_v33, %v1327_v32  ;;  %v2001_v10 = vrot.slane %v1499_v35, 6  ;;  %v2116_v13 = vrot.slane %v1499_v35, 2 }
0x1185   :  { %v1409_v43 = vadd.f32 %v1408_v38, %v1331_v37  ;;  %v2002_v17 = vrot.slane %v1501_v39, 6  ;;  %v2117_v19 = vrot.slane %v1501_v39, 2 }
0x1187   :  { %v1412_v44 = vpop.f32.mrb[12].mxu0  ;;  %v1505_v11 = vpop.f32.mrb[16].mxu1 }
0x1188   :  { %v1413_v46 = vadd.f32 %v1412_v44, %v1327_v32  ;;  %v1528_v47 = vrot.slane %v1505_v11, 6  ;;  %v1639_v50 = vrot.slane %v1505_v11, 2  ;;  %v1414_v16 = vpop.f32.mrb[13].mxu0  ;;  %v1507_v51 = vpop.f32.mrb[17].mxu1 }
0x1189   :  { %v1415_v22 = vadd.f32 %v1414_v16, %v1331_v37  ;;  %v1529_v53 = vrot.slane %v1507_v51, 6  ;;  %v1640_v54 = vrot.slane %v1507_v51, 2 }
0x118a   :  { %v5395_v56 = vadd.f32 %v2116_v13, %v1413_v46  ;;  %v5397_v57 = vadd.f32 %v1639_v50, %v1407_v40  ;;  %v5399_v58 = vadd.f32 %v1528_v47, %v1407_v40  ;;  %v5401_v59 = vadd.f32 %v2001_v10, %v1413_v46 }
0x118b   :  { %v5403_v25 = vadd.f32 %v2117_v19, %v1415_v22  ;;  %v5405_v60 = vadd.f32 %v1640_v54, %v1409_v43  ;;  %v5407_v61 = vadd.f32 %v1529_v53, %v1409_v43  ;;  %v5409_v55 = vadd.f32 %v2002_v17, %v1415_v22 }
0x1193   :  { %v1600_v27 = vpop.f32.mrb[14].mxu0 }
0x1194   :  { %v1605_v62 = vadd.f32 %v1600_v27, %v5399_v58  ;;  %v1602_v36 = vpop.f32.mrb[15].mxu0 }
0x1195   :  { %v1606_v42 = vadd.f32 %v1602_v36, %v5407_v61 }
0x1196   :  { %v1607_v41 = vsub.f32 0.0, %v1605_v62 }
0x1197   :  { %v1613_v4 = vsub.f32 0.0, %v1606_v42 }
0x1198   :  { %v1608_v9 = vmul.f32 1.442695, %v1607_v41 }
0x1199   :  { %v1614_v18 = vmul.f32 1.442695, %v1613_v4 }
0x119a   :  { %4404 = vpow2.f32 %v1608_v9 }
0x119b   :  { %4406 = vtanh.f32 %v1606_v42 }
0x11a4   :  { %v4405_v14 = vpop.eup %4404 }
0x11a5   :  { %v1610_v63 = vadd.f32 1.0, %v4405_v14  ;;  %v4407_v45 = vpop.eup %4406 }
0x11a7   :  { %4408 = vrcp.f32 %v1610_v63 }
0x11a8   :  { %4410 = vpow2.f32 %v1614_v18 }
0x11b1   :  { %v4409_v0 = vpop.eup %4408 }
0x11b2   :  { %v1619_v3 = vmul.f32 %v4409_v0, %v4407_v45  ;;  %v4411_v5 = vpop.eup %4410  ;;  %v1618_v8 = vmul.f32 0.0, %v4409_v0 }
0x11b3   :  { %v1616_v6 = vadd.f32 1.0, %v4411_v5 }
0x11b4   :  { %1621 = vrot.lane.b32.xlu1 %v1619_v3, %s5925_s30 }
0x11b5   :  { %4412 = vrcp.f32 %v1616_v6 }
0x11bf   :  { %v4413_v21 = vpop.eup %4412 }
0x1226   :  { %v1622_v20 = vpop.permute.xlu1 %1621 }
0x1227   :  { %v1624_v15 = vadd.f32 %v1622_v20, %v1618_v8 }
0x1229   :  { %4414 = vtanh.f32 %v1624_v15  ;;  %v1738_v44 = vrot.slane %v1624_v15, 6 }
0x1233   :  { %v4415_v23 = vpop.eup %4414 }
0x1234   :  { %v1626_v28 = vmul.f32 %v4415_v23, %v4413_v21 }
0x1236   :  { %1628 = vrot.lane.b32.xlu0 %v1626_v28, %s5925_s30 }
0x12a8   :  { %v1629_v29 = vpop.permute.xlu0 %1628 }
0x12a9   :  { %1632 = vst.msk [vmem:[#allocation3] sm:$0x1] %vm1631_vm10, %v1629_v29  ;;  %3649 = vmatmul.mubr.msk.f32.vlgmr.msra.gmra.mrb[18].mxu1 %vm5900_vm3, %v1629_v29 }
0x12aa   :  { %1634 = vst.msk [vmem:[#allocation3 + $0x7] sm:$0x1] %vm1633_vm11, %v1629_v29  ;;  %4092 = vmatpush1.bf16.msra.mxu1 %v5315_v1  ;;  %1949 = vmatprep.mubr.f32.mxu1 %v4704_v12 }
0x12ab   :  { %1636 = vst.msk [vmem:[#allocation3 - $0x1] sm:$0x2] %vm1635_vm12, %v1626_v28  ;;  %4094 = vmatprep.subr.bf16.mxu1 %v5317_v2 }
0x12ac   :  { %1638 = vst.msk [vmem:[#allocation3 + $0x6] sm:$0x2] %vm1637_vm13, %v1626_v28 }
0x12ae   :  { %4096 = vmatpush1.bf16.msra.mxu1 %v5335_v52 }
0x12af   :  { %4098 = vmatprep.subr.bf16.mxu1 %v5339_v7 }
0x12b2   :  { %4100 = vmatpush1.bf16.msra.mxu1 %v5357_v24 }
0x12b3   :  { %4102 = vmatprep.subr.bf16.mxu1 %v5361_v26 }
0x12b6   :  { %4104 = vmatpush1.bf16.msra.mxu1 %v5374_v30 }
0x12b7   :  { %4122 = vmatprep.subr.bf16.mxu1 %v5294_v34 }
0x137c   :  { %v1713_v31 = vpop.f32.mrb[18].mxu1 }
0x137d   :  { %v1720_v32 = vrot.slane %v1713_v31, 6  ;;  %v1715_v33 = vpop.f32.mrb[19].mxu1 }
0x137e   :  { %v1721_v39 = vrot.slane %v1715_v33, 6 }
0x137f   :  { %v1724_v35 = vadd.f32 %v1720_v32, %v5397_v57 }
0x1380   :  { %v1725_v40 = vadd.f32 %v1721_v39, %v5405_v60 }
0x1381   :  { %v1726_v37 = vsub.f32 0.0, %v1724_v35 }
0x1382   :  { %v1732_v47 = vsub.f32 0.0, %v1725_v40 }
0x1383   :  { %v1727_v38 = vmul.f32 1.442695, %v1726_v37 }
0x1384   :  { %v1733_v50 = vmul.f32 1.442695, %v1732_v47 }
0x1385   :  { %4416 = vpow2.f32 %v1727_v38 }
0x1386   :  { %4418 = vtanh.f32 %v1725_v40 }
0x138f   :  { %v4417_v10 = vpop.eup %4416 }
0x1390   :  { %v1729_v13 = vadd.f32 1.0, %v4417_v10  ;;  %v4419_v43 = vpop.eup %4418 }
0x1392   :  { %4420 = vrcp.f32 %v1729_v13 }
0x1393   :  { %4422 = vpow2.f32 %v1733_v50 }
0x139c   :  { %v4421_v11 = vpop.eup %4420 }
0x139d   :  { %v1741_v17 = vmul.f32 %v4421_v11, %v4419_v43  ;;  %v1740_v46 = vmul.f32 %v4421_v11, %v1738_v44  ;;  %v4423_v16 = vpop.eup %4422 }
0x139e   :  { %v1735_v51 = vadd.f32 1.0, %v4423_v16 }
0x139f   :  { %1743 = vrot.lane.b32.xlu1 %v1741_v17, %s5925_s30 }
0x13a0   :  { %4424 = vrcp.f32 %v1735_v51 }
0x13aa   :  { %v4425_v53 = vpop.eup %4424 }
0x1411   :  { %v1744_v19 = vpop.permute.xlu1 %1743 }
0x1412   :  { %v1746_v22 = vadd.f32 %v1744_v19, %v1740_v46 }
0x1414   :  { %4426 = vtanh.f32 %v1746_v22  ;;  %v1857_v6 = vrot.slane %v1746_v22, 6 }
0x141e   :  { %v4427_v54 = vpop.eup %4426 }
0x141f   :  { %v5432_v27 = vmul.f32 %v4427_v54, %v4425_v53 }
0x1421   :  { %v1761_v62 = vrot.slane %v5432_v27, 2 }
0x1423   :  { %1762 = vrot.lane.b32.xlu0 %v1761_v62, %s5925_s30 }
0x1495   :  { %v1763_v36 = vpop.permute.xlu0 %1762 }
0x1496   :  { %3650 = vmatmul.mubr.msk.f32.vlgmr.msra.gmra.mrb[16].mxu0 %vm5900_vm3, %v1763_v36 }
0x1497   :  { %4108 = vmatpush1.bf16.msra.mxu0 %v5315_v1  ;;  %2076 = vmatprep.mubr.f32.mxu0 %v4704_v12 }
0x1498   :  { %4110 = vmatprep.subr.bf16.mxu0 %v5317_v2 }
0x149b   :  { %4112 = vmatpush1.bf16.msra.mxu0 %v5335_v52 }
0x149c   :  { %4114 = vmatprep.subr.bf16.mxu0 %v5339_v7 }
0x149f   :  { %4116 = vmatpush1.bf16.msra.mxu0 %v5357_v24 }
0x14a0   :  { %4118 = vmatprep.subr.bf16.mxu0 %v5361_v26 }
0x14a3   :  { %4120 = vmatpush1.bf16.msra.mxu0 %v5374_v30 }
0x14a4   :  { %4138 = vmatprep.subr.bf16.mxu0 %v5294_v34 }
0x1569   :  { %v1832_v41 = vpop.f32.mrb[16].mxu0 }
0x156a   :  { %v1839_v9 = vrot.slane %v1832_v41, 4  ;;  %v1834_v42 = vpop.f32.mrb[17].mxu0 }
0x156b   :  { %v1840_v0 = vrot.slane %v1834_v42, 4 }
0x156c   :  { %v1843_v14 = vadd.f32 %v1839_v9, %v5399_v58 }
0x156d   :  { %v1844_v3 = vadd.f32 %v1840_v0, %v5407_v61 }
0x156e   :  { %v1845_v63 = vsub.f32 0.0, %v1843_v14 }
0x156f   :  { %v1851_v21 = vsub.f32 0.0, %v1844_v3 }
0x1570   :  { %v1846_v45 = vmul.f32 1.442695, %v1845_v63 }
0x1571   :  { %v1852_v23 = vmul.f32 1.442695, %v1851_v21 }
0x1572   :  { %4428 = vpow2.f32 %v1846_v45 }
0x1573   :  { %4430 = vtanh.f32 %v1844_v3 }
0x157c   :  { %v4429_v4 = vpop.eup %4428 }
0x157d   :  { %v1848_v18 = vadd.f32 1.0, %v4429_v4  ;;  %v4431_v5 = vpop.eup %4430 }
0x157f   :  { %4432 = vrcp.f32 %v1848_v18 }
0x1580   :  { %4434 = vpow2.f32 %v1852_v23 }
0x1589   :  { %v4433_v8 = vpop.eup %4432 }
0x158a   :  { %v1860_v20 = vmul.f32 %v4433_v8, %v4431_v5  ;;  %v1859_v15 = vmul.f32 %v4433_v8, %v1857_v6  ;;  %v4435_v58 = vpop.eup %4434 }
0x158b   :  { %v1854_v28 = vadd.f32 1.0, %v4435_v58 }
0x158c   :  { %1862 = vrot.lane.b32.xlu1 %v1860_v20, %s5925_s30 }
0x158d   :  { %4436 = vrcp.f32 %v1854_v28 }
0x1597   :  { %v4437_v61 = vpop.eup %4436 }
0x15fe   :  { %v1863_v29 = vpop.permute.xlu1 %1862 }
0x15ff   :  { %v1865_v31 = vadd.f32 %v1863_v29, %v1859_v15 }
0x1601   :  { %4438 = vtanh.f32 %v1865_v31  ;;  %v1976_v50 = vrot.slane %v1865_v31, 6 }
0x160b   :  { %v4439_v32 = vpop.eup %4438 }
0x160c   :  { %v5449_v33 = vmul.f32 %v4439_v32, %v4437_v61 }
0x160e   :  { %v1880_v35 = vrot.slane %v5449_v33, 4 }
0x1610   :  { %1881 = vrot.lane.b32.xlu0 %v1880_v35, %s5925_s30 }
0x1682   :  { %v1882_v37 = vpop.permute.xlu0 %1881 }
0x1683   :  { %3651 = vmatmul.mubr.msk.f32.vlgmr.msra.gmra.mrb[20].mxu1 %vm5900_vm3, %v1882_v37 }
0x1684   :  { %4124 = vmatpush1.bf16.msra.mxu1 %v5315_v1  ;;  %2188 = vmatprep.mubr.f32.mxu1 %v4704_v12 }
0x1685   :  { %4126 = vmatprep.subr.bf16.mxu1 %v5317_v2 }
0x1688   :  { %4128 = vmatpush1.bf16.msra.mxu1 %v5335_v52 }
0x1689   :  { %4130 = vmatprep.subr.bf16.mxu1 %v5339_v7 }
0x168c   :  { %4132 = vmatpush1.bf16.msra.mxu1 %v5357_v24 }
0x168d   :  { %4134 = vmatprep.subr.bf16.mxu1 %v5361_v26 }
0x1690   :  { %4136 = vmatpush1.bf16.msra.mxu1 %v5374_v30 }
0x1691   :  { %4154 = vmatprep.subr.bf16.mxu1 %v5294_v34 }
0x1756   :  { %v1951_v38 = vpop.f32.mrb[20].mxu1 }
0x1757   :  { %v1958_v39 = vrot.slane %v1951_v38, 2  ;;  %v1953_v40 = vpop.f32.mrb[21].mxu1 }
0x1758   :  { %v1959_v44 = vrot.slane %v1953_v40, 2 }
0x1759   :  { %v1962_v10 = vadd.f32 %v1958_v39, %v5397_v57 }
0x175a   :  { %v1963_v11 = vadd.f32 %v1959_v44, %v5405_v60 }
0x175b   :  { %v1964_v13 = vsub.f32 0.0, %v1962_v10 }
0x175c   :  { %v1970_v19 = vsub.f32 0.0, %v1963_v11 }
0x175d   :  { %v1965_v43 = vmul.f32 1.442695, %v1964_v13 }
0x175e   :  { %v1971_v22 = vmul.f32 1.442695, %v1970_v19 }
0x175f   :  { %4440 = vpow2.f32 %v1965_v43 }
0x1760   :  { %4442 = vtanh.f32 %v1963_v11 }
0x1769   :  { %v4441_v17 = vpop.eup %4440 }
0x176a   :  { %v1967_v46 = vadd.f32 1.0, %v4441_v17  ;;  %v4443_v47 = vpop.eup %4442 }
0x176c   :  { %4444 = vrcp.f32 %v1967_v46 }
0x176d   :  { %4446 = vpow2.f32 %v1971_v22 }
0x1776   :  { %v4445_v16 = vpop.eup %4444 }
0x1777   :  { %v1979_v51 = vmul.f32 %v4445_v16, %v4443_v47  ;;  %v1978_v34 = vmul.f32 %v4445_v16, %v1976_v50  ;;  %v4447_v57 = vpop.eup %4446 }
0x1778   :  { %v1973_v53 = vadd.f32 1.0, %v4447_v57 }
0x1779   :  { %1981 = vrot.lane.b32.xlu1 %v1979_v51, %s5925_s30 }
0x177a   :  { %4448 = vrcp.f32 %v1973_v53 }
0x1784   :  { %v4449_v60 = vpop.eup %4448 }
0x17eb   :  { %v1982_v54 = vpop.permute.xlu1 %1981 }
0x17ec   :  { %v1984_v62 = vadd.f32 %v1982_v54, %v1978_v34 }
0x17ee   :  { %4450 = vtanh.f32 %v1984_v62  ;;  %v2097_v8 = vrot.slane %v1984_v62, 6 }
0x17f8   :  { %v4451_v36 = vpop.eup %4450 }
0x17f9   :  { %v5466_v41 = vmul.f32 %v4451_v36, %v4449_v60 }
0x17fb   :  { %v2007_v9 = vrot.slane %v5466_v41, 6 }
0x17fd   :  { %2008 = vrot.lane.b32.xlu0 %v2007_v9, %s5925_s30 }
0x186f   :  { %v2009_v42 = vpop.permute.xlu0 %2008 }
0x1870   :  { %3652 = vmatmul.mubr.msk.f32.vlgmr.msra.gmra.mrb[18].mxu0 %vm5900_vm3, %v2009_v42 }
0x1871   :  { %4140 = vmatpush1.bf16.msra.mxu0 %v5315_v1  ;;  %2303 = vmatprep.mubr.f32.mxu0 %v4704_v12 }
0x1872   :  { %4142 = vmatprep.subr.bf16.mxu0 %v5317_v2 }
0x1875   :  { %4144 = vmatpush1.bf16.msra.mxu0 %v5335_v52 }
0x1876   :  { %4146 = vmatprep.subr.bf16.mxu0 %v5339_v7 }
0x1879   :  { %4148 = vmatpush1.bf16.msra.mxu0 %v5357_v24 }
0x187a   :  { %4150 = vmatprep.subr.bf16.mxu0 %v5361_v26 }
0x187d   :  { %4152 = vmatpush1.bf16.msra.mxu0 %v5374_v30 }
0x187e   :  { %3760 = vmatprep.subr.mxu0 %v4704_v12 }
0x1943   :  { %v2078_v14 = vpop.f32.mrb[18].mxu0 }
0x1944   :  { %v2083_v63 = vadd.f32 %v2078_v14, %v5401_v59  ;;  %v2080_v45 = vpop.f32.mrb[19].mxu0 }
0x1945   :  { %v2084_v4 = vadd.f32 %v2080_v45, %v5409_v55 }
0x1946   :  { %v2085_v0 = vsub.f32 0.0, %v2083_v63 }
0x1947   :  { %v2091_v23 = vsub.f32 0.0, %v2084_v4 }
0x1948   :  { %v2086_v3 = vmul.f32 1.442695, %v2085_v0 }
0x1949   :  { %v2092_v58 = vmul.f32 1.442695, %v2091_v23 }
0x194a   :  { %4452 = vpow2.f32 %v2086_v3 }
0x194b   :  { %4454 = vtanh.f32 %v2084_v4 }
0x1954   :  { %v4453_v18 = vpop.eup %4452 }
0x1955   :  { %v2088_v5 = vadd.f32 1.0, %v4453_v18  ;;  %v4455_v6 = vpop.eup %4454 }
0x1957   :  { %4456 = vrcp.f32 %v2088_v5 }
0x1958   :  { %4458 = vpow2.f32 %v2092_v58 }
0x1961   :  { %v4457_v20 = vpop.eup %4456 }
0x1962   :  { %v2100_v15 = vmul.f32 %v4457_v20, %v4455_v6  ;;  %v2099_v21 = vmul.f32 %v4457_v20, %v2097_v8  ;;  %v4459_v28 = vpop.eup %4458 }
0x1963   :  { %v2094_v29 = vadd.f32 1.0, %v4459_v28 }
0x1964   :  { %2102 = vrot.lane.b32.xlu1 %v2100_v15, %s5925_s30 }
0x1965   :  { %4460 = vrcp.f32 %v2094_v29 }
0x196f   :  { %v4461_v32 = vpop.eup %4460 }
0x19d6   :  { %v2103_v31 = vpop.permute.xlu1 %2102 }
0x19d7   :  { %v2105_v61 = vadd.f32 %v2103_v31, %v2099_v21 }
0x19d9   :  { %4462 = vtanh.f32 %v2105_v61 }
0x19e3   :  { %v4463_v35 = vpop.eup %4462 }
0x19e4   :  { %v5483_v37 = vmul.f32 %v4463_v35, %v4461_v32 }
0x19e6   :  { %2109 = vrot.lane.b32.xlu0 %v5483_v37, %s5925_s30 }
0x1a58   :  { %v5487_v38 = vpop.permute.xlu0 %2109 }
0x1a59   :  { %3653 = vmatmul.mubr.msk.f32.vlgmr.msra.gmra.mrb[22].mxu1 %vm5900_vm3, %v5487_v38 }
0x1a5a   :  { %4156 = vmatpush1.bf16.msra.mxu1 %v5315_v1  ;;  %2418 = vmatprep.mubr.f32.mxu1 %v4704_v12 }
0x1a5b   :  { %4158 = vmatprep.subr.bf16.mxu1 %v5317_v2 }
0x1a5e   :  { %4160 = vmatpush1.bf16.msra.mxu1 %v5335_v52 }
0x1a5f   :  { %4162 = vmatprep.subr.bf16.mxu1 %v5339_v7 }
0x1a62   :  { %4164 = vmatpush1.bf16.msra.mxu1 %v5357_v24 }
0x1a63   :  { %4166 = vmatprep.subr.bf16.mxu1 %v5361_v26  ;;  %v2215_v26 = vrot.slane %v2105_v61, 6 }
0x1a66   :  { %4168 = vmatpush1.bf16.msra.mxu1 %v5374_v30 }
0x1a67   :  { %3765 = vmatprep.subr.mxu1 %v4704_v12 }
0x1b2c   :  { %v2190_v39 = vpop.f32.mrb[22].mxu1 }
0x1b2d   :  { %v2197_v40 = vrot.slane %v2190_v39, 6  ;;  %v2192_v10 = vpop.f32.mrb[23].mxu1 }
0x1b2e   :  { %v2198_v2 = vrot.slane %v2192_v10, 6 }
0x1b2f   :  { %v2201_v1 = vadd.f32 %v2197_v40, %v5395_v56 }
0x1b30   :  { %v2202_v52 = vadd.f32 %v2198_v2, %v5403_v25 }
0x1b31   :  { %v2203_v13 = vsub.f32 0.0, %v2201_v1 }
0x1b32   :  { %v2209_v46 = vsub.f32 0.0, %v2202_v52 }
0x1b33   :  { %v2204_v43 = vmul.f32 1.442695, %v2203_v13 }
0x1b34   :  { %v2210_v47 = vmul.f32 1.442695, %v2209_v46 }
0x1b35   :  { %4464 = vpow2.f32 %v2204_v43 }
0x1b36   :  { %4466 = vtanh.f32 %v2202_v52 }
0x1b3f   :  { %v4465_v7 = vpop.eup %4464 }
0x1b40   :  { %v2206_v44 = vadd.f32 1.0, %v4465_v7  ;;  %v4467_v24 = vpop.eup %4466 }
0x1b42   :  { %4468 = vrcp.f32 %v2206_v44 }
0x1b43   :  { %4470 = vpow2.f32 %v2210_v47 }
0x1b4c   :  { %v4469_v30 = vpop.eup %4468 }
0x1b4d   :  { %v2218_v11 = vmul.f32 %v4469_v30, %v4467_v24  ;;  %v2217_v17 = vmul.f32 %v4469_v30, %v2215_v26  ;;  %v4471_v50 = vpop.eup %4470 }
0x1b4e   :  { %v2212_v16 = vadd.f32 1.0, %v4471_v50 }
0x1b4f   :  { %2220 = vrot.lane.b32.xlu1 %v2218_v11, %s5925_s30 }
0x1b50   :  { %4472 = vrcp.f32 %v2212_v16 }
0x1b5a   :  { %v4473_v19 = vpop.eup %4472 }
0x1bc1   :  { %v2221_v51 = vpop.permute.xlu1 %2220 }
0x1bc2   :  { %v2223_v34 = vadd.f32 %v2221_v51, %v2217_v17 }
0x1bc4   :  { %4474 = vtanh.f32 %v2223_v34  ;;  %v2330_v18 = vrot.slane %v2223_v34, 6 }
0x1bce   :  { %v4475_v22 = vpop.eup %4474 }
0x1bcf   :  { %v5503_v57 = vmul.f32 %v4475_v22, %v4473_v19  ;;  %v2482_v22 = vld [vmem:[#allocation13 + $0x4] sm:$0xf] }
0x1bd1   :  { %v2234_v53 = vrot.slane %v5503_v57, 2 }
0x1bd3   :  { %2235 = vrot.lane.b32.xlu0 %v2234_v53, %s5925_s30  ;;  %v2465_v53 = vld [vmem:[#allocation15] sm:$0x3] }
0x1c45   :  { %v2236_v54 = vpop.permute.xlu0 %2235 }
0x1c46   :  { %3654 = vmatmul.mubr.msk.f32.vlgmr.msra.gmra.mrb[20].mxu0 %vm5900_vm3, %v2236_v54  ;;  %v2478_v54 = vrot.slane %v2465_v53, %v5051_v49 }
0x1d19   :  { %v2305_v62 = vpop.f32.mrb[20].mxu0 }
0x1d1a   :  { %v2312_v60 = vrot.slane %v2305_v62, 4  ;;  %v2307_v36 = vpop.f32.mrb[21].mxu0  ;;  %v2471_v62 = vrot.slane %v2465_v53, %v5049_v48 }
0x1d1b   :  { %v2313_v63 = vrot.slane %v2307_v36, 4 }
0x1d1c   :  { %v2316_v9 = vadd.f32 %v2312_v60, %v5401_v59 }
0x1d1d   :  { %v2317_v45 = vadd.f32 %v2313_v63, %v5409_v55  ;;  %v2631_v63 = vld [vmem:[#allocation13 + $0x8] sm:$0xf] }
0x1d1e   :  { %v2318_v42 = vsub.f32 0.0, %v2316_v9 }
0x1d1f   :  { %v2324_v20 = vsub.f32 0.0, %v2317_v45 }
0x1d20   :  { %v2319_v14 = vmul.f32 1.442695, %v2318_v42 }
0x1d21   :  { %v2325_v15 = vmul.f32 1.442695, %v2324_v20 }
0x1d22   :  { %4476 = vpow2.f32 %v2319_v14  ;;  %v2480_v14 = vld [vmem:[#allocation13] sm:$0xf] }
0x1d23   :  { %4478 = vtanh.f32 %v2317_v45 }
0x1d2c   :  { %v4477_v0 = vpop.eup %4476 }
0x1d2d   :  { %v2321_v3 = vadd.f32 1.0, %v4477_v0  ;;  %v4479_v4 = vpop.eup %4478 }
0x1d2f   :  { %4480 = vrcp.f32 %v2321_v3 }
0x1d30   :  { %4482 = vpow2.f32 %v2325_v15 }
0x1d39   :  { %v4481_v5 = vpop.eup %4480 }
0x1d3a   :  { %v2333_v6 = vmul.f32 %v4481_v5, %v4479_v4  ;;  %v2332_v8 = vmul.f32 %v4481_v5, %v2330_v18  ;;  %v4483_v59 = vpop.eup %4482 }
0x1d3b   :  { %v2327_v21 = vadd.f32 1.0, %v4483_v59 }
0x1d3c   :  { %2335 = vrot.lane.b32.xlu1 %v2333_v6, %s5925_s30 }
0x1d3d   :  { %4484 = vrcp.f32 %v2327_v21  ;;  %v2734_v21 = vld [vmem:[%s5869_s13] sm:$0xf] }
0x1d47   :  { %v4485_v55 = vpop.eup %4484 }
0x1dae   :  { %v2336_v23 = vpop.permute.xlu1 %2335 }
0x1daf   :  { %v2338_v58 = vadd.f32 %v2336_v23, %v2332_v8 }
0x1db1   :  { %4486 = vtanh.f32 %v2338_v58  ;;  %v2445_v7 = vrot.slane %v2338_v58, 6 }
0x1dbb   :  { %v4487_v28 = vpop.eup %4486 }
0x1dbc   :  { %v2340_v29 = vmul.f32 %v4487_v28, %v4485_v55 }
0x1dbe   :  { %v2349_v31 = vrot.slane %v2340_v29, 4 }
0x1dc0   :  { %2350 = vrot.lane.b32.xlu0 %v2349_v31, %s5925_s30  ;;  %v2727_v31 = vld [vmem:[%s5868_s12] sm:$0xf] }
0x1dc4   :  { %1750 = vrot.lane.b32.xlu0 %v5432_v27, %s5925_s30 }
0x1dc8   :  { %1988 = vrot.lane.b32.xlu0 %v5466_v41, %s5925_s30 }
0x1dcc   :  { %2342 = vrot.lane.b32.xlu0 %v2340_v29, %s5925_s30 }
0x1e32   :  { %v2351_v61 = vpop.permute.xlu0 %2350 }
0x1e33   :  { %3655 = vmatmul.mubr.msk.f32.vlgmr.msra.gmra.mrb[24].mxu1 %vm5900_vm3, %v2351_v61  ;;  %vm1878_vm3 = vcmask 1046277   ;;  %v4708_v61 = vmov 0.0|0.0  }
0x1e36   :  { %v1751_v32 = vpop.permute.xlu0 %1750 }
0x1e37   :  { %1754 = vst.msk [vmem:[#allocation3 - $0x1] sm:$0x4] %vm1753_vm14, %v1751_v32 }
0x1e38   :  { %1756 = vst.msk [vmem:[#allocation3 + $0x4] sm:$0x4] %vm1755_vm15, %v1751_v32  ;;  %v2742_v32 = vld [vmem:[%s5871_s15] sm:$0xff] }
0x1e39   :  { %1758 = vst.msk [vmem:[#allocation3 - $0x2] sm:$0x8] %vm1757_vm1, %v5432_v27 }
0x1e3a   :  { %1760 = vst.msk [vmem:[#allocation3 + $0x3] sm:$0x8] %vm1759_vm2, %v5432_v27  ;;  %v1989_v35 = vpop.permute.xlu0 %1988 }
0x1e3b   :  { %1992 = vst.msk [vmem:[#allocation3 - $0x3] sm:$0x40] %vm1991_vm4, %v1989_v35 }
0x1e3c   :  { %1994 = vst.msk [vmem:[#allocation3 - $0x2] sm:$0x40] %vm1993_vm5, %v1989_v35  ;;  %v2743_v35 = vld [vmem:[%s5871_s15 + $0x8] sm:$0xff] }
0x1e3d   :  { %1996 = vst.msk [vmem:[#allocation3 - $0x4] sm:$0x80] %vm1995_vm6, %v5466_v41 }
0x1e3e   :  { %1998 = vst.msk [vmem:[#allocation3 - $0x3] sm:$0x80] %vm1997_vm7, %v5466_v41  ;;  %v2343_v27 = vpop.permute.xlu0 %2342 }
0x1e3f   :  { %2112 = vst.msk [vmem:[#allocation3 + $0x4] sm:$0x1] %vm1631_vm10, %v5487_v38  ;;  %vm2713_vm10 = vcmask 1043456  }
0x1e40   :  { %2113 = vst.msk [vmem:[#allocation3 + $0x3] sm:$0x1] %vm1633_vm11, %v5487_v38  ;;  %vm5929_vm11 = vcmask 523264  }
0x1e41   :  { %2114 = vst.msk [vmem:[#allocation3 + $0x3] sm:$0x2] %vm1635_vm12, %v5483_v37  ;;  %vm5930_vm12 = vmmov %vm5929_vm11 }
0x1e42   :  { %2115 = vst.msk [vmem:[#allocation3 + $0x2] sm:$0x2] %vm1637_vm13, %v5483_v37  ;;  %vm5931_vm13 = vmmov %vm5929_vm11 }
0x1e43   :  { %2345 = vst.msk [vmem:[#allocation3 + $0x2] sm:$0x10] %vm1872_vm8, %v2343_v27 }
0x1e44   :  { %2346 = vst.msk [vmem:[#allocation3 - $0x3] sm:$0x10] %vm1874_vm9, %v2343_v27  ;;  %v2750_v27 = vld [vmem:[%s5872_s16] sm:$0xff] }
0x1e45   :  { %2347 = vst.msk [vmem:[#allocation3 + $0x1] sm:$0x20] %vm1876_vm0, %v2340_v29 }
0x1e46   :  { %2348 = vst.msk [vmem:[#allocation3 - $0x4] sm:$0x20] %vm1878_vm3, %v2340_v29 }
0x1f06   :  { %v2420_v41 = vpop.f32.mrb[24].mxu1 }
0x1f07   :  { %v2427_v39 = vrot.slane %v2420_v41, 2  ;;  %v2422_v38 = vpop.f32.mrb[25].mxu1  ;;  %v4170_v41 = vpack.c.bf16 %v2743_v35, %v2742_v32  ;;  %v3668_v32 = vld [vmem:[%s5873_s17 + $0x10] sm:$0xff] }
0x1f08   :  { %v2428_v13 = vrot.slane %v2422_v38, 2 }
0x1f09   :  { %v2431_v40 = vadd.f32 %v2427_v39, %v5395_v56  ;;  %v2751_v39 = vld [vmem:[%s5872_s16 + $0x8] sm:$0xff] }
0x1f0a   :  { %v2432_v43 = vadd.f32 %v2428_v13, %v5403_v25  ;;  %v4182_v38 = vpack.c.bf16 %v2751_v39, %v2750_v27 }
0x1f0b   :  { %v2433_v10 = vsub.f32 0.0, %v2431_v40  ;;  %v2744_v40 = vld [vmem:[%s5871_s15 + $0x10] sm:$0xff] }
0x1f0c   :  { %v2439_v56 = vsub.f32 0.0, %v2432_v43 }
0x1f0d   :  { %v2434_v1 = vmul.f32 1.442695, %v2433_v10  ;;  %v2745_v10 = vld [vmem:[%s5871_s15 + $0x18] sm:$0xff] }
0x1f0e   :  { %v2440_v30 = vmul.f32 1.442695, %v2439_v56  ;;  %v4173_v13 = vpack.c.bf16 %v2745_v10, %v2744_v40  ;;  %v2748_v56 = vld [vmem:[%s5871_s15 + $0x30] sm:$0xff] }
0x1f0f   :  { %4488 = vpow2.f32 %v2434_v1  ;;  %v2752_v1 = vld [vmem:[%s5872_s16 + $0x10] sm:$0xff] }
0x1f10   :  { %4490 = vtanh.f32 %v2432_v43  ;;  %v2753_v43 = vld [vmem:[%s5872_s16 + $0x18] sm:$0xff] }
0x1f19   :  { %v4489_v37 = vpop.eup %4488 }
0x1f1a   :  { %v2436_v2 = vadd.f32 1.0, %v4489_v37  ;;  %v4491_v52 = vpop.eup %4490  ;;  %v4185_v37 = vpack.c.bf16 %v2753_v43, %v2752_v1 }
0x1f1c   :  { %4492 = vrcp.f32 %v2436_v2  ;;  %v2746_v2 = vld [vmem:[%s5871_s15 + $0x20] sm:$0xff] }
0x1f1d   :  { %4494 = vpow2.f32 %v2440_v30  ;;  %v2749_v30 = vld [vmem:[%s5871_s15 + $0x38] sm:$0xff] }
0x1f26   :  { %v4493_v44 = vpop.eup %4492 }
0x1f27   :  { %v2448_v24 = vmul.f32 %v4493_v44, %v4491_v52  ;;  %v2447_v26 = vmul.f32 %v4493_v44, %v2445_v7  ;;  %v4495_v25 = vpop.eup %4494  ;;  %v2747_v52 = vld [vmem:[%s5871_s15 + $0x28] sm:$0xff]  ;;  %v2754_v7 = vld [vmem:[%s5872_s16 + $0x20] sm:$0xff]  ;;  %s4709_s15 = smov 32  }
0x1f28   :  { %v2442_v11 = vadd.f32 1.0, %v4495_v25  ;;  %v4176_v44 = vpack.c.bf16 %v2747_v52, %v2746_v2  ;;  %v2756_v25 = vld [vmem:[%s5872_s16 + $0x30] sm:$0xff] }
0x1f29   :  { %2450 = vrot.lane.b32.xlu1 %v2448_v24, %s5925_s30  ;;  %v2755_v24 = vld [vmem:[%s5872_s16 + $0x28] sm:$0xff] }
0x1f2a   :  { %4496 = vrcp.f32 %v2442_v11  ;;  %v4179_v11 = vpack.c.bf16 %v2749_v30, %v2748_v56  ;;  %v3438_v56 = vld [vmem:[%s5878_s22 + $0x80] sm:$0xff]  ;;  %v3439_v30 = vld [vmem:[%s5878_s22 + $0x88] sm:$0xff] }
0x1f2d   :  { %1869 = vrot.lane.b32.xlu1 %v5449_v33, %s5925_s30 }
0x1f31   :  { %2227 = vrot.lane.b32.xlu1 %v5503_v57, %s5925_s30 }
0x1f34   :  { %v4497_v16 = vpop.eup %4496 }
0x1f9b   :  { %v2451_v17 = vpop.permute.xlu1 %2450 }
0x1f9c   :  { %v2453_v46 = vadd.f32 %v2451_v17, %v2447_v26  ;;  %v4188_v26 = vpack.c.bf16 %v2755_v24, %v2754_v7  ;;  %v2757_v17 = vld [vmem:[%s5872_s16 + $0x38] sm:$0xff] }
0x1f9e   :  { %4498 = vtanh.f32 %v2453_v46  ;;  %v4191_v46 = vpack.c.bf16 %v2757_v17, %v2756_v25  ;;  %v3422_v25 = vld [vmem:[%s5878_s22] sm:$0xff]  ;;  %v3423_v17 = vld [vmem:[%s5878_s22 + $0x8] sm:$0xff] }
0x1f9f   :  { %v1870_v47 = vpop.permute.xlu1 %1869 }
0x1fa0   :  { %1873 = vst.msk [vmem:[#allocation3 - $0x2] sm:$0x10] %vm1872_vm8, %v1870_v47  ;;  %vm3419_vm8 = vcmask 1040384  }
0x1fa1   :  { %1875 = vst.msk [vmem:[#allocation3 + $0x1] sm:$0x10] %vm1874_vm9, %v1870_v47 }
0x1fa2   :  { %1877 = vst.msk [vmem:[#allocation3 - $0x3] sm:$0x20] %vm1876_vm0, %v5449_v33  ;;  %vm4705_vm0 = vmmov 0  }
0x1fa3   :  { %1879 = vst.msk [vmem:[#allocation3] sm:$0x20] %vm1878_vm3, %v5449_v33  ;;  %v2228_v50 = vpop.permute.xlu1 %2227  ;;  %3762 = vmatprep.mubr.msk.f32.mxu0 %vm4705_vm0, %v4704_v12  ;;  %3767 = vmatprep.mubr.msk.f32.mxu1 %vm4705_vm0, %v4704_v12  ;;  %vm2483_vm3 = vcmask 64512  }
0x1fa4   :  { %2230 = vst.msk [vmem:[#allocation3 + $0x3] sm:$0x4] %vm1753_vm14, %v2228_v50  ;;  %vm5932_vm14 = vmmov %vm5929_vm11 }
0x1fa5   :  { %2231 = vst.msk [vmem:[#allocation3] sm:$0x4] %vm1755_vm15, %v2228_v50  ;;  %vm3051_vm15 = vcmask 261120  }
0x1fa6   :  { %2232 = vst.msk [vmem:[#allocation3 + $0x2] sm:$0x8] %vm1757_vm1, %v5503_v57  ;;  %vm3054_vm1 = vcmask 1048064  }
0x1fa7   :  { %2233 = vst.msk [vmem:[#allocation3 - $0x1] sm:$0x8] %vm1759_vm2, %v5503_v57  ;;  %v2706_v57 = vld [vmem:[%s5867_s11] sm:$0xf]  ;;  %vm3082_vm2 = vcmask 31744  }
0x1fa8   :  { %v4499_v51 = vpop.eup %4498 }
0x1fa9   :  { %v2455_v34 = vmul.f32 %v4499_v51, %v4497_v16 }
0x1fab   :  { %2457 = vrot.lane.b32.xlu1 %v2455_v34, %s5925_s30 }
0x201d   :  { %v2458_v33 = vpop.permute.xlu1 %2457 }
0x201e   :  { %2460 = vst.msk [vmem:[#allocation3 + $0x1] sm:$0x40] %vm1991_vm4, %v2458_v33  ;;  %vm5933_vm4 = vmmov %vm5929_vm11 }
0x201f   :  { %2461 = vst.msk [vmem:[#allocation3 - $0x6] sm:$0x40] %vm1993_vm5, %v2458_v33  ;;  %vm5934_vm5 = vmmov %vm5933_vm4 }
0x2020   :  { %2462 = vst.msk [vmem:[#allocation3] sm:$0x80] %vm1995_vm6, %v2455_v34  ;;  %vm3382_vm6 = vcmask 785408   ;;  %vm5936_vm9 = vmmov %vm5933_vm4 }
0x2021   :  { %2463 = vst.msk [vmem:[#allocation3 - $0x7] sm:$0x80] %vm1997_vm7, %v2455_v34  ;;  %vm5935_vm7 = vmmov %vm5933_vm4 }
0x2028   :  { %v2464_v19 = vld [vmem:[#allocation3] sm:$0xff] }
0x2029   :  { %2473 = vrot.lane.b32.xlu1 %v2464_v19, %s4706_s0  ;;  %2466 = vrot.lane.b32.xlu0 %v2464_v19, %s4707_s5 }
0x202a   :  { %3761 = vmatpush3.msra.mxu0 %v2464_v19 }
0x202b   :  { %3763 = vmatmul.mubr.msk.f32.vlgmr.msra.gmra.mrb[22].mxu0 %vm2483_vm3, %v2482_v22  ;;  %3770 = vmatprep.subr.mxu0 %v4704_v12 }
0x202c   :  { %3772 = vmatprep.mubr.msk.f32.mxu0 %vm4705_vm0, %v4704_v12 }
0x202d   :  { %2709 = vperm.xlu0 %4276, %v2706_v57  }
0x209b   :  { %v2474_v60 = vpop.permute.xlu1 %2473  ;;  %v2467_v36 = vpop.permute.xlu0 %2466 }
0x209c   :  { %v2479_v9 = vmul.f32 %v2478_v54, %v2474_v60  ;;  %v2472_v42 = vmul.f32 %v2471_v62, %v2467_v36 }
0x209e   :  { %3766 = vmatpush3.msra.mxu1 %v2472_v42  ;;  %3771 = vmatpush3.msra.mxu0 %v2479_v9 }
0x209f   :  { %3768 = vmatmul.mubr.msk.f32.vlgmr.msra.gmra.mrb[26].mxu1 %vm2483_vm3, %v2480_v14  ;;  %3773 = vmatmul.mubr.msk.f32.vlgmr.msra.gmra.mrb[24].mxu0 %vm2483_vm3, %v2631_v63 }
0x20a0   :  { %3791 = vmatprep.mubr.msk.f32.mxu1 %vm4705_vm0, %v4704_v12  ;;  %3810 = vmatprep.mubr.msk.f32.mxu0 %vm4705_vm0, %v4704_v12 }
0x20a1   :  { %4169 = vmatprep.subr.bf16.mxu1 %v4708_v61  ;;  %4181 = vmatprep.subr.bf16.mxu0 %v4708_v61 }
0x20a2   :  { %4171 = vmatpush3.bf16.msra.mxu1 %v4170_v41  ;;  %4183 = vmatpush3.bf16.msra.mxu0 %v4182_v38 }
0x20a3   :  { %4172 = vmatprep.subr.bf16.mxu1 %v4708_v61  ;;  %4184 = vmatprep.subr.bf16.mxu0 %v4708_v61 }
0x20a6   :  { %4174 = vmatpush3.bf16.msra.mxu1 %v4173_v13  ;;  %4186 = vmatpush3.bf16.msra.mxu0 %v4185_v37 }
0x20a7   :  { %4175 = vmatprep.subr.bf16.mxu1 %v4708_v61  ;;  %4187 = vmatprep.subr.bf16.mxu0 %v4708_v61 }
0x20aa   :  { %4177 = vmatpush3.bf16.msra.mxu1 %v4176_v44  ;;  %4189 = vmatpush3.bf16.msra.mxu0 %v4188_v26 }
0x20ab   :  { %4178 = vmatprep.subr.bf16.mxu1 %v4708_v61  ;;  %4190 = vmatprep.subr.bf16.mxu0 %v4708_v61 }
0x20ac   :  { %v2710_v20 = vpop.permute.xlu0 %2709 }
0x20ae   :  { %4180 = vmatpush3.bf16.msra.mxu1 %v4179_v11  ;;  %4192 = vmatpush3.bf16.msra.mxu0 %v4191_v46 }
0x20af   :  { %4193 = vmatprep.subr.bf16.mxu1 %v4708_v61  ;;  %4205 = vmatprep.subr.bf16.mxu0 %v4708_v61 }
0x20fe   :  { %v2553_v45 = vpop.f32.mrb[22].mxu0 }
0x20ff   :  { %v3764_v0 = vpop.f32.mrb[23].mxu0 }
0x2172   :  { %v2626_v3 = vpop.f32.mrb[26].mxu1  ;;  %v2701_v4 = vpop.f32.mrb[24].mxu0 }
0x2173   :  { %v2627_v18 = vadd.f32 %v2626_v3, %v2553_v45  ;;  %v3769_v5 = vpop.f32.mrb[27].mxu1  ;;  %v3774_v6 = vpop.f32.mrb[25].mxu0 }
0x2175   :  { %v2705_v8 = vadd.f32 %v2701_v4, %v2627_v18  ;;  %v3053_v4 = vld [vmem:[%s5877_s21] sm:$0x3]  ;;  %s5939_s21 = sld [smem:[#allocation33_spill]] }
0x2176   :  { %v3064_v6 = vrot.slane %v3053_v4, %v5049_v48 }
0x2177   :  { %v2712_v15 = vadd.f32 %v2710_v20, %v2705_v8 }
0x2179   :  { %v2714_v59 = vsel %vm2713_vm10, %v2712_v15, 0.0 }
0x217a   :  { %2715 = vadd.xlane.f32.xlu1 %v2714_v59  ;;  %v3663_v59 = vld [vmem:[%s5873_s17 + $0x8] sm:$0xff] }
0x218b   :  { %2737 = vperm.xlu1 %4277, %v2734_v21  }
0x2207   :  { %v2716_v23 = vpop.xlane.xlu1 %2715 }
0x2208   :  { %v2717_v58 = vmul.f32 0.0078125, %v2716_v23 }
0x220a   :  { %v2718_v55 = vsub.f32 %v2712_v15, %v2717_v58  ;;  %v3073_v15 = vrot.slane %v3053_v4, %v5051_v49  ;;  %v3430_v4 = vld [vmem:[%s5878_s22 + $0x40] sm:$0xff] }
0x220b   :  { %v2738_v19 = vpop.permute.xlu1 %2737 }
0x220c   :  { %v2719_v28 = vmul.f32 %v2718_v55, %v2718_v55 }
0x220e   :  { %v2720_v29 = vsel %vm2713_vm10, %v2719_v28, 0.0  ;;  %v3318_v28 = vld [vmem:[%s5874_s18] sm:$0xff] }
0x220f   :  { %2721 = vadd.xlane.f32.xlu0 %v2720_v29  ;;  %v3079_v29 = vld [vmem:[%s5873_s17] sm:$0xff] }
0x2225   :  { %2730 = vperm.xlu0 %4276, %v2727_v31  }
0x229c   :  { %v2722_v47 = vpop.xlane.xlu0 %2721 }
0x229d   :  { %v2723_v50 = vmul.f32 0.0078125, %v2722_v47  ;;  %v3441_v47 = vld [vmem:[%s5878_s22 + $0x98] sm:$0xff] }
0x229f   :  { %v2724_v16 = vadd.f32 1e-05, %v2723_v50  ;;  %v4219_v50 = vpack.c.bf16 %v3423_v17, %v3422_v25 }
0x22a1   :  { %4500 = vrsqrt.f32 %v2724_v16 }
0x22a4   :  { %v2731_v33 = vpop.permute.xlu0 %2730 }
0x22ab   :  { %v4501_v51 = vpop.eup %4500 }
0x22ac   :  { %v2726_v34 = vmul.f32 %v4501_v51, %v2718_v55  ;;  %v3424_v51 = vld [vmem:[%s5878_s22 + $0x10] sm:$0xff] }
0x22ae   :  { %v2733_v22 = vmul.f32 %v2731_v33, %v2726_v34  ;;  %v3425_v34 = vld [vmem:[%s5878_s22 + $0x18] sm:$0xff]  ;;  %v3442_v33 = vld [vmem:[%s5878_s22 + $0xa0] sm:$0xff] }
0x22b0   :  { %v2740_v57 = vadd.f32 %v2738_v19, %v2733_v22  ;;  %v3443_v19 = vld [vmem:[%s5878_s22 + $0xa8] sm:$0xff]  ;;  %v4223_v22 = vpack.c.bf16 %v3425_v34, %v3424_v51 }
0x22b2   :  { %v2741_v53 = vmax.f32 %v2740_v57, 0.0  ;;  %v4225_v57 = vpack.c.bf16 %v3443_v19, %v3442_v33 }
0x22b4   :  { %2902 = vrot.lane.b32.xlu1 %v2741_v53, %s5925_s30  ;;  %3792 = vmatmul.mubr.msk.f32.vlgmr.msra.gmra.mrb[28].mxu1 %vm5929_vm11, %v2741_v53  ;;  %vm3614_vm11 = vcmask 123904  }
0x22b5   :  { %3811 = vmatmul.mubr.msk.f32.vlgmr.msra.gmra.mrb[26].mxu0 %vm5930_vm12, %v2741_v53  ;;  %4195 = vmatpush3.bf16.msra.mxu1 %v4170_v41  ;;  %v3426_v53 = vld [vmem:[%s5878_s22 + $0x20] sm:$0xff] }
0x22b6   :  { %4207 = vmatpush3.bf16.msra.mxu0 %v4182_v38  ;;  %4196 = vmatprep.subr.bf16.mxu1 %v4708_v61 }
0x22b7   :  { %4208 = vmatprep.subr.bf16.mxu0 %v4708_v61  ;;  %3829 = vmatprep.mubr.msk.f32.mxu1 %vm4705_vm0, %v4704_v12 }
0x22b8   :  { %3848 = vmatprep.mubr.msk.f32.mxu0 %vm4705_vm0, %v4704_v12 }
0x22b9   :  { %4198 = vmatpush3.bf16.msra.mxu1 %v4173_v13 }
0x22ba   :  { %4210 = vmatpush3.bf16.msra.mxu0 %v4185_v37  ;;  %4199 = vmatprep.subr.bf16.mxu1 %v4708_v61 }
0x22bb   :  { %4211 = vmatprep.subr.bf16.mxu0 %v4708_v61 }
0x22bd   :  { %4201 = vmatpush3.bf16.msra.mxu1 %v4176_v44 }
0x22be   :  { %4213 = vmatpush3.bf16.msra.mxu0 %v4188_v26  ;;  %4202 = vmatprep.subr.bf16.mxu1 %v4708_v61  ;;  %v3345_v26 = vld [vmem:[%s5876_s20] sm:$0xff] }
0x22bf   :  { %4214 = vmatprep.subr.bf16.mxu0 %v4708_v61 }
0x22c1   :  { %4204 = vmatpush3.bf16.msra.mxu1 %v4179_v11  ;;  %v4217_v11 = vpack.c.bf16 %v3439_v30, %v3438_v56 }
0x22c2   :  { %4216 = vmatpush3.bf16.msra.mxu0 %v4191_v46  ;;  %3851 = vmatprep.subr.mxu1 %v4704_v12  ;;  %v3440_v46 = vld [vmem:[%s5878_s22 + $0x90] sm:$0xff] }
0x22c3   :  { %3856 = vmatprep.subr.mxu0 %v4704_v12  ;;  %v4221_v16 = vpack.c.bf16 %v3441_v47, %v3440_v46 }
0x2326   :  { %v2903_v54 = vpop.permute.xlu1 %2902 }
0x2327   :  { %3830 = vmatmul.mubr.msk.f32.vlgmr.msra.gmra.mrb[30].mxu1 %vm5931_vm13, %v2903_v54  ;;  %3849 = vmatmul.mubr.msk.f32.vlgmr.msra.gmra.mrb[28].mxu0 %vm5932_vm14, %v2903_v54  ;;  %v3427_v54 = vld [vmem:[%s5878_s22 + $0x28] sm:$0xff] }
0x2328   :  { %3853 = vmatprep.mubr.msk.f32.mxu1 %vm4705_vm0, %v4704_v12  ;;  %3858 = vmatprep.mubr.msk.f32.mxu0 %vm4705_vm0, %v4704_v12 }
0x2387   :  { %v2827_v62 = vpop.f32.mrb[28].mxu1 }
0x2388   :  { %v2897_v60 = vpop.f32.mrb[26].mxu0  ;;  %v3793_v36 = vpop.f32.mrb[29].mxu1 }
0x2389   :  { %v2901_v9 = vmax.f32 %v2827_v62, %v2897_v60  ;;  %v3812_v42 = vpop.f32.mrb[27].mxu0  ;;  %v3444_v62 = vld [vmem:[%s5878_s22 + $0xb0] sm:$0xff]  ;;  %v3445_v60 = vld [vmem:[%s5878_s22 + $0xb8] sm:$0xff]  ;;  %v4227_v36 = vpack.c.bf16 %v3427_v54, %v3426_v53 }
0x238a   :  { %v3428_v42 = vld [vmem:[%s5878_s22 + $0x30] sm:$0xff] }
0x23fa   :  { %v2972_v14 = vpop.f32.mrb[30].mxu1  ;;  %v3042_v63 = vpop.f32.mrb[28].mxu0 }
0x23fb   :  { %v3046_v45 = vmax.f32 %v2972_v14, %v3042_v63  ;;  %v3831_v0 = vpop.f32.mrb[31].mxu1  ;;  %v3850_v3 = vpop.f32.mrb[29].mxu0  ;;  %v3429_v14 = vld [vmem:[%s5878_s22 + $0x38] sm:$0xff]  ;;  %v3446_v63 = vld [vmem:[%s5878_s22 + $0xc0] sm:$0xff] }
0x23fc   :  { %v4231_v0 = vpack.c.bf16 %v3429_v14, %v3428_v42 }
0x23fd   :  { %3048 = vrot.lane.b32.xlu0 %v3046_v45, %s4709_s15  ;;  %v3447_v45 = vld [vmem:[%s5878_s22 + $0xc8] sm:$0xff] }
0x23fe   :  { %v4233_v3 = vpack.c.bf16 %v3447_v45, %v3446_v63 }
0x246f   :  { %v3049_v18 = vpop.permute.xlu0 %3048 }
0x2470   :  { %v3052_v5 = vsel %vm3051_vm15, %v2901_v9, %v3049_v18  ;;  %v4229_v9 = vpack.c.bf16 %v3445_v60, %v3444_v62  ;;  %v3431_v18 = vld [vmem:[%s5878_s22 + $0x48] sm:$0xff] }
0x2471   :  { %3055 = vrot.lane.b32.xlu1 %v3052_v5, %s5925_s30  ;;  %3852 = vmatpush3.msk.msra.mxu1 %vm2713_vm10, %v3052_v5 }
0x2472   :  { %3861 = vmatprep.subr.mxu1 %v4704_v12  ;;  %3854 = vmatmul.mubr.msk.f32.vlgmr.msra.gmra.mrb[32].mxu1 %vm3082_vm2, %v3663_v59  ;;  %v3448_v59 = vld [vmem:[%s5878_s22 + $0xd0] sm:$0xff] }
0x2473   :  { %3863 = vmatprep.mubr.msk.f32.mxu1 %vm4705_vm0, %v4704_v12 }
0x2475   :  { %3066 = vrot.lane.b32.xlu1 %v3064_v6, %s4710_s23 }
0x24e3   :  { %v3056_v8 = vpop.permute.xlu1 %3055 }
0x24e4   :  { %v3057_v20 = vsel %vm3054_vm1, %v3056_v8, %v3052_v5 }
0x24e5   :  { %3058 = vrot.lane.b32.xlu0 %v3057_v20, %s5925_s30 }
0x24e7   :  { %v3067_v48 = vpop.permute.xlu1 %3066 }
0x24e9   :  { %3075 = vrot.lane.b32.xlu0 %v3073_v15, %s4707_s5  ;;  %s4713_s5 = smov [#allocation16]  }
0x24ea   :  { %s3622_s14 = sshll.u32 %s4713_s5, 4  ;;  %s3623_s14 = int_to_ptr.vmem [resolvable:$true] %s3622_s14 }
0x24eb   :  { %p4663_p1 = scmp.lt.s32.totalorder %s3623_s14, %s3623_s14 }
0x2545   :  { %v3155_v27 = vpop.f32.mrb[32].mxu1 }
0x2546   :  { %v3855_v41 = vpop.f32.mrb[33].mxu1 }
0x2557   :  { %v3059_v21 = vpop.permute.xlu0 %3058 }
0x2558   :  { %v3060_v23 = vsel %vm3054_vm1, %v3059_v21, %v3052_v5  ;;  %v4235_v5 = vpack.c.bf16 %v3431_v18, %v3430_v4 }
0x2559   :  { %v3069_v58 = vmul.f32 %v3067_v48, %v3060_v23  ;;  %v3449_v48 = vld [vmem:[%s5878_s22 + $0xd8] sm:$0xff] }
0x255b   :  { %v3076_v55 = vpop.permute.xlu0 %3075  ;;  %3160 = vrot.lane.b32.xlu1 %v3069_v58, %s4711_s25  ;;  %v3432_v58 = vld [vmem:[%s5878_s22 + $0x50] sm:$0xff] }
0x255c   :  { %v3078_v49 = vmul.f32 %v3076_v55, %v3060_v23  ;;  %v4237_v23 = vpack.c.bf16 %v3449_v48, %v3448_v59  ;;  %v3433_v55 = vld [vmem:[%s5878_s22 + $0x58] sm:$0xff] }
0x255e   :  { %3240 = vrot.lane.b32.xlu0 %v3078_v49, %s4706_s0 }
0x255f   :  { %3321 = vperm.xlu1 %4277, %v3318_v28   ;;  %v4239_v28 = vpack.c.bf16 %v3433_v55, %v3432_v58 }
0x25cd   :  { %v3161_v31 = vpop.permute.xlu1 %3160 }
0x25ce   :  { %3857 = vmatpush3.msk.msra.mxu0 %vm2713_vm10, %v3161_v31 }
0x25cf   :  { %3859 = vmatmul.mubr.msk.f32.vlgmr.msra.gmra.mrb[30].mxu0 %vm3082_vm2, %v3079_v29  ;;  %4218 = vmatprep.subr.bf16.mxu0 %v4217_v11 }
0x25d0   :  { %v3241_v35 = vpop.permute.xlu0 %3240  ;;  %4220 = vmatpush3.bf16.msra.mxu0 %v4219_v50 }
0x25d1   :  { %3862 = vmatpush3.msk.msra.mxu1 %vm2713_vm10, %v3241_v35  ;;  %4222 = vmatprep.subr.bf16.mxu0 %v4221_v16  ;;  %v3451_v35 = vld [vmem:[%s5878_s22 + $0xe8] sm:$0xff]  ;;  %vm5940_vm10 = vcmask 130048  }
0x25d2   :  { %3864 = vmatmul.mubr.msk.f32.vlgmr.msra.gmra.mrb[34].mxu1 %vm3082_vm2, %v3668_v32  ;;  %4249 = vmatprep.subr.bf16.mxu1 %v4708_v61  ;;  %v3338_v61 = vld [vmem:[%s5875_s19] sm:$0xff] }
0x25d3   :  { %3870 = vmatprep.mubr.msk.f32.mxu1 %vm4705_vm0, %v4704_v12  ;;  %v3450_v32 = vld [vmem:[%s5878_s22 + $0xe0] sm:$0xff]  ;;  %vm5937_vm0 = vmmov %vm5933_vm4 }
0x25d4   :  { %4224 = vmatpush3.bf16.msra.mxu0 %v4223_v22  ;;  %v4241_v41 = vpack.c.bf16 %v3451_v35, %v3450_v32  ;;  %vm5938_vm3 = vmmov %vm5937_vm0  ;;  %v3671_v35 = vld [vmem:[%s5939_s21] ss:$0 sm:$0xff] }
0x25d5   :  { %4226 = vmatprep.subr.bf16.mxu0 %v4225_v57 }
0x25d8   :  { %4228 = vmatpush3.bf16.msra.mxu0 %v4227_v36 }
0x25d9   :  { %4230 = vmatprep.subr.bf16.mxu0 %v4229_v9 }
0x25dc   :  { %4232 = vmatpush3.bf16.msra.mxu0 %v4231_v0 }
0x25dd   :  { %4234 = vmatprep.subr.bf16.mxu0 %v4233_v3 }
0x25de   :  { %v3322_v43 = vpop.permute.xlu1 %3321 }
0x25e0   :  { %4236 = vmatpush3.bf16.msra.mxu0 %v4235_v5 }
0x25e1   :  { %4238 = vmatprep.subr.bf16.mxu0 %v4237_v23 }
0x25e4   :  { %4240 = vmatpush3.bf16.msra.mxu0 %v4239_v28  ;;  %v3532_v28 = vld [vmem:[%s5880_s24] sm:$0xff] }
0x25e5   :  { %4242 = vmatprep.subr.bf16.mxu0 %v4241_v41 }
0x26a2   :  { %v3233_v39 = vpop.f32.mrb[30].mxu0 }
0x26a3   :  { %v3234_v38 = vadd.f32 %v3233_v39, %v3155_v27  ;;  %v3860_v40 = vpop.f32.mrb[31].mxu0  ;;  %v3434_v39 = vld [vmem:[%s5878_s22 + $0x60] sm:$0xff] }
0x26a5   :  { %v3313_v10 = vpop.f32.mrb[34].mxu1 }
0x26a6   :  { %v3317_v1 = vadd.f32 %v3313_v10, %v3234_v38  ;;  %v3865_v13 = vpop.f32.mrb[35].mxu1  ;;  %v3435_v38 = vld [vmem:[%s5878_s22 + $0x68] sm:$0xff] }
0x26a7   :  { %v4243_v40 = vpack.c.bf16 %v3435_v38, %v3434_v39  ;;  %v3453_v13 = vld [vmem:[%s5878_s22 + $0xf8] sm:$0xff] }
0x26a8   :  { %v3324_v37 = vadd.f32 %v3322_v43, %v3317_v1  ;;  %v3452_v1 = vld [vmem:[%s5878_s22 + $0xf0] sm:$0xff] }
0x26a9   :  { %4244 = vmatpush3.bf16.msra.mxu0 %v4243_v40  ;;  %v3672_v40 = vld [vmem:[%s5941_s8] ss:$0 sm:$0xff] }
0x26aa   :  { %v3325_v2 = vsel %vm5933_vm4, %v3324_v37, 0.0 }
0x26ab   :  { %3326 = vadd.xlane.f32.xlu0 %v3325_v2 }
0x26c1   :  { %3341 = vperm.xlu0 %4276, %v3338_v61   ;;  %v3436_v61 = vld [vmem:[%s5878_s22 + $0x70] sm:$0xff] }
0x2738   :  { %v3327_v52 = vpop.xlane.xlu0 %3326 }
0x2739   :  { %v3328_v12 = vmul.f32 0.015625, %v3327_v52  ;;  %v3437_v52 = vld [vmem:[%s5878_s22 + $0x78] sm:$0xff] }
0x273a   :  { %v4247_v30 = vpack.c.bf16 %v3437_v52, %v3436_v61 }
0x273b   :  { %v3329_v7 = vsub.f32 %v3324_v37, %v3328_v12 }
0x273d   :  { %v3330_v44 = vmul.f32 %v3329_v7, %v3329_v7 }
0x273f   :  { %v3331_v24 = vsel %vm5934_vm5, %v3330_v44, 0.0  ;;  %v4245_v44 = vpack.c.bf16 %v3453_v13, %v3452_v1 }
0x2740   :  { %3332 = vadd.xlane.f32.xlu1 %v3331_v24  ;;  %v3342_v49 = vpop.permute.xlu0 %3341 }
0x2741   :  { %4246 = vmatprep.subr.bf16.mxu0 %v4245_v44 }
0x2742   :  { %4248 = vmatpush3.bf16.msra.mxu0 %v4247_v30 }
0x2751   :  { %3348 = vperm.xlu1 %4277, %v3345_v26  }
0x27cd   :  { %v3333_v6 = vpop.xlane.xlu1 %3332 }
0x27ce   :  { %v3334_v8 = vmul.f32 0.015625, %v3333_v6 }
0x27d0   :  { %v3335_v20 = vadd.f32 1e-05, %v3334_v8 }
0x27d1   :  { %v3349_v31 = vpop.permute.xlu1 %3348 }
0x27d2   :  { %4502 = vrsqrt.f32 %v3335_v20 }
0x27dc   :  { %v4503_v15 = vpop.eup %4502 }
0x27dd   :  { %v3337_v21 = vmul.f32 %v4503_v15, %v3329_v7 }
0x27df   :  { %v3344_v29 = vmul.f32 %v3342_v49, %v3337_v21 }
0x27e1   :  { %v3351_v27 = vadd.f32 %v3349_v31, %v3344_v29  ;;  %v3533_v29 = vld [vmem:[%s5880_s24 + $0x8] sm:$0xff]  ;;  %s4658_s24 = scalar_lea.vmem %s3623_s14, 32 }
0x27e2   :  { %v4250_v31 = vpack.c.bf16 %v3533_v29, %v3532_v28  ;;  %p4659_p0 = scmp.ne.s32.totalorder %s3623_s14, %s4658_s24  ;;  %p4664_p2 = scmp.lt.s32.totalorder %s4658_s24, %s4658_s24 }
0x27e3   :  { %v3352_v10 = vmax.f32 %v3351_v27, 0.0 }
0x27e4   :  { %4251 = vmatpush3.bf16.msra.mxu1 %v4250_v31  ;;  %p4665_p3 = por %p4664_p2, %p4663_p1 }
0x27e5   :  { %v3368_v43 = vrot.slane %v3352_v10, 5  ;;  %v3372_v37 = vrot.slane %v3352_v10, 6  ;;  %v3366_v2 = vrot.slane %v3352_v10, 4  ;;  %v3376_v12 = vrot.slane %v3352_v10, 7 }
0x27e6   :  { %v3354_v7 = vrot.slane %v3352_v10, 1  ;;  %v3358_v56 = vrot.slane %v3352_v10, 2  ;;  %v3362_v17 = vrot.slane %v3352_v10, 3  ;;  %p4666_p4 = pnand %p4665_p3, %p4659_p0 }
0x27e7   :  { %v4283_v24 = vpack.i.bf16 %v3368_v43, %v3372_v37  ;;  %v4278_v26 = vpack.i.bf16 %v3352_v10, %v3366_v2  ;;  %v4293_v25 = vpack.i.bf16 %v3372_v37, %v3376_v12 }
0x27e8   :  { %v4288_v11 = vpack.i.bf16 %v3354_v7, %v3358_v56  ;;  %v4303_v46 = vpack.i.bf16 %v3362_v17, %v3376_v12  ;;  %v4298_v47 = vpack.i.bf16 %v3358_v56, %v3362_v17 }
0x27e9   :  { %4284 = vrot.lane.b32.xlu1 %v4283_v24, %s4709_s15  ;;  %4279 = vrot.lane.b32.xlu0 %v4278_v26, %s4712_s1 }
0x27ed   :  { %4294 = vrot.lane.b32.xlu1 %v4293_v25, %s5925_s30  ;;  %4289 = vrot.lane.b32.xlu0 %v4288_v11, %s4709_s15 }
0x27f1   :  { %4304 = vrot.lane.b32.xlu1 %v4303_v46, %s4712_s1  ;;  %4299 = vrot.lane.b32.xlu0 %v4298_v47, %s5925_s30 }
0x285b   :  { %v4285_v50 = vpop.permute.xlu1 %4284  ;;  %v4280_v16 = vpop.permute.xlu0 %4279 }
0x285c   :  { %v4281_v51 = vunpack.i.l.bf16 %v4280_v16  ;;  %v4286_v34 = vunpack.i.l.bf16 %v4285_v50  ;;  %v4287_v19 = vunpack.i.h.bf16 %v4285_v50  ;;  %v4282_v22 = vunpack.i.h.bf16 %v4280_v16 }
0x285e   :  { %v3410_v33 = vsel %vm3051_vm15, %v4281_v51, %v3368_v43  ;;  %v3384_v14 = vsel %vm3051_vm15, %v3366_v2, %v4287_v19  ;;  %v3407_v63 = vsel %vm3051_vm15, %v4282_v22, %v3354_v7 }
0x285f   :  { %v4295_v57 = vpop.permute.xlu1 %4294  ;;  %v4290_v53 = vpop.permute.xlu0 %4289  ;;  %v3411_v60 = vsel %vm5935_vm7, %v3410_v33, %v4286_v34 }
0x2860   :  { %v4296_v54 = vunpack.i.l.bf16 %v4295_v57  ;;  %v4297_v62 = vunpack.i.h.bf16 %v4295_v57  ;;  %v4292_v36 = vunpack.i.h.bf16 %v4290_v53  ;;  %v4291_v9 = vunpack.i.l.bf16 %v4290_v53 }
0x2862   :  { %v3412_v42 = vsel %vm3382_vm6, %v3411_v60, %v4296_v54  ;;  %v3380_v6 = vsel %vm3051_vm15, %v3352_v10, %v4292_v36  ;;  %v3408_v8 = vsel %vm5936_vm9, %v3407_v63, %v4291_v9  ;;  %v3385_v20 = vsel %vm5937_vm0, %v3384_v14, %v4297_v62 }
0x2863   :  { %v4305_v45 = vpop.permute.xlu1 %4304  ;;  %v4300_v0 = vpop.permute.xlu0 %4299  ;;  %v3416_v15 = vrot.slane %v3412_v42, 7 }
0x2864   :  { %v4307_v3 = vunpack.i.h.bf16 %v4305_v45  ;;  %v4306_v4 = vunpack.i.l.bf16 %v4305_v45  ;;  %v4302_v18 = vunpack.i.h.bf16 %v4300_v0  ;;  %v4301_v5 = vunpack.i.l.bf16 %v4300_v0 }
0x2866   :  { %v3381_v59 = vsel %vm5938_vm3, %v3380_v6, %v4302_v18  ;;  %v3409_v48 = vsel %vm3382_vm6, %v3408_v8, %v4301_v5  ;;  %v3386_v21 = vsel %vm3382_vm6, %v3385_v20, %v4306_v4 }
0x2867   :  { %v3415_v23 = vrot.slane %v3409_v48, 7  ;;  %v3421_v58 = vsel %vm3419_vm8, %v3386_v21, %v3416_v15  ;;  %v3383_v55 = vsel %vm3382_vm6, %v3381_v59, %v4307_v3 }
0x2868   :  { %3525 = vmatprep.mubr.f32.mxu0 %v3421_v58 }
0x2869   :  { %v3420_v49 = vsel %vm3419_vm8, %v3383_v55, %v3415_v23 }
0x286a   :  { %3526 = vmatmul.mubr.f32.vlgmr.msra.gmra.mrb[32].mxu0 %v3420_v49 }
0x293d   :  { %v3754_v32 = vpop.f32.mrb[32].mxu0 }
0x293e   :  { %v3755_v27 = vpop.f32.mrb[33].mxu0 }
0x293f   :  { %v3756_v41 = vadd.f32 %v3755_v27, %v3754_v32 }
0x2941   :  { %v3528_v39 = vadd.f32 %v3756_v41, %v3671_v35 }
0x2943   :  { %v3531_v38 = vmax.f32 %v3528_v39, 0.0 }
0x2945   :  { %3871 = vmatmul.mubr.msk.f32.vlgmr.msra.gmra.mrb[36].mxu1 %vm5940_vm10, %v3531_v38 }
0x2a18   :  { %v3610_v10 = vpop.f32.mrb[36].mxu1 }
0x2a19   :  { %v3611_v1 = vadd.f32 %v3672_v40, %v3610_v10  ;;  %v3872_v13 = vpop.f32.mrb[37].mxu1 }
0x2a1b   :  { %3615 = vst.msk [vmem:[#allocation16] sm:$0x3] %vm3614_vm11, %v3611_v1 }
0x2a1c   :  { %4669 = shalt.err (!%p4666_p4)
}
0x2a1d   :  { %s5942_s13 = sld [smem:[#allocation35_spill]] }
0x2a23   :  { %s4670_s17 = scalar_lea.hbm %s5942_s13, 32 }
0x2a24   :  { %p4671_p5 = scmp.ne.s32.totalorder %s5942_s13, %s4670_s17  ;;  %p4674_p6 = scmp.lt.u32.totalorder %s4670_s17, %s5942_s13 }
0x2a26   :  { %p4676_p7 = pnand %p4674_p6, %p4671_p5 }
0x2a28   :  { %4679 = shalt.err (!%p4676_p7)
}
0x2a29   :  { %3625 = dma.vmem_to_hbm [thread:$0]  %s3623_s14, 32, %s5942_s13, [#allocation6]  }
0x2a2a   :  { %4688 = dma.done.wait [#allocation6], 32  }
0x2a2b   :  { %4689 = vsyncadd [#allocation6], 4294967264 }
0x2a2c   :  { %3629 = vsyncpa [#allocation5], 1 }
0x2a2d   :  { %3630 = vsyncpa [#allocation8], 1 }
0x2a2e   :  { %3631 = vsyncpa [#allocation11], 1 }
0x2a2f   :  { %3632 = vsyncpa [#allocation14], 1 }
0x2a30   :  { %3633 = vsyncpa [#allocation6], 1 }

</bundles_post_ra>
